<compile_context>
chip_gen: v5e
topology: v5e:2x2
jax: 0.10.0
libtpu: 0.0.40
codegen_flags: <defaults>
</compile_context>

<pallas_src>
import functools

import numpy as np
import jax
import jax.numpy as jnp
from jax import lax
from jax.experimental import pallas as pl
from jax.experimental.pallas import tpu as pltpu

_EPS = 1e-5

# Nearest x2 upsample folded into conv2: output pixel (2h+a, 2w+b) only reads
# h1[h+roff, w+coff] with roff/coff in {-1, 0, +1}.  _FOLD[a][roff] lists which
# original 3x3 tap indices (dy) collapse onto that offset (same table for dx/b).
_FOLD = {
    0: {-1: (0,), 0: (1, 2)},
    1: {0: (0, 1), 1: (2,)},
}


def _upblock_kernel(*refs, is_last, N, Cin, Cout, H, W):
    if is_last:
        (xp_ref, mask_ref, w1c_ref, g1_ref, bt1_ref,
         w2c_ref, b2_ref, o_ref, h1p_ref) = refs
        g2_ref = bt2_ref = None
    else:
        (xp_ref, mask_ref, w1c_ref, g1_ref, bt1_ref,
         w2c_ref, g2_ref, bt2_ref, o_ref, h1p_ref) = refs
        b2_ref = None

    PH, PW = H + 2, W + 2
    FLAT = PH * PW                 # flattened padded plane length (lane axis)
    MAR = PW + 1                   # max |shift| = one padded row + one column
    NS = Cin * N                   # packed sublane rows: sublane = ci*N + n
    BUFW = xp_ref.shape[1]
    inv_n1 = 1.0 / (N * H * W)         # BN1 element count per channel
    inv_n2 = 1.0 / (4 * N * H * W)     # BN2 element count per channel (4 phases)

    mask = mask_ref[...]                                   # (1, FLAT) interior mask
    offs = [(r, c) for r in (-1, 0, 1) for c in (-1, 0, 1)]
    shifts = [r * PW + c for (r, c) in offs]               # tap order = dy*3+dx

    # Zero only the halo margins of the h1 scratch (its FLAT window is fully
    # overwritten by stage 1).
    h1p_ref[:, 0:MAR] = jnp.zeros((NS, MAR), jnp.float32)
    rmar = BUFW - MAR - FLAT
    if rmar > 0:
        h1p_ref[:, MAR + FLAT:BUFW] = jnp.zeros((NS, rmar), jnp.float32)

    # ---- stage 1: conv1(3x3, same) + BN(batch stats) + ReLU ----
    # 9 shifted patches loaded once, shared by all output channels.
    taps1 = [xp_ref[:, MAR + s:MAR + s + FLAT] for s in shifts]   # 9 x (NS, FLAT)
    for co in range(Cin):
        wslab = w1c_ref[co]                                # (9*NS, 1) weight columns
        acc = taps1[0] * wslab[0:NS]
        for t in range(1, 9):
            acc = acc + taps1[t] * wslab[t * NS:(t + 1) * NS]
        # segmented sublane reduction over Cin (sublane = ci*N + n).
        red = acc[0:N]
        for ci in range(1, Cin):
            red = red + acc[ci * N:(ci + 1) * N]           # (N, FLAT)
        # b1 is cancelled by the batch-mean subtraction -> dropped.
        mean = jnp.sum(red * mask, keepdims=True) * inv_n1
        cen = red - mean
        var = jnp.sum(cen * cen * mask, keepdims=True) * inv_n1
        h1 = jnp.maximum(cen * lax.rsqrt(var + _EPS) * g1_ref[co] + bt1_ref[co], 0.0)
        # mask zeroes the halo ring so stage-2 'same' padding stays exact.
        h1p_ref[co * N:(co + 1) * N, MAR:MAR + FLAT] = h1 * mask

    # ---- stage 2: nearest x2 upsample folded into conv2 (4 output phases) ----
    taps2 = [h1p_ref[:, MAR + s:MAR + s + FLAT] for s in shifts]  # shared across co
    for co in range(Cout):
        slabs = [[w2c_ref[co * 4 + a * 2 + b] for b in range(2)] for a in range(2)]
        ph = [[None, None], [None, None]]
        for t, (roff, coff) in enumerate(offs):
            tap = taps2[t]
            for a in (0, 1):
                if roff not in _FOLD[a]:
                    continue
                for b in (0, 1):
                    if coff not in _FOLD[b]:
                        continue
                    contrib = tap * slabs[a][b][t * NS:(t + 1) * NS]
                    ph[a][b] = contrib if ph[a][b] is None else ph[a][b] + contrib
        # reduce over input channels for each phase
        red = [[None, None], [None, None]]
        for a in (0, 1):
            for b in (0, 1):
                r = ph[a][b][0:N]
                for ci in range(1, Cin):
                    r = r + ph[a][b][ci * N:(ci + 1) * N]
                red[a][b] = r                               # (N, FLAT)

        if is_last:
            for a in (0, 1):
                for b in (0, 1):
                    o_ref[co * 4 + a * 2 + b] = jnp.tanh(red[a][b] + b2_ref[co])
        else:
            # b2 cancelled by BN; merged stats over the 4 phases (one masked
            # reduction for the mean, one for the variance).
            psum = red[0][0] + red[0][1] + red[1][0] + red[1][1]
            mean = jnp.sum(psum * mask, keepdims=True) * inv_n2
            cen = [[red[a][b] - mean for b in (0, 1)] for a in (0, 1)]
            csq = (cen[0][0] * cen[0][0] + cen[0][1] * cen[0][1]
                   + cen[1][0] * cen[1][0] + cen[1][1] * cen[1][1])
            var = jnp.sum(csq * mask, keepdims=True) * inv_n2
            scale = lax.rsqrt(var + _EPS) * g2_ref[co]
            for a in (0, 1):
                for b in (0, 1):
                    o_ref[co * 4 + a * 2 + b] = jnp.maximum(
                        cen[a][b] * scale + bt2_ref[co], 0.0)


@functools.partial(jax.jit, static_argnames=("is_last",))
def up_block_forward(x_nchw, params, is_last=False):
    """Fused Pallas UpBlock forward.  Input/output are NCHW like PyTorch."""
    x = x_nchw.astype(jnp.float32)
    N, Cin, H, W = x.shape
    Cout = params["w2"].shape[0]
    PH, PW = H + 2, W + 2
    FLAT = PH * PW
    MAR = PW + 1
    NS = Cin * N
    BUFW = ((2 * MAR + FLAT + 127) // 128) * 128

    # Pack / pad / flatten the input: sublane = ci*N + n, lanes = flat padded (h, w),
    # plus MAR-wide zero margins so every shifted tap slice stays in-bounds.
    xp = jnp.transpose(x, (1, 0, 2, 3))                    # (Cin, N, H, W)
    xp = jnp.pad(xp, ((0, 0), (0, 0), (1, 1), (1, 1)))     # (Cin, N, PH, PW)
    xp = xp.reshape(NS, FLAT)
    xp = jnp.pad(xp, ((0, 0), (MAR, BUFW - MAR - FLAT)))   # (NS, BUFW)

    mask = (jnp.zeros((PH, PW), jnp.float32)
            .at[1:H + 1, 1:W + 1].set(1.0).reshape(1, FLAT))

    # conv1 per-sublane weight columns: row t*NS + (ci*N + n) = w1[co, ci, t].
    w1 = params["w1"].astype(jnp.float32)
    w1cols = jnp.repeat(jnp.transpose(w1.reshape(Cin, Cin, 9), (0, 2, 1)), N, axis=2)
    w1cols = w1cols.reshape(Cin, 9 * NS, 1)

    # folded conv2 weights (upsample fold precomputed on the host).
    w2 = params["w2"].astype(jnp.float32)
    fold = np.zeros((2, 2, 9, 3, 3), np.float32)
    for a in (0, 1):
        for roff, dys in _FOLD[a].items():
            for b in (0, 1):
                for coff, dxs in _FOLD[b].items():
                    t = (roff + 1) * 3 + (coff + 1)
                    for dy in dys:
                        for dx in dxs:
                            fold[a, b, t, dy, dx] = 1.0
    kfold = jnp.einsum('abtyx,oiyx->oabti', jnp.asarray(fold), w2)  # (Cout,2,2,9,Cin)
    w2cols = jnp.repeat(kfold, N, axis=-1).reshape(Cout * 4, 9 * NS, 1)

    smem = pl.BlockSpec(memory_space=pltpu.MemorySpace.SMEM)
    vmem = pl.BlockSpec(memory_space=pltpu.MemorySpace.VMEM)

    inputs = [xp, mask, w1cols,
              params["g1"].astype(jnp.float32),
              params["beta1"].astype(jnp.float32),
              w2cols]
    in_specs = [vmem, vmem, vmem, smem, smem, vmem]
    if is_last:
        inputs += [params["b2"].astype(jnp.float32)]
        in_specs += [smem]
    else:
        inputs += [params["g2"].astype(jnp.float32),
                   params["beta2"].astype(jnp.float32)]
        in_specs += [smem, smem]

    out = pl.pallas_call(
        functools.partial(_upblock_kernel, is_last=is_last,
                          N=N, Cin=Cin, Cout=Cout, H=H, W=W),
        out_shape=jax.ShapeDtypeStruct((Cout * 4, N, FLAT), jnp.float32),
        in_specs=in_specs,
        out_specs=vmem,
        scratch_shapes=[pltpu.VMEM((NS, BUFW), jnp.float32)],   # padded h1 planes
        compiler_params=pltpu.CompilerParams(vmem_limit_bytes=32 * 1024 * 1024),
    )(*inputs)

    # Crop the halo and interleave the 4 phases: out[co, a, b, n, h, w] ->
    # result[n, co, 2h+a, 2w+b].  Pure layout plumbing on a tiny array.
    out = out.reshape(Cout, 2, 2, N, PH, PW)[:, :, :, :, 1:H + 1, 1:W + 1]
    out = jnp.transpose(out, (3, 0, 4, 1, 5, 2))
    return out.reshape(N, Cout, 2 * H, 2 * W)


# ---------------- pure-JAX reference (for correctness check) ----------------
def _ref_forward(x, params, is_last=False):
    x = x.astype(jnp.float32)

    def conv(x, w, b):
        y = lax.conv_general_dilated(
            x, w, window_strides=(1, 1), padding=((1, 1), (1, 1)),
            dimension_numbers=("NCHW", "OIHW", "NCHW"))
        return y + b.reshape(1, -1, 1, 1)

    def bn_relu(y, g, bt):
        m = jnp.mean(y, axis=(0, 2, 3), keepdims=True)
        v = jnp.mean((y - m) ** 2, axis=(0, 2, 3), keepdims=True)
        return jnp.maximum((y - m) * lax.rsqrt(v + _EPS) * g.reshape(1, -1, 1, 1)
                           + bt.reshape(1, -1, 1, 1), 0.0)

    h = bn_relu(conv(x, params["w1"], params["b1"]), params["g1"], params["beta1"])
    h = jnp.repeat(jnp.repeat(h, 2, axis=2), 2, axis=3)   # nearest x2
    h = conv(h, params["w2"], params["b2"])
    return jnp.tanh(h) if is_last else bn_relu(h, params["g2"], params["beta2"])


if __name__ == "__main__":
    in_ch, out_ch, N, H, W = 4, 3, 2, 16, 16

    key = jax.random.PRNGKey(0)
    ks = jax.random.split(key, 5)
    params = dict(
        w1=0.2 * jax.random.normal(ks[0], (in_ch, in_ch, 3, 3), jnp.float32),  # OIHW
        b1=0.1 * jax.random.normal(ks[1], (in_ch,), jnp.float32),
        g1=jnp.ones((in_ch,), jnp.float32),       # BN default gamma=1
        beta1=jnp.zeros((in_ch,), jnp.float32),   # BN default beta=0
        w2=0.2 * jax.random.normal(ks[2], (out_ch, in_ch, 3, 3), jnp.float32),
        b2=0.1 * jax.random.normal(ks[3], (out_ch,), jnp.float32),
        g2=jnp.ones((out_ch,), jnp.float32),
        beta2=jnp.zeros((out_ch,), jnp.float32),
    )

    x = jax.random.normal(ks[4], (N, in_ch, H, W), jnp.float32)   # NCHW

    out = jax.block_until_ready(up_block_forward(x, params, is_last=False))
    out_last = jax.block_until_ready(up_block_forward(x, params, is_last=True))

    assert out.shape == (N, out_ch, 2 * H, 2 * W)
    assert out_last.shape == (N, out_ch, 2 * H, 2 * W)
    assert jnp.allclose(out, _ref_forward(x, params, is_last=False),
                        atol=1e-4, rtol=1e-4)
    assert jnp.allclose(out_last, _ref_forward(x, params, is_last=True),
                        atol=1e-4, rtol=1e-4)

    print("KERNEL_OK")
</pallas_src>

<mosaic_0001>
module attributes {stable_mosaic.version = 11 : i64} {
  func.func @_upblock_kernel(%arg0: memref<8x384xf32, #tpu.memory_space<vmem>>, %arg1: memref<1x324xf32, #tpu.memory_space<vmem>>, %arg2: memref<4x72x1xf32, #tpu.memory_space<vmem>>, %arg3: memref<4xf32, #tpu.memory_space<smem>>, %arg4: memref<4xf32, #tpu.memory_space<smem>>, %arg5: memref<12x72x1xf32, #tpu.memory_space<vmem>>, %arg6: memref<3xf32, #tpu.memory_space<smem>>, %arg7: memref<3xf32, #tpu.memory_space<smem>>, %arg8: memref<12x2x324xf32, #tpu.memory_space<vmem>>, %arg9: memref<8x384xf32, #tpu.memory_space<vmem>>) attributes {dimension_semantics = [], scalar_prefetch = 0 : i64, scratch_operands = 1 : i64, tpu.core_type = #tpu.core_type<tc>} {
    %c0 = arith.constant 0 : index
    %c0_0 = arith.constant 0 : index
    %0 = vector.load %arg1[%c0, %c0_0] : memref<1x324xf32, #tpu.memory_space<vmem>>, vector<1x324xf32>
    %cst = arith.constant 0.000000e+00 : f32
    %1 = vector.broadcast %cst : f32 to vector<8x19xf32>
    %c0_1 = arith.constant 0 : index
    %c0_2 = arith.constant 0 : index
    %2 = vector.load %arg9[%c0_1, %c0_2] : memref<8x384xf32, #tpu.memory_space<vmem>>, vector<8x19xf32>
    tpu.vector_store %arg9[%c0_1, %c0_2], %1 {strides = array<i32>} : memref<8x384xf32, #tpu.memory_space<vmem>>, vector<8x19xf32>,
    %cst_3 = arith.constant 0.000000e+00 : f32
    %3 = vector.broadcast %cst_3 : f32 to vector<8x41xf32>
    %c0_4 = arith.constant 0 : index
    %c343 = arith.constant 343 : index
    %4 = vector.load %arg9[%c0_4, %c343] : memref<8x384xf32, #tpu.memory_space<vmem>>, vector<8x41xf32>
    tpu.vector_store %arg9[%c0_4, %c343], %3 {strides = array<i32>} : memref<8x384xf32, #tpu.memory_space<vmem>>, vector<8x41xf32>,
    %c0_5 = arith.constant 0 : index
    %c0_6 = arith.constant 0 : index
    %5 = vector.load %arg0[%c0_5, %c0_6] : memref<8x384xf32, #tpu.memory_space<vmem>>, vector<8x324xf32>
    %c0_7 = arith.constant 0 : index
    %c1 = arith.constant 1 : index
    %6 = vector.load %arg0[%c0_7, %c1] : memref<8x384xf32, #tpu.memory_space<vmem>>, vector<8x324xf32>
    %c0_8 = arith.constant 0 : index
    %c2 = arith.constant 2 : index
    %7 = vector.load %arg0[%c0_8, %c2] : memref<8x384xf32, #tpu.memory_space<vmem>>, vector<8x324xf32>
    %c0_9 = arith.constant 0 : index
    %c18 = arith.constant 18 : index
    %8 = vector.load %arg0[%c0_9, %c18] : memref<8x384xf32, #tpu.memory_space<vmem>>, vector<8x324xf32>
    %c0_10 = arith.constant 0 : index
    %c19 = arith.constant 19 : index
    %9 = vector.load %arg0[%c0_10, %c19] : memref<8x384xf32, #tpu.memory_space<vmem>>, vector<8x324xf32>
    %c0_11 = arith.constant 0 : index
    %c20 = arith.constant 20 : index
    %10 = vector.load %arg0[%c0_11, %c20] : memref<8x384xf32, #tpu.memory_space<vmem>>, vector<8x324xf32>
    %c0_12 = arith.constant 0 : index
    %c36 = arith.constant 36 : index
    %11 = vector.load %arg0[%c0_12, %c36] : memref<8x384xf32, #tpu.memory_space<vmem>>, vector<8x324xf32>
    %c0_13 = arith.constant 0 : index
    %c37 = arith.constant 37 : index
    %12 = vector.load %arg0[%c0_13, %c37] : memref<8x384xf32, #tpu.memory_space<vmem>>, vector<8x324xf32>
    %c0_14 = arith.constant 0 : index
    %c38 = arith.constant 38 : index
    %13 = vector.load %arg0[%c0_14, %c38] : memref<8x384xf32, #tpu.memory_space<vmem>>, vector<8x324xf32>
    %c0_15 = arith.constant 0 : index
    %c0_16 = arith.constant 0 : index
    %c0_17 = arith.constant 0 : index
    %14 = vector.load %arg2[%c0_15, %c0_16, %c0_17] : memref<4x72x1xf32, #tpu.memory_space<vmem>>, vector<1x72x1xf32>
    %15 = vector.shape_cast %14 : vector<1x72x1xf32> to vector<72x1xf32>
    %16 = vector.extract_strided_slice %15 {offsets = [0, 0], sizes = [8, 1], strides = [1, 1]} : vector<72x1xf32> to vector<8x1xf32>
    %17 = vector.broadcast %16 : vector<8x1xf32> to vector<8x324xf32>
    %18 = arith.mulf %5, %17 : vector<8x324xf32>
    %19 = vector.extract_strided_slice %15 {offsets = [8, 0], sizes = [8, 1], strides = [1, 1]} : vector<72x1xf32> to vector<8x1xf32>
    %20 = vector.broadcast %19 : vector<8x1xf32> to vector<8x324xf32>
    %21 = arith.mulf %6, %20 : vector<8x324xf32>
    %22 = arith.addf %18, %21 : vector<8x324xf32>
    %23 = vector.extract_strided_slice %15 {offsets = [16, 0], sizes = [8, 1], strides = [1, 1]} : vector<72x1xf32> to vector<8x1xf32>
    %24 = vector.broadcast %23 : vector<8x1xf32> to vector<8x324xf32>
    %25 = arith.mulf %7, %24 : vector<8x324xf32>
    %26 = arith.addf %22, %25 : vector<8x324xf32>
    %27 = vector.extract_strided_slice %15 {offsets = [24, 0], sizes = [8, 1], strides = [1, 1]} : vector<72x1xf32> to vector<8x1xf32>
    %28 = vector.broadcast %27 : vector<8x1xf32> to vector<8x324xf32>
    %29 = arith.mulf %8, %28 : vector<8x324xf32>
    %30 = arith.addf %26, %29 : vector<8x324xf32>
    %31 = vector.extract_strided_slice %15 {offsets = [32, 0], sizes = [8, 1], strides = [1, 1]} : vector<72x1xf32> to vector<8x1xf32>
    %32 = vector.broadcast %31 : vector<8x1xf32> to vector<8x324xf32>
    %33 = arith.mulf %9, %32 : vector<8x324xf32>
    %34 = arith.addf %30, %33 : vector<8x324xf32>
    %35 = vector.extract_strided_slice %15 {offsets = [40, 0], sizes = [8, 1], strides = [1, 1]} : vector<72x1xf32> to vector<8x1xf32>
    %36 = vector.broadcast %35 : vector<8x1xf32> to vector<8x324xf32>
    %37 = arith.mulf %10, %36 : vector<8x324xf32>
    %38 = arith.addf %34, %37 : vector<8x324xf32>
    %39 = vector.extract_strided_slice %15 {offsets = [48, 0], sizes = [8, 1], strides = [1, 1]} : vector<72x1xf32> to vector<8x1xf32>
    %40 = vector.broadcast %39 : vector<8x1xf32> to vector<8x324xf32>
    %41 = arith.mulf %11, %40 : vector<8x324xf32>
    %42 = arith.addf %38, %41 : vector<8x324xf32>
    %43 = vector.extract_strided_slice %15 {offsets = [56, 0], sizes = [8, 1], strides = [1, 1]} : vector<72x1xf32> to vector<8x1xf32>
    %44 = vector.broadcast %43 : vector<8x1xf32> to vector<8x324xf32>
    %45 = arith.mulf %12, %44 : vector<8x324xf32>
    %46 = arith.addf %42, %45 : vector<8x324xf32>
    %47 = vector.extract_strided_slice %15 {offsets = [64, 0], sizes = [8, 1], strides = [1, 1]} : vector<72x1xf32> to vector<8x1xf32>
    %48 = vector.broadcast %47 : vector<8x1xf32> to vector<8x324xf32>
    %49 = arith.mulf %13, %48 : vector<8x324xf32>
    %50 = arith.addf %46, %49 : vector<8x324xf32>
    %51 = vector.extract_strided_slice %50 {offsets = [0, 0], sizes = [2, 324], strides = [1, 1]} : vector<8x324xf32> to vector<2x324xf32>
    %52 = vector.extract_strided_slice %50 {offsets = [2, 0], sizes = [2, 324], strides = [1, 1]} : vector<8x324xf32> to vector<2x324xf32>
    %53 = arith.addf %51, %52 : vector<2x324xf32>
    %54 = vector.extract_strided_slice %50 {offsets = [4, 0], sizes = [2, 324], strides = [1, 1]} : vector<8x324xf32> to vector<2x324xf32>
    %55 = arith.addf %53, %54 : vector<2x324xf32>
    %56 = vector.extract_strided_slice %50 {offsets = [6, 0], sizes = [2, 324], strides = [1, 1]} : vector<8x324xf32> to vector<2x324xf32>
    %57 = arith.addf %55, %56 : vector<2x324xf32>
    %58 = vector.broadcast %0 : vector<1x324xf32> to vector<2x324xf32>
    %59 = arith.mulf %57, %58 : vector<2x324xf32>
    %60 = vector.shape_cast %59 : vector<2x324xf32> to vector<1x2x324xf32>
    %cst_18 = arith.constant dense<0.000000e+00> : vector<1xf32>
    %61 = vector.multi_reduction <add>, %60, %cst_18 [1, 2] : vector<1x2x324xf32> to vector<1xf32>
    %62 = vector.shape_cast %61 : vector<1xf32> to vector<1x1x1xf32>
    %63 = vector.extract %62[0, 0, 0] : f32 from vector<1x1x1xf32>
    %64 = vector.broadcast %63 : f32 to vector<1x1xf32>
    %cst_19 = arith.constant 0.001953125 : f32
    %65 = vector.broadcast %cst_19 : f32 to vector<1x1xf32>
    %66 = arith.mulf %64, %65 : vector<1x1xf32>
    %67 = vector.broadcast %66 : vector<1x1xf32> to vector<2x324xf32>
    %68 = arith.subf %57, %67 : vector<2x324xf32>
    %69 = arith.mulf %68, %68 : vector<2x324xf32>
    %70 = vector.broadcast %0 : vector<1x324xf32> to vector<2x324xf32>
    %71 = arith.mulf %69, %70 : vector<2x324xf32>
    %72 = vector.shape_cast %71 : vector<2x324xf32> to vector<1x2x324xf32>
    %cst_20 = arith.constant dense<0.000000e+00> : vector<1xf32>
    %73 = vector.multi_reduction <add>, %72, %cst_20 [1, 2] : vector<1x2x324xf32> to vector<1xf32>
    %74 = vector.shape_cast %73 : vector<1xf32> to vector<1x1x1xf32>
    %75 = vector.extract %74[0, 0, 0] : f32 from vector<1x1x1xf32>
    %76 = vector.broadcast %75 : f32 to vector<1x1xf32>
    %cst_21 = arith.constant 0.001953125 : f32
    %77 = vector.broadcast %cst_21 : f32 to vector<1x1xf32>
    %78 = arith.mulf %76, %77 : vector<1x1xf32>
    %cst_22 = arith.constant 9.99999974E-6 : f32
    %79 = vector.broadcast %cst_22 : f32 to vector<1x1xf32>
    %80 = arith.addf %78, %79 : vector<1x1xf32>
    %81 = math.rsqrt %80 : vector<1x1xf32>
    %82 = vector.broadcast %81 : vector<1x1xf32> to vector<2x324xf32>
    %83 = arith.mulf %68, %82 : vector<2x324xf32>
    %c0_23 = arith.constant 0 : index
    %84 = memref.load %arg3[%c0_23] : memref<4xf32, #tpu.memory_space<smem>>
    %85 = vector.broadcast %84 : f32 to vector<2x324xf32>
    %86 = arith.mulf %83, %85 : vector<2x324xf32>
    %c0_24 = arith.constant 0 : index
    %87 = memref.load %arg4[%c0_24] : memref<4xf32, #tpu.memory_space<smem>>
    %88 = vector.broadcast %87 : f32 to vector<2x324xf32>
    %89 = arith.addf %86, %88 : vector<2x324xf32>
    %cst_25 = arith.constant 0.000000e+00 : f32
    %90 = vector.broadcast %cst_25 : f32 to vector<2x324xf32>
    %91 = arith.maximumf %89, %90 : vector<2x324xf32>
    %92 = vector.broadcast %0 : vector<1x324xf32> to vector<2x324xf32>
    %93 = arith.mulf %91, %92 : vector<2x324xf32>
    %c0_26 = arith.constant 0 : index
    %c19_27 = arith.constant 19 : index
    %94 = vector.load %arg9[%c0_26, %c19_27] : memref<8x384xf32, #tpu.memory_space<vmem>>, vector<2x324xf32>
    tpu.vector_store %arg9[%c0_26, %c19_27], %93 {strides = array<i32>} : memref<8x384xf32, #tpu.memory_space<vmem>>, vector<2x324xf32>,
    %c1_28 = arith.constant 1 : index
    %c0_29 = arith.constant 0 : index
    %c0_30 = arith.constant 0 : index
    %95 = vector.load %arg2[%c1_28, %c0_29, %c0_30] : memref<4x72x1xf32, #tpu.memory_space<vmem>>, vector<1x72x1xf32>
    %96 = vector.shape_cast %95 : vector<1x72x1xf32> to vector<72x1xf32>
    %97 = vector.extract_strided_slice %96 {offsets = [0, 0], sizes = [8, 1], strides = [1, 1]} : vector<72x1xf32> to vector<8x1xf32>
    %98 = vector.broadcast %97 : vector<8x1xf32> to vector<8x324xf32>
    %99 = arith.mulf %5, %98 : vector<8x324xf32>
    %100 = vector.extract_strided_slice %96 {offsets = [8, 0], sizes = [8, 1], strides = [1, 1]} : vector<72x1xf32> to vector<8x1xf32>
    %101 = vector.broadcast %100 : vector<8x1xf32> to vector<8x324xf32>
    %102 = arith.mulf %6, %101 : vector<8x324xf32>
    %103 = arith.addf %99, %102 : vector<8x324xf32>
    %104 = vector.extract_strided_slice %96 {offsets = [16, 0], sizes = [8, 1], strides = [1, 1]} : vector<72x1xf32> to vector<8x1xf32>
    %105 = vector.broadcast %104 : vector<8x1xf32> to vector<8x324xf32>
    %106 = arith.mulf %7, %105 : vector<8x324xf32>
    %107 = arith.addf %103, %106 : vector<8x324xf32>
    %108 = vector.extract_strided_slice %96 {offsets = [24, 0], sizes = [8, 1], strides = [1, 1]} : vector<72x1xf32> to vector<8x1xf32>
    %109 = vector.broadcast %108 : vector<8x1xf32> to vector<8x324xf32>
    %110 = arith.mulf %8, %109 : vector<8x324xf32>
    %111 = arith.addf %107, %110 : vector<8x324xf32>
    %112 = vector.extract_strided_slice %96 {offsets = [32, 0], sizes = [8, 1], strides = [1, 1]} : vector<72x1xf32> to vector<8x1xf32>
    %113 = vector.broadcast %112 : vector<8x1xf32> to vector<8x324xf32>
    %114 = arith.mulf %9, %113 : vector<8x324xf32>
    %115 = arith.addf %111, %114 : vector<8x324xf32>
    %116 = vector.extract_strided_slice %96 {offsets = [40, 0], sizes = [8, 1], strides = [1, 1]} : vector<72x1xf32> to vector<8x1xf32>
    %117 = vector.broadcast %116 : vector<8x1xf32> to vector<8x324xf32>
    %118 = arith.mulf %10, %117 : vector<8x324xf32>
    %119 = arith.addf %115, %118 : vector<8x324xf32>
    %120 = vector.extract_strided_slice %96 {offsets = [48, 0], sizes = [8, 1], strides = [1, 1]} : vector<72x1xf32> to vector<8x1xf32>
    %121 = vector.broadcast %120 : vector<8x1xf32> to vector<8x324xf32>
    %122 = arith.mulf %11, %121 : vector<8x324xf32>
    %123 = arith.addf %119, %122 : vector<8x324xf32>
    %124 = vector.extract_strided_slice %96 {offsets = [56, 0], sizes = [8, 1], strides = [1, 1]} : vector<72x1xf32> to vector<8x1xf32>
    %125 = vector.broadcast %124 : vector<8x1xf32> to vector<8x324xf32>
    %126 = arith.mulf %12, %125 : vector<8x324xf32>
    %127 = arith.addf %123, %126 : vector<8x324xf32>
    %128 = vector.extract_strided_slice %96 {offsets = [64, 0], sizes = [8, 1], strides = [1, 1]} : vector<72x1xf32> to vector<8x1xf32>
    %129 = vector.broadcast %128 : vector<8x1xf32> to vector<8x324xf32>
    %130 = arith.mulf %13, %129 : vector<8x324xf32>
    %131 = arith.addf %127, %130 : vector<8x324xf32>
    %132 = vector.extract_strided_slice %131 {offsets = [0, 0], sizes = [2, 324], strides = [1, 1]} : vector<8x324xf32> to vector<2x324xf32>
    %133 = vector.extract_strided_slice %131 {offsets = [2, 0], sizes = [2, 324], strides = [1, 1]} : vector<8x324xf32> to vector<2x324xf32>
    %134 = arith.addf %132, %133 : vector<2x324xf32>
    %135 = vector.extract_strided_slice %131 {offsets = [4, 0], sizes = [2, 324], strides = [1, 1]} : vector<8x324xf32> to vector<2x324xf32>
    %136 = arith.addf %134, %135 : vector<2x324xf32>
    %137 = vector.extract_strided_slice %131 {offsets = [6, 0], sizes = [2, 324], strides = [1, 1]} : vector<8x324xf32> to vector<2x324xf32>
    %138 = arith.addf %136, %137 : vector<2x324xf32>
    %139 = vector.broadcast %0 : vector<1x324xf32> to vector<2x324xf32>
    %140 = arith.mulf %138, %139 : vector<2x324xf32>
    %141 = vector.shape_cast %140 : vector<2x324xf32> to vector<1x2x324xf32>
    %cst_31 = arith.constant dense<0.000000e+00> : vector<1xf32>
    %142 = vector.multi_reduction <add>, %141, %cst_31 [1, 2] : vector<1x2x324xf32> to vector<1xf32>
    %143 = vector.shape_cast %142 : vector<1xf32> to vector<1x1x1xf32>
    %144 = vector.extract %143[0, 0, 0] : f32 from vector<1x1x1xf32>
    %145 = vector.broadcast %144 : f32 to vector<1x1xf32>
    %cst_32 = arith.constant 0.001953125 : f32
    %146 = vector.broadcast %cst_32 : f32 to vector<1x1xf32>
    %147 = arith.mulf %145, %146 : vector<1x1xf32>
    %148 = vector.broadcast %147 : vector<1x1xf32> to vector<2x324xf32>
    %149 = arith.subf %138, %148 : vector<2x324xf32>
    %150 = arith.mulf %149, %149 : vector<2x324xf32>
    %151 = vector.broadcast %0 : vector<1x324xf32> to vector<2x324xf32>
    %152 = arith.mulf %150, %151 : vector<2x324xf32>
    %153 = vector.shape_cast %152 : vector<2x324xf32> to vector<1x2x324xf32>
    %cst_33 = arith.constant dense<0.000000e+00> : vector<1xf32>
    %154 = vector.multi_reduction <add>, %153, %cst_33 [1, 2] : vector<1x2x324xf32> to vector<1xf32>
    %155 = vector.shape_cast %154 : vector<1xf32> to vector<1x1x1xf32>
    %156 = vector.extract %155[0, 0, 0] : f32 from vector<1x1x1xf32>
    %157 = vector.broadcast %156 : f32 to vector<1x1xf32>
    %cst_34 = arith.constant 0.001953125 : f32
    %158 = vector.broadcast %cst_34 : f32 to vector<1x1xf32>
    %159 = arith.mulf %157, %158 : vector<1x1xf32>
    %cst_35 = arith.constant 9.99999974E-6 : f32
    %160 = vector.broadcast %cst_35 : f32 to vector<1x1xf32>
    %161 = arith.addf %159, %160 : vector<1x1xf32>
    %162 = math.rsqrt %161 : vector<1x1xf32>
    %163 = vector.broadcast %162 : vector<1x1xf32> to vector<2x324xf32>
    %164 = arith.mulf %149, %163 : vector<2x324xf32>
    %c1_36 = arith.constant 1 : index
    %165 = memref.load %arg3[%c1_36] : memref<4xf32, #tpu.memory_space<smem>>
    %166 = vector.broadcast %165 : f32 to vector<2x324xf32>
    %167 = arith.mulf %164, %166 : vector<2x324xf32>
    %c1_37 = arith.constant 1 : index
    %168 = memref.load %arg4[%c1_37] : memref<4xf32, #tpu.memory_space<smem>>
    %169 = vector.broadcast %168 : f32 to vector<2x324xf32>
    %170 = arith.addf %167, %169 : vector<2x324xf32>
    %cst_38 = arith.constant 0.000000e+00 : f32
    %171 = vector.broadcast %cst_38 : f32 to vector<2x324xf32>
    %172 = arith.maximumf %170, %171 : vector<2x324xf32>
    %173 = vector.broadcast %0 : vector<1x324xf32> to vector<2x324xf32>
    %174 = arith.mulf %172, %173 : vector<2x324xf32>
    %c2_39 = arith.constant 2 : index
    %c19_40 = arith.constant 19 : index
    %175 = vector.load %arg9[%c2_39, %c19_40] : memref<8x384xf32, #tpu.memory_space<vmem>>, vector<2x324xf32>
    tpu.vector_store %arg9[%c2_39, %c19_40], %174 {strides = array<i32>} : memref<8x384xf32, #tpu.memory_space<vmem>>, vector<2x324xf32>,
    %c2_41 = arith.constant 2 : index
    %c0_42 = arith.constant 0 : index
    %c0_43 = arith.constant 0 : index
    %176 = vector.load %arg2[%c2_41, %c0_42, %c0_43] : memref<4x72x1xf32, #tpu.memory_space<vmem>>, vector<1x72x1xf32>
    %177 = vector.shape_cast %176 : vector<1x72x1xf32> to vector<72x1xf32>
    %178 = vector.extract_strided_slice %177 {offsets = [0, 0], sizes = [8, 1], strides = [1, 1]} : vector<72x1xf32> to vector<8x1xf32>
    %179 = vector.broadcast %178 : vector<8x1xf32> to vector<8x324xf32>
    %180 = arith.mulf %5, %179 : vector<8x324xf32>
    %181 = vector.extract_strided_slice %177 {offsets = [8, 0], sizes = [8, 1], strides = [1, 1]} : vector<72x1xf32> to vector<8x1xf32>
    %182 = vector.broadcast %181 : vector<8x1xf32> to vector<8x324xf32>
    %183 = arith.mulf %6, %182 : vector<8x324xf32>
    %184 = arith.addf %180, %183 : vector<8x324xf32>
    %185 = vector.extract_strided_slice %177 {offsets = [16, 0], sizes = [8, 1], strides = [1, 1]} : vector<72x1xf32> to vector<8x1xf32>
    %186 = vector.broadcast %185 : vector<8x1xf32> to vector<8x324xf32>
    %187 = arith.mulf %7, %186 : vector<8x324xf32>
    %188 = arith.addf %184, %187 : vector<8x324xf32>
    %189 = vector.extract_strided_slice %177 {offsets = [24, 0], sizes = [8, 1], strides = [1, 1]} : vector<72x1xf32> to vector<8x1xf32>
    %190 = vector.broadcast %189 : vector<8x1xf32> to vector<8x324xf32>
    %191 = arith.mulf %8, %190 : vector<8x324xf32>
    %192 = arith.addf %188, %191 : vector<8x324xf32>
    %193 = vector.extract_strided_slice %177 {offsets = [32, 0], sizes = [8, 1], strides = [1, 1]} : vector<72x1xf32> to vector<8x1xf32>
    %194 = vector.broadcast %193 : vector<8x1xf32> to vector<8x324xf32>
    %195 = arith.mulf %9, %194 : vector<8x324xf32>
    %196 = arith.addf %192, %195 : vector<8x324xf32>
    %197 = vector.extract_strided_slice %177 {offsets = [40, 0], sizes = [8, 1], strides = [1, 1]} : vector<72x1xf32> to vector<8x1xf32>
    %198 = vector.broadcast %197 : vector<8x1xf32> to vector<8x324xf32>
    %199 = arith.mulf %10, %198 : vector<8x324xf32>
    %200 = arith.addf %196, %199 : vector<8x324xf32>
    %201 = vector.extract_strided_slice %177 {offsets = [48, 0], sizes = [8, 1], strides = [1, 1]} : vector<72x1xf32> to vector<8x1xf32>
    %202 = vector.broadcast %201 : vector<8x1xf32> to vector<8x324xf32>
    %203 = arith.mulf %11, %202 : vector<8x324xf32>
    %204 = arith.addf %200, %203 : vector<8x324xf32>
    %205 = vector.extract_strided_slice %177 {offsets = [56, 0], sizes = [8, 1], strides = [1, 1]} : vector<72x1xf32> to vector<8x1xf32>
    %206 = vector.broadcast %205 : vector<8x1xf32> to vector<8x324xf32>
    %207 = arith.mulf %12, %206 : vector<8x324xf32>
    %208 = arith.addf %204, %207 : vector<8x324xf32>
    %209 = vector.extract_strided_slice %177 {offsets = [64, 0], sizes = [8, 1], strides = [1, 1]} : vector<72x1xf32> to vector<8x1xf32>
    %210 = vector.broadcast %209 : vector<8x1xf32> to vector<8x324xf32>
    %211 = arith.mulf %13, %210 : vector<8x324xf32>
    %212 = arith.addf %208, %211 : vector<8x324xf32>
    %213 = vector.extract_strided_slice %212 {offsets = [0, 0], sizes = [2, 324], strides = [1, 1]} : vector<8x324xf32> to vector<2x324xf32>
    %214 = vector.extract_strided_slice %212 {offsets = [2, 0], sizes = [2, 324], strides = [1, 1]} : vector<8x324xf32> to vector<2x324xf32>
    %215 = arith.addf %213, %214 : vector<2x324xf32>
    %216 = vector.extract_strided_slice %212 {offsets = [4, 0], sizes = [2, 324], strides = [1, 1]} : vector<8x324xf32> to vector<2x324xf32>
    %217 = arith.addf %215, %216 : vector<2x324xf32>
    %218 = vector.extract_strided_slice %212 {offsets = [6, 0], sizes = [2, 324], strides = [1, 1]} : vector<8x324xf32> to vector<2x324xf32>
    %219 = arith.addf %217, %218 : vector<2x324xf32>
    %220 = vector.broadcast %0 : vector<1x324xf32> to vector<2x324xf32>
    %221 = arith.mulf %219, %220 : vector<2x324xf32>
    %222 = vector.shape_cast %221 : vector<2x324xf32> to vector<1x2x324xf32>
    %cst_44 = arith.constant dense<0.000000e+00> : vector<1xf32>
    %223 = vector.multi_reduction <add>, %222, %cst_44 [1, 2] : vector<1x2x324xf32> to vector<1xf32>
    %224 = vector.shape_cast %223 : vector<1xf32> to vector<1x1x1xf32>
    %225 = vector.extract %224[0, 0, 0] : f32 from vector<1x1x1xf32>
    %226 = vector.broadcast %225 : f32 to vector<1x1xf32>
    %cst_45 = arith.constant 0.001953125 : f32
    %227 = vector.broadcast %cst_45 : f32 to vector<1x1xf32>
    %228 = arith.mulf %226, %227 : vector<1x1xf32>
    %229 = vector.broadcast %228 : vector<1x1xf32> to vector<2x324xf32>
    %230 = arith.subf %219, %229 : vector<2x324xf32>
    %231 = arith.mulf %230, %230 : vector<2x324xf32>
    %232 = vector.broadcast %0 : vector<1x324xf32> to vector<2x324xf32>
    %233 = arith.mulf %231, %232 : vector<2x324xf32>
    %234 = vector.shape_cast %233 : vector<2x324xf32> to vector<1x2x324xf32>
    %cst_46 = arith.constant dense<0.000000e+00> : vector<1xf32>
    %235 = vector.multi_reduction <add>, %234, %cst_46 [1, 2] : vector<1x2x324xf32> to vector<1xf32>
    %236 = vector.shape_cast %235 : vector<1xf32> to vector<1x1x1xf32>
    %237 = vector.extract %236[0, 0, 0] : f32 from vector<1x1x1xf32>
    %238 = vector.broadcast %237 : f32 to vector<1x1xf32>
    %cst_47 = arith.constant 0.001953125 : f32
    %239 = vector.broadcast %cst_47 : f32 to vector<1x1xf32>
    %240 = arith.mulf %238, %239 : vector<1x1xf32>
    %cst_48 = arith.constant 9.99999974E-6 : f32
    %241 = vector.broadcast %cst_48 : f32 to vector<1x1xf32>
    %242 = arith.addf %240, %241 : vector<1x1xf32>
    %243 = math.rsqrt %242 : vector<1x1xf32>
    %244 = vector.broadcast %243 : vector<1x1xf32> to vector<2x324xf32>
    %245 = arith.mulf %230, %244 : vector<2x324xf32>
    %c2_49 = arith.constant 2 : index
    %246 = memref.load %arg3[%c2_49] : memref<4xf32, #tpu.memory_space<smem>>
    %247 = vector.broadcast %246 : f32 to vector<2x324xf32>
    %248 = arith.mulf %245, %247 : vector<2x324xf32>
    %c2_50 = arith.constant 2 : index
    %249 = memref.load %arg4[%c2_50] : memref<4xf32, #tpu.memory_space<smem>>
    %250 = vector.broadcast %249 : f32 to vector<2x324xf32>
    %251 = arith.addf %248, %250 : vector<2x324xf32>
    %cst_51 = arith.constant 0.000000e+00 : f32
    %252 = vector.broadcast %cst_51 : f32 to vector<2x324xf32>
    %253 = arith.maximumf %251, %252 : vector<2x324xf32>
    %254 = vector.broadcast %0 : vector<1x324xf32> to vector<2x324xf32>
    %255 = arith.mulf %253, %254 : vector<2x324xf32>
    %c4 = arith.constant 4 : index
    %c19_52 = arith.constant 19 : index
    %256 = vector.load %arg9[%c4, %c19_52] : memref<8x384xf32, #tpu.memory_space<vmem>>, vector<2x324xf32>
    tpu.vector_store %arg9[%c4, %c19_52], %255 {strides = array<i32>} : memref<8x384xf32, #tpu.memory_space<vmem>>, vector<2x324xf32>,
    %c3 = arith.constant 3 : index
    %c0_53 = arith.constant 0 : index
    %c0_54 = arith.constant 0 : index
    %257 = vector.load %arg2[%c3, %c0_53, %c0_54] : memref<4x72x1xf32, #tpu.memory_space<vmem>>, vector<1x72x1xf32>
    %258 = vector.shape_cast %257 : vector<1x72x1xf32> to vector<72x1xf32>
    %259 = vector.extract_strided_slice %258 {offsets = [0, 0], sizes = [8, 1], strides = [1, 1]} : vector<72x1xf32> to vector<8x1xf32>
    %260 = vector.broadcast %259 : vector<8x1xf32> to vector<8x324xf32>
    %261 = arith.mulf %5, %260 : vector<8x324xf32>
    %262 = vector.extract_strided_slice %258 {offsets = [8, 0], sizes = [8, 1], strides = [1, 1]} : vector<72x1xf32> to vector<8x1xf32>
    %263 = vector.broadcast %262 : vector<8x1xf32> to vector<8x324xf32>
    %264 = arith.mulf %6, %263 : vector<8x324xf32>
    %265 = arith.addf %261, %264 : vector<8x324xf32>
    %266 = vector.extract_strided_slice %258 {offsets = [16, 0], sizes = [8, 1], strides = [1, 1]} : vector<72x1xf32> to vector<8x1xf32>
    %267 = vector.broadcast %266 : vector<8x1xf32> to vector<8x324xf32>
    %268 = arith.mulf %7, %267 : vector<8x324xf32>
    %269 = arith.addf %265, %268 : vector<8x324xf32>
    %270 = vector.extract_strided_slice %258 {offsets = [24, 0], sizes = [8, 1], strides = [1, 1]} : vector<72x1xf32> to vector<8x1xf32>
    %271 = vector.broadcast %270 : vector<8x1xf32> to vector<8x324xf32>
    %272 = arith.mulf %8, %271 : vector<8x324xf32>
    %273 = arith.addf %269, %272 : vector<8x324xf32>
    %274 = vector.extract_strided_slice %258 {offsets = [32, 0], sizes = [8, 1], strides = [1, 1]} : vector<72x1xf32> to vector<8x1xf32>
    %275 = vector.broadcast %274 : vector<8x1xf32> to vector<8x324xf32>
    %276 = arith.mulf %9, %275 : vector<8x324xf32>
    %277 = arith.addf %273, %276 : vector<8x324xf32>
    %278 = vector.extract_strided_slice %258 {offsets = [40, 0], sizes = [8, 1], strides = [1, 1]} : vector<72x1xf32> to vector<8x1xf32>
    %279 = vector.broadcast %278 : vector<8x1xf32> to vector<8x324xf32>
    %280 = arith.mulf %10, %279 : vector<8x324xf32>
    %281 = arith.addf %277, %280 : vector<8x324xf32>
    %282 = vector.extract_strided_slice %258 {offsets = [48, 0], sizes = [8, 1], strides = [1, 1]} : vector<72x1xf32> to vector<8x1xf32>
    %283 = vector.broadcast %282 : vector<8x1xf32> to vector<8x324xf32>
    %284 = arith.mulf %11, %283 : vector<8x324xf32>
    %285 = arith.addf %281, %284 : vector<8x324xf32>
    %286 = vector.extract_strided_slice %258 {offsets = [56, 0], sizes = [8, 1], strides = [1, 1]} : vector<72x1xf32> to vector<8x1xf32>
    %287 = vector.broadcast %286 : vector<8x1xf32> to vector<8x324xf32>
    %288 = arith.mulf %12, %287 : vector<8x324xf32>
    %289 = arith.addf %285, %288 : vector<8x324xf32>
    %290 = vector.extract_strided_slice %258 {offsets = [64, 0], sizes = [8, 1], strides = [1, 1]} : vector<72x1xf32> to vector<8x1xf32>
    %291 = vector.broadcast %290 : vector<8x1xf32> to vector<8x324xf32>
    %292 = arith.mulf %13, %291 : vector<8x324xf32>
    %293 = arith.addf %289, %292 : vector<8x324xf32>
    %294 = vector.extract_strided_slice %293 {offsets = [0, 0], sizes = [2, 324], strides = [1, 1]} : vector<8x324xf32> to vector<2x324xf32>
    %295 = vector.extract_strided_slice %293 {offsets = [2, 0], sizes = [2, 324], strides = [1, 1]} : vector<8x324xf32> to vector<2x324xf32>
    %296 = arith.addf %294, %295 : vector<2x324xf32>
    %297 = vector.extract_strided_slice %293 {offsets = [4, 0], sizes = [2, 324], strides = [1, 1]} : vector<8x324xf32> to vector<2x324xf32>
    %298 = arith.addf %296, %297 : vector<2x324xf32>
    %299 = vector.extract_strided_slice %293 {offsets = [6, 0], sizes = [2, 324], strides = [1, 1]} : vector<8x324xf32> to vector<2x324xf32>
    %300 = arith.addf %298, %299 : vector<2x324xf32>
    %301 = vector.broadcast %0 : vector<1x324xf32> to vector<2x324xf32>
    %302 = arith.mulf %300, %301 : vector<2x324xf32>
    %303 = vector.shape_cast %302 : vector<2x324xf32> to vector<1x2x324xf32>
    %cst_55 = arith.constant dense<0.000000e+00> : vector<1xf32>
    %304 = vector.multi_reduction <add>, %303, %cst_55 [1, 2] : vector<1x2x324xf32> to vector<1xf32>
    %305 = vector.shape_cast %304 : vector<1xf32> to vector<1x1x1xf32>
    %306 = vector.extract %305[0, 0, 0] : f32 from vector<1x1x1xf32>
    %307 = vector.broadcast %306 : f32 to vector<1x1xf32>
    %cst_56 = arith.constant 0.001953125 : f32
    %308 = vector.broadcast %cst_56 : f32 to vector<1x1xf32>
    %309 = arith.mulf %307, %308 : vector<1x1xf32>
    %310 = vector.broadcast %309 : vector<1x1xf32> to vector<2x324xf32>
    %311 = arith.subf %300, %310 : vector<2x324xf32>
    %312 = arith.mulf %311, %311 : vector<2x324xf32>
    %313 = vector.broadcast %0 : vector<1x324xf32> to vector<2x324xf32>
    %314 = arith.mulf %312, %313 : vector<2x324xf32>
    %315 = vector.shape_cast %314 : vector<2x324xf32> to vector<1x2x324xf32>
    %cst_57 = arith.constant dense<0.000000e+00> : vector<1xf32>
    %316 = vector.multi_reduction <add>, %315, %cst_57 [1, 2] : vector<1x2x324xf32> to vector<1xf32>
    %317 = vector.shape_cast %316 : vector<1xf32> to vector<1x1x1xf32>
    %318 = vector.extract %317[0, 0, 0] : f32 from vector<1x1x1xf32>
    %319 = vector.broadcast %318 : f32 to vector<1x1xf32>
    %cst_58 = arith.constant 0.001953125 : f32
    %320 = vector.broadcast %cst_58 : f32 to vector<1x1xf32>
    %321 = arith.mulf %319, %320 : vector<1x1xf32>
    %cst_59 = arith.constant 9.99999974E-6 : f32
    %322 = vector.broadcast %cst_59 : f32 to vector<1x1xf32>
    %323 = arith.addf %321, %322 : vector<1x1xf32>
    %324 = math.rsqrt %323 : vector<1x1xf32>
    %325 = vector.broadcast %324 : vector<1x1xf32> to vector<2x324xf32>
    %326 = arith.mulf %311, %325 : vector<2x324xf32>
    %c3_60 = arith.constant 3 : index
    %327 = memref.load %arg3[%c3_60] : memref<4xf32, #tpu.memory_space<smem>>
    %328 = vector.broadcast %327 : f32 to vector<2x324xf32>
    %329 = arith.mulf %326, %328 : vector<2x324xf32>
    %c3_61 = arith.constant 3 : index
    %330 = memref.load %arg4[%c3_61] : memref<4xf32, #tpu.memory_space<smem>>
    %331 = vector.broadcast %330 : f32 to vector<2x324xf32>
    %332 = arith.addf %329, %331 : vector<2x324xf32>
    %cst_62 = arith.constant 0.000000e+00 : f32
    %333 = vector.broadcast %cst_62 : f32 to vector<2x324xf32>
    %334 = arith.maximumf %332, %333 : vector<2x324xf32>
    %335 = vector.broadcast %0 : vector<1x324xf32> to vector<2x324xf32>
    %336 = arith.mulf %334, %335 : vector<2x324xf32>
    %c6 = arith.constant 6 : index
    %c19_63 = arith.constant 19 : index
    %337 = vector.load %arg9[%c6, %c19_63] : memref<8x384xf32, #tpu.memory_space<vmem>>, vector<2x324xf32>
    tpu.vector_store %arg9[%c6, %c19_63], %336 {strides = array<i32>} : memref<8x384xf32, #tpu.memory_space<vmem>>, vector<2x324xf32>,
    %c0_64 = arith.constant 0 : index
    %c0_65 = arith.constant 0 : index
    %338 = vector.load %arg9[%c0_64, %c0_65] : memref<8x384xf32, #tpu.memory_space<vmem>>, vector<8x324xf32>
    %c0_66 = arith.constant 0 : index
    %c1_67 = arith.constant 1 : index
    %339 = vector.load %arg9[%c0_66, %c1_67] : memref<8x384xf32, #tpu.memory_space<vmem>>, vector<8x324xf32>
    %c0_68 = arith.constant 0 : index
    %c2_69 = arith.constant 2 : index
    %340 = vector.load %arg9[%c0_68, %c2_69] : memref<8x384xf32, #tpu.memory_space<vmem>>, vector<8x324xf32>
    %c0_70 = arith.constant 0 : index
    %c18_71 = arith.constant 18 : index
    %341 = vector.load %arg9[%c0_70, %c18_71] : memref<8x384xf32, #tpu.memory_space<vmem>>, vector<8x324xf32>
    %c0_72 = arith.constant 0 : index
    %c19_73 = arith.constant 19 : index
    %342 = vector.load %arg9[%c0_72, %c19_73] : memref<8x384xf32, #tpu.memory_space<vmem>>, vector<8x324xf32>
    %c0_74 = arith.constant 0 : index
    %c20_75 = arith.constant 20 : index
    %343 = vector.load %arg9[%c0_74, %c20_75] : memref<8x384xf32, #tpu.memory_space<vmem>>, vector<8x324xf32>
    %c0_76 = arith.constant 0 : index
    %c36_77 = arith.constant 36 : index
    %344 = vector.load %arg9[%c0_76, %c36_77] : memref<8x384xf32, #tpu.memory_space<vmem>>, vector<8x324xf32>
    %c0_78 = arith.constant 0 : index
    %c37_79 = arith.constant 37 : index
    %345 = vector.load %arg9[%c0_78, %c37_79] : memref<8x384xf32, #tpu.memory_space<vmem>>, vector<8x324xf32>
    %c0_80 = arith.constant 0 : index
    %c38_81 = arith.constant 38 : index
    %346 = vector.load %arg9[%c0_80, %c38_81] : memref<8x384xf32, #tpu.memory_space<vmem>>, vector<8x324xf32>
    %c0_82 = arith.constant 0 : index
    %c0_83 = arith.constant 0 : index
    %c0_84 = arith.constant 0 : index
    %347 = vector.load %arg5[%c0_82, %c0_83, %c0_84] : memref<12x72x1xf32, #tpu.memory_space<vmem>>, vector<1x72x1xf32>
    %348 = vector.shape_cast %347 : vector<1x72x1xf32> to vector<72x1xf32>
    %c1_85 = arith.constant 1 : index
    %c0_86 = arith.constant 0 : index
    %c0_87 = arith.constant 0 : index
    %349 = vector.load %arg5[%c1_85, %c0_86, %c0_87] : memref<12x72x1xf32, #tpu.memory_space<vmem>>, vector<1x72x1xf32>
    %350 = vector.shape_cast %349 : vector<1x72x1xf32> to vector<72x1xf32>
    %c2_88 = arith.constant 2 : index
    %c0_89 = arith.constant 0 : index
    %c0_90 = arith.constant 0 : index
    %351 = vector.load %arg5[%c2_88, %c0_89, %c0_90] : memref<12x72x1xf32, #tpu.memory_space<vmem>>, vector<1x72x1xf32>
    %352 = vector.shape_cast %351 : vector<1x72x1xf32> to vector<72x1xf32>
    %c3_91 = arith.constant 3 : index
    %c0_92 = arith.constant 0 : index
    %c0_93 = arith.constant 0 : index
    %353 = vector.load %arg5[%c3_91, %c0_92, %c0_93] : memref<12x72x1xf32, #tpu.memory_space<vmem>>, vector<1x72x1xf32>
    %354 = vector.shape_cast %353 : vector<1x72x1xf32> to vector<72x1xf32>
    %355 = vector.extract_strided_slice %348 {offsets = [0, 0], sizes = [8, 1], strides = [1, 1]} : vector<72x1xf32> to vector<8x1xf32>
    %356 = vector.broadcast %355 : vector<8x1xf32> to vector<8x324xf32>
    %357 = arith.mulf %338, %356 : vector<8x324xf32>
    %358 = vector.extract_strided_slice %348 {offsets = [8, 0], sizes = [8, 1], strides = [1, 1]} : vector<72x1xf32> to vector<8x1xf32>
    %359 = vector.broadcast %358 : vector<8x1xf32> to vector<8x324xf32>
    %360 = arith.mulf %339, %359 : vector<8x324xf32>
    %361 = arith.addf %357, %360 : vector<8x324xf32>
    %362 = vector.extract_strided_slice %350 {offsets = [8, 0], sizes = [8, 1], strides = [1, 1]} : vector<72x1xf32> to vector<8x1xf32>
    %363 = vector.broadcast %362 : vector<8x1xf32> to vector<8x324xf32>
    %364 = arith.mulf %339, %363 : vector<8x324xf32>
    %365 = vector.extract_strided_slice %350 {offsets = [16, 0], sizes = [8, 1], strides = [1, 1]} : vector<72x1xf32> to vector<8x1xf32>
    %366 = vector.broadcast %365 : vector<8x1xf32> to vector<8x324xf32>
    %367 = arith.mulf %340, %366 : vector<8x324xf32>
    %368 = arith.addf %364, %367 : vector<8x324xf32>
    %369 = vector.extract_strided_slice %348 {offsets = [24, 0], sizes = [8, 1], strides = [1, 1]} : vector<72x1xf32> to vector<8x1xf32>
    %370 = vector.broadcast %369 : vector<8x1xf32> to vector<8x324xf32>
    %371 = arith.mulf %341, %370 : vector<8x324xf32>
    %372 = arith.addf %361, %371 : vector<8x324xf32>
    %373 = vector.extract_strided_slice %352 {offsets = [24, 0], sizes = [8, 1], strides = [1, 1]} : vector<72x1xf32> to vector<8x1xf32>
    %374 = vector.broadcast %373 : vector<8x1xf32> to vector<8x324xf32>
    %375 = arith.mulf %341, %374 : vector<8x324xf32>
    %376 = vector.extract_strided_slice %348 {offsets = [32, 0], sizes = [8, 1], strides = [1, 1]} : vector<72x1xf32> to vector<8x1xf32>
    %377 = vector.broadcast %376 : vector<8x1xf32> to vector<8x324xf32>
    %378 = arith.mulf %342, %377 : vector<8x324xf32>
    %379 = arith.addf %372, %378 : vector<8x324xf32>
    %380 = vector.extract_strided_slice %350 {offsets = [32, 0], sizes = [8, 1], strides = [1, 1]} : vector<72x1xf32> to vector<8x1xf32>
    %381 = vector.broadcast %380 : vector<8x1xf32> to vector<8x324xf32>
    %382 = arith.mulf %342, %381 : vector<8x324xf32>
    %383 = arith.addf %368, %382 : vector<8x324xf32>
    %384 = vector.extract_strided_slice %352 {offsets = [32, 0], sizes = [8, 1], strides = [1, 1]} : vector<72x1xf32> to vector<8x1xf32>
    %385 = vector.broadcast %384 : vector<8x1xf32> to vector<8x324xf32>
    %386 = arith.mulf %342, %385 : vector<8x324xf32>
    %387 = arith.addf %375, %386 : vector<8x324xf32>
    %388 = vector.extract_strided_slice %354 {offsets = [32, 0], sizes = [8, 1], strides = [1, 1]} : vector<72x1xf32> to vector<8x1xf32>
    %389 = vector.broadcast %388 : vector<8x1xf32> to vector<8x324xf32>
    %390 = arith.mulf %342, %389 : vector<8x324xf32>
    %391 = vector.extract_strided_slice %350 {offsets = [40, 0], sizes = [8, 1], strides = [1, 1]} : vector<72x1xf32> to vector<8x1xf32>
    %392 = vector.broadcast %391 : vector<8x1xf32> to vector<8x324xf32>
    %393 = arith.mulf %343, %392 : vector<8x324xf32>
    %394 = arith.addf %383, %393 : vector<8x324xf32>
    %395 = vector.extract_strided_slice %354 {offsets = [40, 0], sizes = [8, 1], strides = [1, 1]} : vector<72x1xf32> to vector<8x1xf32>
    %396 = vector.broadcast %395 : vector<8x1xf32> to vector<8x324xf32>
    %397 = arith.mulf %343, %396 : vector<8x324xf32>
    %398 = arith.addf %390, %397 : vector<8x324xf32>
    %399 = vector.extract_strided_slice %352 {offsets = [48, 0], sizes = [8, 1], strides = [1, 1]} : vector<72x1xf32> to vector<8x1xf32>
    %400 = vector.broadcast %399 : vector<8x1xf32> to vector<8x324xf32>
    %401 = arith.mulf %344, %400 : vector<8x324xf32>
    %402 = arith.addf %387, %401 : vector<8x324xf32>
    %403 = vector.extract_strided_slice %352 {offsets = [56, 0], sizes = [8, 1], strides = [1, 1]} : vector<72x1xf32> to vector<8x1xf32>
    %404 = vector.broadcast %403 : vector<8x1xf32> to vector<8x324xf32>
    %405 = arith.mulf %345, %404 : vector<8x324xf32>
    %406 = arith.addf %402, %405 : vector<8x324xf32>
    %407 = vector.extract_strided_slice %354 {offsets = [56, 0], sizes = [8, 1], strides = [1, 1]} : vector<72x1xf32> to vector<8x1xf32>
    %408 = vector.broadcast %407 : vector<8x1xf32> to vector<8x324xf32>
    %409 = arith.mulf %345, %408 : vector<8x324xf32>
    %410 = arith.addf %398, %409 : vector<8x324xf32>
    %411 = vector.extract_strided_slice %354 {offsets = [64, 0], sizes = [8, 1], strides = [1, 1]} : vector<72x1xf32> to vector<8x1xf32>
    %412 = vector.broadcast %411 : vector<8x1xf32> to vector<8x324xf32>
    %413 = arith.mulf %346, %412 : vector<8x324xf32>
    %414 = arith.addf %410, %413 : vector<8x324xf32>
    %415 = vector.extract_strided_slice %379 {offsets = [0, 0], sizes = [2, 324], strides = [1, 1]} : vector<8x324xf32> to vector<2x324xf32>
    %416 = vector.extract_strided_slice %379 {offsets = [2, 0], sizes = [2, 324], strides = [1, 1]} : vector<8x324xf32> to vector<2x324xf32>
    %417 = arith.addf %415, %416 : vector<2x324xf32>
    %418 = vector.extract_strided_slice %379 {offsets = [4, 0], sizes = [2, 324], strides = [1, 1]} : vector<8x324xf32> to vector<2x324xf32>
    %419 = arith.addf %417, %418 : vector<2x324xf32>
    %420 = vector.extract_strided_slice %379 {offsets = [6, 0], sizes = [2, 324], strides = [1, 1]} : vector<8x324xf32> to vector<2x324xf32>
    %421 = arith.addf %419, %420 : vector<2x324xf32>
    %422 = vector.extract_strided_slice %394 {offsets = [0, 0], sizes = [2, 324], strides = [1, 1]} : vector<8x324xf32> to vector<2x324xf32>
    %423 = vector.extract_strided_slice %394 {offsets = [2, 0], sizes = [2, 324], strides = [1, 1]} : vector<8x324xf32> to vector<2x324xf32>
    %424 = arith.addf %422, %423 : vector<2x324xf32>
    %425 = vector.extract_strided_slice %394 {offsets = [4, 0], sizes = [2, 324], strides = [1, 1]} : vector<8x324xf32> to vector<2x324xf32>
    %426 = arith.addf %424, %425 : vector<2x324xf32>
    %427 = vector.extract_strided_slice %394 {offsets = [6, 0], sizes = [2, 324], strides = [1, 1]} : vector<8x324xf32> to vector<2x324xf32>
    %428 = arith.addf %426, %427 : vector<2x324xf32>
    %429 = vector.extract_strided_slice %406 {offsets = [0, 0], sizes = [2, 324], strides = [1, 1]} : vector<8x324xf32> to vector<2x324xf32>
    %430 = vector.extract_strided_slice %406 {offsets = [2, 0], sizes = [2, 324], strides = [1, 1]} : vector<8x324xf32> to vector<2x324xf32>
    %431 = arith.addf %429, %430 : vector<2x324xf32>
    %432 = vector.extract_strided_slice %406 {offsets = [4, 0], sizes = [2, 324], strides = [1, 1]} : vector<8x324xf32> to vector<2x324xf32>
    %433 = arith.addf %431, %432 : vector<2x324xf32>
    %434 = vector.extract_strided_slice %406 {offsets = [6, 0], sizes = [2, 324], strides = [1, 1]} : vector<8x324xf32> to vector<2x324xf32>
    %435 = arith.addf %433, %434 : vector<2x324xf32>
    %436 = vector.extract_strided_slice %414 {offsets = [0, 0], sizes = [2, 324], strides = [1, 1]} : vector<8x324xf32> to vector<2x324xf32>
    %437 = vector.extract_strided_slice %414 {offsets = [2, 0], sizes = [2, 324], strides = [1, 1]} : vector<8x324xf32> to vector<2x324xf32>
    %438 = arith.addf %436, %437 : vector<2x324xf32>
    %439 = vector.extract_strided_slice %414 {offsets = [4, 0], sizes = [2, 324], strides = [1, 1]} : vector<8x324xf32> to vector<2x324xf32>
    %440 = arith.addf %438, %439 : vector<2x324xf32>
    %441 = vector.extract_strided_slice %414 {offsets = [6, 0], sizes = [2, 324], strides = [1, 1]} : vector<8x324xf32> to vector<2x324xf32>
    %442 = arith.addf %440, %441 : vector<2x324xf32>
    %443 = arith.addf %421, %428 : vector<2x324xf32>
    %444 = arith.addf %443, %435 : vector<2x324xf32>
    %445 = arith.addf %444, %442 : vector<2x324xf32>
    %446 = vector.broadcast %0 : vector<1x324xf32> to vector<2x324xf32>
    %447 = arith.mulf %445, %446 : vector<2x324xf32>
    %448 = vector.shape_cast %447 : vector<2x324xf32> to vector<1x2x324xf32>
    %cst_94 = arith.constant dense<0.000000e+00> : vector<1xf32>
    %449 = vector.multi_reduction <add>, %448, %cst_94 [1, 2] : vector<1x2x324xf32> to vector<1xf32>
    %450 = vector.shape_cast %449 : vector<1xf32> to vector<1x1x1xf32>
    %451 = vector.extract %450[0, 0, 0] : f32 from vector<1x1x1xf32>
    %452 = vector.broadcast %451 : f32 to vector<1x1xf32>
    %cst_95 = arith.constant 4.8828125E-4 : f32
    %453 = vector.broadcast %cst_95 : f32 to vector<1x1xf32>
    %454 = arith.mulf %452, %453 : vector<1x1xf32>
    %455 = vector.broadcast %454 : vector<1x1xf32> to vector<2x324xf32>
    %456 = arith.subf %421, %455 : vector<2x324xf32>
    %457 = vector.broadcast %454 : vector<1x1xf32> to vector<2x324xf32>
    %458 = arith.subf %428, %457 : vector<2x324xf32>
    %459 = vector.broadcast %454 : vector<1x1xf32> to vector<2x324xf32>
    %460 = arith.subf %435, %459 : vector<2x324xf32>
    %461 = vector.broadcast %454 : vector<1x1xf32> to vector<2x324xf32>
    %462 = arith.subf %442, %461 : vector<2x324xf32>
    %463 = arith.mulf %456, %456 : vector<2x324xf32>
    %464 = arith.mulf %458, %458 : vector<2x324xf32>
    %465 = arith.addf %463, %464 : vector<2x324xf32>
    %466 = arith.mulf %460, %460 : vector<2x324xf32>
    %467 = arith.addf %465, %466 : vector<2x324xf32>
    %468 = arith.mulf %462, %462 : vector<2x324xf32>
    %469 = arith.addf %467, %468 : vector<2x324xf32>
    %470 = vector.broadcast %0 : vector<1x324xf32> to vector<2x324xf32>
    %471 = arith.mulf %469, %470 : vector<2x324xf32>
    %472 = vector.shape_cast %471 : vector<2x324xf32> to vector<1x2x324xf32>
    %cst_96 = arith.constant dense<0.000000e+00> : vector<1xf32>
    %473 = vector.multi_reduction <add>, %472, %cst_96 [1, 2] : vector<1x2x324xf32> to vector<1xf32>
    %474 = vector.shape_cast %473 : vector<1xf32> to vector<1x1x1xf32>
    %475 = vector.extract %474[0, 0, 0] : f32 from vector<1x1x1xf32>
    %476 = vector.broadcast %475 : f32 to vector<1x1xf32>
    %cst_97 = arith.constant 4.8828125E-4 : f32
    %477 = vector.broadcast %cst_97 : f32 to vector<1x1xf32>
    %478 = arith.mulf %476, %477 : vector<1x1xf32>
    %cst_98 = arith.constant 9.99999974E-6 : f32
    %479 = vector.broadcast %cst_98 : f32 to vector<1x1xf32>
    %480 = arith.addf %478, %479 : vector<1x1xf32>
    %481 = math.rsqrt %480 : vector<1x1xf32>
    %c0_99 = arith.constant 0 : index
    %482 = memref.load %arg6[%c0_99] : memref<3xf32, #tpu.memory_space<smem>>
    %483 = vector.broadcast %482 : f32 to vector<1x1xf32>
    %484 = arith.mulf %481, %483 : vector<1x1xf32>
    %485 = vector.broadcast %484 : vector<1x1xf32> to vector<2x324xf32>
    %486 = arith.mulf %456, %485 : vector<2x324xf32>
    %c0_100 = arith.constant 0 : index
    %487 = memref.load %arg7[%c0_100] : memref<3xf32, #tpu.memory_space<smem>>
    %488 = vector.broadcast %487 : f32 to vector<2x324xf32>
    %489 = arith.addf %486, %488 : vector<2x324xf32>
    %cst_101 = arith.constant 0.000000e+00 : f32
    %490 = vector.broadcast %cst_101 : f32 to vector<2x324xf32>
    %491 = arith.maximumf %489, %490 : vector<2x324xf32>
    %c0_102 = arith.constant 0 : index
    %c0_103 = arith.constant 0 : index
    %c0_104 = arith.constant 0 : index
    %492 = vector.load %arg8[%c0_102, %c0_103, %c0_104] : memref<12x2x324xf32, #tpu.memory_space<vmem>>, vector<1x2x324xf32>
    %493 = vector.shape_cast %492 : vector<1x2x324xf32> to vector<2x324xf32>
    %494 = vector.shape_cast %491 : vector<2x324xf32> to vector<1x2x324xf32>
    tpu.vector_store %arg8[%c0_102, %c0_103, %c0_104], %494 {strides = array<i32>} : memref<12x2x324xf32, #tpu.memory_space<vmem>>, vector<1x2x324xf32>,
    %495 = vector.broadcast %484 : vector<1x1xf32> to vector<2x324xf32>
    %496 = arith.mulf %458, %495 : vector<2x324xf32>
    %c0_105 = arith.constant 0 : index
    %497 = memref.load %arg7[%c0_105] : memref<3xf32, #tpu.memory_space<smem>>
    %498 = vector.broadcast %497 : f32 to vector<2x324xf32>
    %499 = arith.addf %496, %498 : vector<2x324xf32>
    %cst_106 = arith.constant 0.000000e+00 : f32
    %500 = vector.broadcast %cst_106 : f32 to vector<2x324xf32>
    %501 = arith.maximumf %499, %500 : vector<2x324xf32>
    %c1_107 = arith.constant 1 : index
    %c0_108 = arith.constant 0 : index
    %c0_109 = arith.constant 0 : index
    %502 = vector.load %arg8[%c1_107, %c0_108, %c0_109] : memref<12x2x324xf32, #tpu.memory_space<vmem>>, vector<1x2x324xf32>
    %503 = vector.shape_cast %502 : vector<1x2x324xf32> to vector<2x324xf32>
    %504 = vector.shape_cast %501 : vector<2x324xf32> to vector<1x2x324xf32>
    tpu.vector_store %arg8[%c1_107, %c0_108, %c0_109], %504 {strides = array<i32>} : memref<12x2x324xf32, #tpu.memory_space<vmem>>, vector<1x2x324xf32>,
    %505 = vector.broadcast %484 : vector<1x1xf32> to vector<2x324xf32>
    %506 = arith.mulf %460, %505 : vector<2x324xf32>
    %c0_110 = arith.constant 0 : index
    %507 = memref.load %arg7[%c0_110] : memref<3xf32, #tpu.memory_space<smem>>
    %508 = vector.broadcast %507 : f32 to vector<2x324xf32>
    %509 = arith.addf %506, %508 : vector<2x324xf32>
    %cst_111 = arith.constant 0.000000e+00 : f32
    %510 = vector.broadcast %cst_111 : f32 to vector<2x324xf32>
    %511 = arith.maximumf %509, %510 : vector<2x324xf32>
    %c2_112 = arith.constant 2 : index
    %c0_113 = arith.constant 0 : index
    %c0_114 = arith.constant 0 : index
    %512 = vector.load %arg8[%c2_112, %c0_113, %c0_114] : memref<12x2x324xf32, #tpu.memory_space<vmem>>, vector<1x2x324xf32>
    %513 = vector.shape_cast %512 : vector<1x2x324xf32> to vector<2x324xf32>
    %514 = vector.shape_cast %511 : vector<2x324xf32> to vector<1x2x324xf32>
    tpu.vector_store %arg8[%c2_112, %c0_113, %c0_114], %514 {strides = array<i32>} : memref<12x2x324xf32, #tpu.memory_space<vmem>>, vector<1x2x324xf32>,
    %515 = vector.broadcast %484 : vector<1x1xf32> to vector<2x324xf32>
    %516 = arith.mulf %462, %515 : vector<2x324xf32>
    %c0_115 = arith.constant 0 : index
    %517 = memref.load %arg7[%c0_115] : memref<3xf32, #tpu.memory_space<smem>>
    %518 = vector.broadcast %517 : f32 to vector<2x324xf32>
    %519 = arith.addf %516, %518 : vector<2x324xf32>
    %cst_116 = arith.constant 0.000000e+00 : f32
    %520 = vector.broadcast %cst_116 : f32 to vector<2x324xf32>
    %521 = arith.maximumf %519, %520 : vector<2x324xf32>
    %c3_117 = arith.constant 3 : index
    %c0_118 = arith.constant 0 : index
    %c0_119 = arith.constant 0 : index
    %522 = vector.load %arg8[%c3_117, %c0_118, %c0_119] : memref<12x2x324xf32, #tpu.memory_space<vmem>>, vector<1x2x324xf32>
    %523 = vector.shape_cast %522 : vector<1x2x324xf32> to vector<2x324xf32>
    %524 = vector.shape_cast %521 : vector<2x324xf32> to vector<1x2x324xf32>
    tpu.vector_store %arg8[%c3_117, %c0_118, %c0_119], %524 {strides = array<i32>} : memref<12x2x324xf32, #tpu.memory_space<vmem>>, vector<1x2x324xf32>,
    %c4_120 = arith.constant 4 : index
    %c0_121 = arith.constant 0 : index
    %c0_122 = arith.constant 0 : index
    %525 = vector.load %arg5[%c4_120, %c0_121, %c0_122] : memref<12x72x1xf32, #tpu.memory_space<vmem>>, vector<1x72x1xf32>
    %526 = vector.shape_cast %525 : vector<1x72x1xf32> to vector<72x1xf32>
    %c5 = arith.constant 5 : index
    %c0_123 = arith.constant 0 : index
    %c0_124 = arith.constant 0 : index
    %527 = vector.load %arg5[%c5, %c0_123, %c0_124] : memref<12x72x1xf32, #tpu.memory_space<vmem>>, vector<1x72x1xf32>
    %528 = vector.shape_cast %527 : vector<1x72x1xf32> to vector<72x1xf32>
    %c6_125 = arith.constant 6 : index
    %c0_126 = arith.constant 0 : index
    %c0_127 = arith.constant 0 : index
    %529 = vector.load %arg5[%c6_125, %c0_126, %c0_127] : memref<12x72x1xf32, #tpu.memory_space<vmem>>, vector<1x72x1xf32>
    %530 = vector.shape_cast %529 : vector<1x72x1xf32> to vector<72x1xf32>
    %c7 = arith.constant 7 : index
    %c0_128 = arith.constant 0 : index
    %c0_129 = arith.constant 0 : index
    %531 = vector.load %arg5[%c7, %c0_128, %c0_129] : memref<12x72x1xf32, #tpu.memory_space<vmem>>, vector<1x72x1xf32>
    %532 = vector.shape_cast %531 : vector<1x72x1xf32> to vector<72x1xf32>
    %533 = vector.extract_strided_slice %526 {offsets = [0, 0], sizes = [8, 1], strides = [1, 1]} : vector<72x1xf32> to vector<8x1xf32>
    %534 = vector.broadcast %533 : vector<8x1xf32> to vector<8x324xf32>
    %535 = arith.mulf %338, %534 : vector<8x324xf32>
    %536 = vector.extract_strided_slice %526 {offsets = [8, 0], sizes = [8, 1], strides = [1, 1]} : vector<72x1xf32> to vector<8x1xf32>
    %537 = vector.broadcast %536 : vector<8x1xf32> to vector<8x324xf32>
    %538 = arith.mulf %339, %537 : vector<8x324xf32>
    %539 = arith.addf %535, %538 : vector<8x324xf32>
    %540 = vector.extract_strided_slice %528 {offsets = [8, 0], sizes = [8, 1], strides = [1, 1]} : vector<72x1xf32> to vector<8x1xf32>
    %541 = vector.broadcast %540 : vector<8x1xf32> to vector<8x324xf32>
    %542 = arith.mulf %339, %541 : vector<8x324xf32>
    %543 = vector.extract_strided_slice %528 {offsets = [16, 0], sizes = [8, 1], strides = [1, 1]} : vector<72x1xf32> to vector<8x1xf32>
    %544 = vector.broadcast %543 : vector<8x1xf32> to vector<8x324xf32>
    %545 = arith.mulf %340, %544 : vector<8x324xf32>
    %546 = arith.addf %542, %545 : vector<8x324xf32>
    %547 = vector.extract_strided_slice %526 {offsets = [24, 0], sizes = [8, 1], strides = [1, 1]} : vector<72x1xf32> to vector<8x1xf32>
    %548 = vector.broadcast %547 : vector<8x1xf32> to vector<8x324xf32>
    %549 = arith.mulf %341, %548 : vector<8x324xf32>
    %550 = arith.addf %539, %549 : vector<8x324xf32>
    %551 = vector.extract_strided_slice %530 {offsets = [24, 0], sizes = [8, 1], strides = [1, 1]} : vector<72x1xf32> to vector<8x1xf32>
    %552 = vector.broadcast %551 : vector<8x1xf32> to vector<8x324xf32>
    %553 = arith.mulf %341, %552 : vector<8x324xf32>
    %554 = vector.extract_strided_slice %526 {offsets = [32, 0], sizes = [8, 1], strides = [1, 1]} : vector<72x1xf32> to vector<8x1xf32>
    %555 = vector.broadcast %554 : vector<8x1xf32> to vector<8x324xf32>
    %556 = arith.mulf %342, %555 : vector<8x324xf32>
    %557 = arith.addf %550, %556 : vector<8x324xf32>
    %558 = vector.extract_strided_slice %528 {offsets = [32, 0], sizes = [8, 1], strides = [1, 1]} : vector<72x1xf32> to vector<8x1xf32>
    %559 = vector.broadcast %558 : vector<8x1xf32> to vector<8x324xf32>
    %560 = arith.mulf %342, %559 : vector<8x324xf32>
    %561 = arith.addf %546, %560 : vector<8x324xf32>
    %562 = vector.extract_strided_slice %530 {offsets = [32, 0], sizes = [8, 1], strides = [1, 1]} : vector<72x1xf32> to vector<8x1xf32>
    %563 = vector.broadcast %562 : vector<8x1xf32> to vector<8x324xf32>
    %564 = arith.mulf %342, %563 : vector<8x324xf32>
    %565 = arith.addf %553, %564 : vector<8x324xf32>
    %566 = vector.extract_strided_slice %532 {offsets = [32, 0], sizes = [8, 1], strides = [1, 1]} : vector<72x1xf32> to vector<8x1xf32>
    %567 = vector.broadcast %566 : vector<8x1xf32> to vector<8x324xf32>
    %568 = arith.mulf %342, %567 : vector<8x324xf32>
    %569 = vector.extract_strided_slice %528 {offsets = [40, 0], sizes = [8, 1], strides = [1, 1]} : vector<72x1xf32> to vector<8x1xf32>
    %570 = vector.broadcast %569 : vector<8x1xf32> to vector<8x324xf32>
    %571 = arith.mulf %343, %570 : vector<8x324xf32>
    %572 = arith.addf %561, %571 : vector<8x324xf32>
    %573 = vector.extract_strided_slice %532 {offsets = [40, 0], sizes = [8, 1], strides = [1, 1]} : vector<72x1xf32> to vector<8x1xf32>
    %574 = vector.broadcast %573 : vector<8x1xf32> to vector<8x324xf32>
    %575 = arith.mulf %343, %574 : vector<8x324xf32>
    %576 = arith.addf %568, %575 : vector<8x324xf32>
    %577 = vector.extract_strided_slice %530 {offsets = [48, 0], sizes = [8, 1], strides = [1, 1]} : vector<72x1xf32> to vector<8x1xf32>
    %578 = vector.broadcast %577 : vector<8x1xf32> to vector<8x324xf32>
    %579 = arith.mulf %344, %578 : vector<8x324xf32>
    %580 = arith.addf %565, %579 : vector<8x324xf32>
    %581 = vector.extract_strided_slice %530 {offsets = [56, 0], sizes = [8, 1], strides = [1, 1]} : vector<72x1xf32> to vector<8x1xf32>
    %582 = vector.broadcast %581 : vector<8x1xf32> to vector<8x324xf32>
    %583 = arith.mulf %345, %582 : vector<8x324xf32>
    %584 = arith.addf %580, %583 : vector<8x324xf32>
    %585 = vector.extract_strided_slice %532 {offsets = [56, 0], sizes = [8, 1], strides = [1, 1]} : vector<72x1xf32> to vector<8x1xf32>
    %586 = vector.broadcast %585 : vector<8x1xf32> to vector<8x324xf32>
    %587 = arith.mulf %345, %586 : vector<8x324xf32>
    %588 = arith.addf %576, %587 : vector<8x324xf32>
    %589 = vector.extract_strided_slice %532 {offsets = [64, 0], sizes = [8, 1], strides = [1, 1]} : vector<72x1xf32> to vector<8x1xf32>
    %590 = vector.broadcast %589 : vector<8x1xf32> to vector<8x324xf32>
    %591 = arith.mulf %346, %590 : vector<8x324xf32>
    %592 = arith.addf %588, %591 : vector<8x324xf32>
    %593 = vector.extract_strided_slice %557 {offsets = [0, 0], sizes = [2, 324], strides = [1, 1]} : vector<8x324xf32> to vector<2x324xf32>
    %594 = vector.extract_strided_slice %557 {offsets = [2, 0], sizes = [2, 324], strides = [1, 1]} : vector<8x324xf32> to vector<2x324xf32>
    %595 = arith.addf %593, %594 : vector<2x324xf32>
    %596 = vector.extract_strided_slice %557 {offsets = [4, 0], sizes = [2, 324], strides = [1, 1]} : vector<8x324xf32> to vector<2x324xf32>
    %597 = arith.addf %595, %596 : vector<2x324xf32>
    %598 = vector.extract_strided_slice %557 {offsets = [6, 0], sizes = [2, 324], strides = [1, 1]} : vector<8x324xf32> to vector<2x324xf32>
    %599 = arith.addf %597, %598 : vector<2x324xf32>
    %600 = vector.extract_strided_slice %572 {offsets = [0, 0], sizes = [2, 324], strides = [1, 1]} : vector<8x324xf32> to vector<2x324xf32>
    %601 = vector.extract_strided_slice %572 {offsets = [2, 0], sizes = [2, 324], strides = [1, 1]} : vector<8x324xf32> to vector<2x324xf32>
    %602 = arith.addf %600, %601 : vector<2x324xf32>
    %603 = vector.extract_strided_slice %572 {offsets = [4, 0], sizes = [2, 324], strides = [1, 1]} : vector<8x324xf32> to vector<2x324xf32>
    %604 = arith.addf %602, %603 : vector<2x324xf32>
    %605 = vector.extract_strided_slice %572 {offsets = [6, 0], sizes = [2, 324], strides = [1, 1]} : vector<8x324xf32> to vector<2x324xf32>
    %606 = arith.addf %604, %605 : vector<2x324xf32>
    %607 = vector.extract_strided_slice %584 {offsets = [0, 0], sizes = [2, 324], strides = [1, 1]} : vector<8x324xf32> to vector<2x324xf32>
    %608 = vector.extract_strided_slice %584 {offsets = [2, 0], sizes = [2, 324], strides = [1, 1]} : vector<8x324xf32> to vector<2x324xf32>
    %609 = arith.addf %607, %608 : vector<2x324xf32>
    %610 = vector.extract_strided_slice %584 {offsets = [4, 0], sizes = [2, 324], strides = [1, 1]} : vector<8x324xf32> to vector<2x324xf32>
    %611 = arith.addf %609, %610 : vector<2x324xf32>
    %612 = vector.extract_strided_slice %584 {offsets = [6, 0], sizes = [2, 324], strides = [1, 1]} : vector<8x324xf32> to vector<2x324xf32>
    %613 = arith.addf %611, %612 : vector<2x324xf32>
    %614 = vector.extract_strided_slice %592 {offsets = [0, 0], sizes = [2, 324], strides = [1, 1]} : vector<8x324xf32> to vector<2x324xf32>
    %615 = vector.extract_strided_slice %592 {offsets = [2, 0], sizes = [2, 324], strides = [1, 1]} : vector<8x324xf32> to vector<2x324xf32>
    %616 = arith.addf %614, %615 : vector<2x324xf32>
    %617 = vector.extract_strided_slice %592 {offsets = [4, 0], sizes = [2, 324], strides = [1, 1]} : vector<8x324xf32> to vector<2x324xf32>
    %618 = arith.addf %616, %617 : vector<2x324xf32>
    %619 = vector.extract_strided_slice %592 {offsets = [6, 0], sizes = [2, 324], strides = [1, 1]} : vector<8x324xf32> to vector<2x324xf32>
    %620 = arith.addf %618, %619 : vector<2x324xf32>
    %621 = arith.addf %599, %606 : vector<2x324xf32>
    %622 = arith.addf %621, %613 : vector<2x324xf32>
    %623 = arith.addf %622, %620 : vector<2x324xf32>
    %624 = vector.broadcast %0 : vector<1x324xf32> to vector<2x324xf32>
    %625 = arith.mulf %623, %624 : vector<2x324xf32>
    %626 = vector.shape_cast %625 : vector<2x324xf32> to vector<1x2x324xf32>
    %cst_130 = arith.constant dense<0.000000e+00> : vector<1xf32>
    %627 = vector.multi_reduction <add>, %626, %cst_130 [1, 2] : vector<1x2x324xf32> to vector<1xf32>
    %628 = vector.shape_cast %627 : vector<1xf32> to vector<1x1x1xf32>
    %629 = vector.extract %628[0, 0, 0] : f32 from vector<1x1x1xf32>
    %630 = vector.broadcast %629 : f32 to vector<1x1xf32>
    %cst_131 = arith.constant 4.8828125E-4 : f32
    %631 = vector.broadcast %cst_131 : f32 to vector<1x1xf32>
    %632 = arith.mulf %630, %631 : vector<1x1xf32>
    %633 = vector.broadcast %632 : vector<1x1xf32> to vector<2x324xf32>
    %634 = arith.subf %599, %633 : vector<2x324xf32>
    %635 = vector.broadcast %632 : vector<1x1xf32> to vector<2x324xf32>
    %636 = arith.subf %606, %635 : vector<2x324xf32>
    %637 = vector.broadcast %632 : vector<1x1xf32> to vector<2x324xf32>
    %638 = arith.subf %613, %637 : vector<2x324xf32>
    %639 = vector.broadcast %632 : vector<1x1xf32> to vector<2x324xf32>
    %640 = arith.subf %620, %639 : vector<2x324xf32>
    %641 = arith.mulf %634, %634 : vector<2x324xf32>
    %642 = arith.mulf %636, %636 : vector<2x324xf32>
    %643 = arith.addf %641, %642 : vector<2x324xf32>
    %644 = arith.mulf %638, %638 : vector<2x324xf32>
    %645 = arith.addf %643, %644 : vector<2x324xf32>
    %646 = arith.mulf %640, %640 : vector<2x324xf32>
    %647 = arith.addf %645, %646 : vector<2x324xf32>
    %648 = vector.broadcast %0 : vector<1x324xf32> to vector<2x324xf32>
    %649 = arith.mulf %647, %648 : vector<2x324xf32>
    %650 = vector.shape_cast %649 : vector<2x324xf32> to vector<1x2x324xf32>
    %cst_132 = arith.constant dense<0.000000e+00> : vector<1xf32>
    %651 = vector.multi_reduction <add>, %650, %cst_132 [1, 2] : vector<1x2x324xf32> to vector<1xf32>
    %652 = vector.shape_cast %651 : vector<1xf32> to vector<1x1x1xf32>
    %653 = vector.extract %652[0, 0, 0] : f32 from vector<1x1x1xf32>
    %654 = vector.broadcast %653 : f32 to vector<1x1xf32>
    %cst_133 = arith.constant 4.8828125E-4 : f32
    %655 = vector.broadcast %cst_133 : f32 to vector<1x1xf32>
    %656 = arith.mulf %654, %655 : vector<1x1xf32>
    %cst_134 = arith.constant 9.99999974E-6 : f32
    %657 = vector.broadcast %cst_134 : f32 to vector<1x1xf32>
    %658 = arith.addf %656, %657 : vector<1x1xf32>
    %659 = math.rsqrt %658 : vector<1x1xf32>
    %c1_135 = arith.constant 1 : index
    %660 = memref.load %arg6[%c1_135] : memref<3xf32, #tpu.memory_space<smem>>
    %661 = vector.broadcast %660 : f32 to vector<1x1xf32>
    %662 = arith.mulf %659, %661 : vector<1x1xf32>
    %663 = vector.broadcast %662 : vector<1x1xf32> to vector<2x324xf32>
    %664 = arith.mulf %634, %663 : vector<2x324xf32>
    %c1_136 = arith.constant 1 : index
    %665 = memref.load %arg7[%c1_136] : memref<3xf32, #tpu.memory_space<smem>>
    %666 = vector.broadcast %665 : f32 to vector<2x324xf32>
    %667 = arith.addf %664, %666 : vector<2x324xf32>
    %cst_137 = arith.constant 0.000000e+00 : f32
    %668 = vector.broadcast %cst_137 : f32 to vector<2x324xf32>
    %669 = arith.maximumf %667, %668 : vector<2x324xf32>
    %c4_138 = arith.constant 4 : index
    %c0_139 = arith.constant 0 : index
    %c0_140 = arith.constant 0 : index
    %670 = vector.load %arg8[%c4_138, %c0_139, %c0_140] : memref<12x2x324xf32, #tpu.memory_space<vmem>>, vector<1x2x324xf32>
    %671 = vector.shape_cast %670 : vector<1x2x324xf32> to vector<2x324xf32>
    %672 = vector.shape_cast %669 : vector<2x324xf32> to vector<1x2x324xf32>
    tpu.vector_store %arg8[%c4_138, %c0_139, %c0_140], %672 {strides = array<i32>} : memref<12x2x324xf32, #tpu.memory_space<vmem>>, vector<1x2x324xf32>,
    %673 = vector.broadcast %662 : vector<1x1xf32> to vector<2x324xf32>
    %674 = arith.mulf %636, %673 : vector<2x324xf32>
    %c1_141 = arith.constant 1 : index
    %675 = memref.load %arg7[%c1_141] : memref<3xf32, #tpu.memory_space<smem>>
    %676 = vector.broadcast %675 : f32 to vector<2x324xf32>
    %677 = arith.addf %674, %676 : vector<2x324xf32>
    %cst_142 = arith.constant 0.000000e+00 : f32
    %678 = vector.broadcast %cst_142 : f32 to vector<2x324xf32>
    %679 = arith.maximumf %677, %678 : vector<2x324xf32>
    %c5_143 = arith.constant 5 : index
    %c0_144 = arith.constant 0 : index
    %c0_145 = arith.constant 0 : index
    %680 = vector.load %arg8[%c5_143, %c0_144, %c0_145] : memref<12x2x324xf32, #tpu.memory_space<vmem>>, vector<1x2x324xf32>
    %681 = vector.shape_cast %680 : vector<1x2x324xf32> to vector<2x324xf32>
    %682 = vector.shape_cast %679 : vector<2x324xf32> to vector<1x2x324xf32>
    tpu.vector_store %arg8[%c5_143, %c0_144, %c0_145], %682 {strides = array<i32>} : memref<12x2x324xf32, #tpu.memory_space<vmem>>, vector<1x2x324xf32>,
    %683 = vector.broadcast %662 : vector<1x1xf32> to vector<2x324xf32>
    %684 = arith.mulf %638, %683 : vector<2x324xf32>
    %c1_146 = arith.constant 1 : index
    %685 = memref.load %arg7[%c1_146] : memref<3xf32, #tpu.memory_space<smem>>
    %686 = vector.broadcast %685 : f32 to vector<2x324xf32>
    %687 = arith.addf %684, %686 : vector<2x324xf32>
    %cst_147 = arith.constant 0.000000e+00 : f32
    %688 = vector.broadcast %cst_147 : f32 to vector<2x324xf32>
    %689 = arith.maximumf %687, %688 : vector<2x324xf32>
    %c6_148 = arith.constant 6 : index
    %c0_149 = arith.constant 0 : index
    %c0_150 = arith.constant 0 : index
    %690 = vector.load %arg8[%c6_148, %c0_149, %c0_150] : memref<12x2x324xf32, #tpu.memory_space<vmem>>, vector<1x2x324xf32>
    %691 = vector.shape_cast %690 : vector<1x2x324xf32> to vector<2x324xf32>
    %692 = vector.shape_cast %689 : vector<2x324xf32> to vector<1x2x324xf32>
    tpu.vector_store %arg8[%c6_148, %c0_149, %c0_150], %692 {strides = array<i32>} : memref<12x2x324xf32, #tpu.memory_space<vmem>>, vector<1x2x324xf32>,
    %693 = vector.broadcast %662 : vector<1x1xf32> to vector<2x324xf32>
    %694 = arith.mulf %640, %693 : vector<2x324xf32>
    %c1_151 = arith.constant 1 : index
    %695 = memref.load %arg7[%c1_151] : memref<3xf32, #tpu.memory_space<smem>>
    %696 = vector.broadcast %695 : f32 to vector<2x324xf32>
    %697 = arith.addf %694, %696 : vector<2x324xf32>
    %cst_152 = arith.constant 0.000000e+00 : f32
    %698 = vector.broadcast %cst_152 : f32 to vector<2x324xf32>
    %699 = arith.maximumf %697, %698 : vector<2x324xf32>
    %c7_153 = arith.constant 7 : index
    %c0_154 = arith.constant 0 : index
    %c0_155 = arith.constant 0 : index
    %700 = vector.load %arg8[%c7_153, %c0_154, %c0_155] : memref<12x2x324xf32, #tpu.memory_space<vmem>>, vector<1x2x324xf32>
    %701 = vector.shape_cast %700 : vector<1x2x324xf32> to vector<2x324xf32>
    %702 = vector.shape_cast %699 : vector<2x324xf32> to vector<1x2x324xf32>
    tpu.vector_store %arg8[%c7_153, %c0_154, %c0_155], %702 {strides = array<i32>} : memref<12x2x324xf32, #tpu.memory_space<vmem>>, vector<1x2x324xf32>,
    %c8 = arith.constant 8 : index
    %c0_156 = arith.constant 0 : index
    %c0_157 = arith.constant 0 : index
    %703 = vector.load %arg5[%c8, %c0_156, %c0_157] : memref<12x72x1xf32, #tpu.memory_space<vmem>>, vector<1x72x1xf32>
    %704 = vector.shape_cast %703 : vector<1x72x1xf32> to vector<72x1xf32>
    %c9 = arith.constant 9 : index
    %c0_158 = arith.constant 0 : index
    %c0_159 = arith.constant 0 : index
    %705 = vector.load %arg5[%c9, %c0_158, %c0_159] : memref<12x72x1xf32, #tpu.memory_space<vmem>>, vector<1x72x1xf32>
    %706 = vector.shape_cast %705 : vector<1x72x1xf32> to vector<72x1xf32>
    %c10 = arith.constant 10 : index
    %c0_160 = arith.constant 0 : index
    %c0_161 = arith.constant 0 : index
    %707 = vector.load %arg5[%c10, %c0_160, %c0_161] : memref<12x72x1xf32, #tpu.memory_space<vmem>>, vector<1x72x1xf32>
    %708 = vector.shape_cast %707 : vector<1x72x1xf32> to vector<72x1xf32>
    %c11 = arith.constant 11 : index
    %c0_162 = arith.constant 0 : index
    %c0_163 = arith.constant 0 : index
    %709 = vector.load %arg5[%c11, %c0_162, %c0_163] : memref<12x72x1xf32, #tpu.memory_space<vmem>>, vector<1x72x1xf32>
    %710 = vector.shape_cast %709 : vector<1x72x1xf32> to vector<72x1xf32>
    %711 = vector.extract_strided_slice %704 {offsets = [0, 0], sizes = [8, 1], strides = [1, 1]} : vector<72x1xf32> to vector<8x1xf32>
    %712 = vector.broadcast %711 : vector<8x1xf32> to vector<8x324xf32>
    %713 = arith.mulf %338, %712 : vector<8x324xf32>
    %714 = vector.extract_strided_slice %704 {offsets = [8, 0], sizes = [8, 1], strides = [1, 1]} : vector<72x1xf32> to vector<8x1xf32>
    %715 = vector.broadcast %714 : vector<8x1xf32> to vector<8x324xf32>
    %716 = arith.mulf %339, %715 : vector<8x324xf32>
    %717 = arith.addf %713, %716 : vector<8x324xf32>
    %718 = vector.extract_strided_slice %706 {offsets = [8, 0], sizes = [8, 1], strides = [1, 1]} : vector<72x1xf32> to vector<8x1xf32>
    %719 = vector.broadcast %718 : vector<8x1xf32> to vector<8x324xf32>
    %720 = arith.mulf %339, %719 : vector<8x324xf32>
    %721 = vector.extract_strided_slice %706 {offsets = [16, 0], sizes = [8, 1], strides = [1, 1]} : vector<72x1xf32> to vector<8x1xf32>
    %722 = vector.broadcast %721 : vector<8x1xf32> to vector<8x324xf32>
    %723 = arith.mulf %340, %722 : vector<8x324xf32>
    %724 = arith.addf %720, %723 : vector<8x324xf32>
    %725 = vector.extract_strided_slice %704 {offsets = [24, 0], sizes = [8, 1], strides = [1, 1]} : vector<72x1xf32> to vector<8x1xf32>
    %726 = vector.broadcast %725 : vector<8x1xf32> to vector<8x324xf32>
    %727 = arith.mulf %341, %726 : vector<8x324xf32>
    %728 = arith.addf %717, %727 : vector<8x324xf32>
    %729 = vector.extract_strided_slice %708 {offsets = [24, 0], sizes = [8, 1], strides = [1, 1]} : vector<72x1xf32> to vector<8x1xf32>
    %730 = vector.broadcast %729 : vector<8x1xf32> to vector<8x324xf32>
    %731 = arith.mulf %341, %730 : vector<8x324xf32>
    %732 = vector.extract_strided_slice %704 {offsets = [32, 0], sizes = [8, 1], strides = [1, 1]} : vector<72x1xf32> to vector<8x1xf32>
    %733 = vector.broadcast %732 : vector<8x1xf32> to vector<8x324xf32>
    %734 = arith.mulf %342, %733 : vector<8x324xf32>
    %735 = arith.addf %728, %734 : vector<8x324xf32>
    %736 = vector.extract_strided_slice %706 {offsets = [32, 0], sizes = [8, 1], strides = [1, 1]} : vector<72x1xf32> to vector<8x1xf32>
    %737 = vector.broadcast %736 : vector<8x1xf32> to vector<8x324xf32>
    %738 = arith.mulf %342, %737 : vector<8x324xf32>
    %739 = arith.addf %724, %738 : vector<8x324xf32>
    %740 = vector.extract_strided_slice %708 {offsets = [32, 0], sizes = [8, 1], strides = [1, 1]} : vector<72x1xf32> to vector<8x1xf32>
    %741 = vector.broadcast %740 : vector<8x1xf32> to vector<8x324xf32>
    %742 = arith.mulf %342, %741 : vector<8x324xf32>
    %743 = arith.addf %731, %742 : vector<8x324xf32>
    %744 = vector.extract_strided_slice %710 {offsets = [32, 0], sizes = [8, 1], strides = [1, 1]} : vector<72x1xf32> to vector<8x1xf32>
    %745 = vector.broadcast %744 : vector<8x1xf32> to vector<8x324xf32>
    %746 = arith.mulf %342, %745 : vector<8x324xf32>
    %747 = vector.extract_strided_slice %706 {offsets = [40, 0], sizes = [8, 1], strides = [1, 1]} : vector<72x1xf32> to vector<8x1xf32>
    %748 = vector.broadcast %747 : vector<8x1xf32> to vector<8x324xf32>
    %749 = arith.mulf %343, %748 : vector<8x324xf32>
    %750 = arith.addf %739, %749 : vector<8x324xf32>
    %751 = vector.extract_strided_slice %710 {offsets = [40, 0], sizes = [8, 1], strides = [1, 1]} : vector<72x1xf32> to vector<8x1xf32>
    %752 = vector.broadcast %751 : vector<8x1xf32> to vector<8x324xf32>
    %753 = arith.mulf %343, %752 : vector<8x324xf32>
    %754 = arith.addf %746, %753 : vector<8x324xf32>
    %755 = vector.extract_strided_slice %708 {offsets = [48, 0], sizes = [8, 1], strides = [1, 1]} : vector<72x1xf32> to vector<8x1xf32>
    %756 = vector.broadcast %755 : vector<8x1xf32> to vector<8x324xf32>
    %757 = arith.mulf %344, %756 : vector<8x324xf32>
    %758 = arith.addf %743, %757 : vector<8x324xf32>
    %759 = vector.extract_strided_slice %708 {offsets = [56, 0], sizes = [8, 1], strides = [1, 1]} : vector<72x1xf32> to vector<8x1xf32>
    %760 = vector.broadcast %759 : vector<8x1xf32> to vector<8x324xf32>
    %761 = arith.mulf %345, %760 : vector<8x324xf32>
    %762 = arith.addf %758, %761 : vector<8x324xf32>
    %763 = vector.extract_strided_slice %710 {offsets = [56, 0], sizes = [8, 1], strides = [1, 1]} : vector<72x1xf32> to vector<8x1xf32>
    %764 = vector.broadcast %763 : vector<8x1xf32> to vector<8x324xf32>
    %765 = arith.mulf %345, %764 : vector<8x324xf32>
    %766 = arith.addf %754, %765 : vector<8x324xf32>
    %767 = vector.extract_strided_slice %710 {offsets = [64, 0], sizes = [8, 1], strides = [1, 1]} : vector<72x1xf32> to vector<8x1xf32>
    %768 = vector.broadcast %767 : vector<8x1xf32> to vector<8x324xf32>
    %769 = arith.mulf %346, %768 : vector<8x324xf32>
    %770 = arith.addf %766, %769 : vector<8x324xf32>
    %771 = vector.extract_strided_slice %735 {offsets = [0, 0], sizes = [2, 324], strides = [1, 1]} : vector<8x324xf32> to vector<2x324xf32>
    %772 = vector.extract_strided_slice %735 {offsets = [2, 0], sizes = [2, 324], strides = [1, 1]} : vector<8x324xf32> to vector<2x324xf32>
    %773 = arith.addf %771, %772 : vector<2x324xf32>
    %774 = vector.extract_strided_slice %735 {offsets = [4, 0], sizes = [2, 324], strides = [1, 1]} : vector<8x324xf32> to vector<2x324xf32>
    %775 = arith.addf %773, %774 : vector<2x324xf32>
    %776 = vector.extract_strided_slice %735 {offsets = [6, 0], sizes = [2, 324], strides = [1, 1]} : vector<8x324xf32> to vector<2x324xf32>
    %777 = arith.addf %775, %776 : vector<2x324xf32>
    %778 = vector.extract_strided_slice %750 {offsets = [0, 0], sizes = [2, 324], strides = [1, 1]} : vector<8x324xf32> to vector<2x324xf32>
    %779 = vector.extract_strided_slice %750 {offsets = [2, 0], sizes = [2, 324], strides = [1, 1]} : vector<8x324xf32> to vector<2x324xf32>
    %780 = arith.addf %778, %779 : vector<2x324xf32>
    %781 = vector.extract_strided_slice %750 {offsets = [4, 0], sizes = [2, 324], strides = [1, 1]} : vector<8x324xf32> to vector<2x324xf32>
    %782 = arith.addf %780, %781 : vector<2x324xf32>
    %783 = vector.extract_strided_slice %750 {offsets = [6, 0], sizes = [2, 324], strides = [1, 1]} : vector<8x324xf32> to vector<2x324xf32>
    %784 = arith.addf %782, %783 : vector<2x324xf32>
    %785 = vector.extract_strided_slice %762 {offsets = [0, 0], sizes = [2, 324], strides = [1, 1]} : vector<8x324xf32> to vector<2x324xf32>
    %786 = vector.extract_strided_slice %762 {offsets = [2, 0], sizes = [2, 324], strides = [1, 1]} : vector<8x324xf32> to vector<2x324xf32>
    %787 = arith.addf %785, %786 : vector<2x324xf32>
    %788 = vector.extract_strided_slice %762 {offsets = [4, 0], sizes = [2, 324], strides = [1, 1]} : vector<8x324xf32> to vector<2x324xf32>
    %789 = arith.addf %787, %788 : vector<2x324xf32>
    %790 = vector.extract_strided_slice %762 {offsets = [6, 0], sizes = [2, 324], strides = [1, 1]} : vector<8x324xf32> to vector<2x324xf32>
    %791 = arith.addf %789, %790 : vector<2x324xf32>
    %792 = vector.extract_strided_slice %770 {offsets = [0, 0], sizes = [2, 324], strides = [1, 1]} : vector<8x324xf32> to vector<2x324xf32>
    %793 = vector.extract_strided_slice %770 {offsets = [2, 0], sizes = [2, 324], strides = [1, 1]} : vector<8x324xf32> to vector<2x324xf32>
    %794 = arith.addf %792, %793 : vector<2x324xf32>
    %795 = vector.extract_strided_slice %770 {offsets = [4, 0], sizes = [2, 324], strides = [1, 1]} : vector<8x324xf32> to vector<2x324xf32>
    %796 = arith.addf %794, %795 : vector<2x324xf32>
    %797 = vector.extract_strided_slice %770 {offsets = [6, 0], sizes = [2, 324], strides = [1, 1]} : vector<8x324xf32> to vector<2x324xf32>
    %798 = arith.addf %796, %797 : vector<2x324xf32>
    %799 = arith.addf %777, %784 : vector<2x324xf32>
    %800 = arith.addf %799, %791 : vector<2x324xf32>
    %801 = arith.addf %800, %798 : vector<2x324xf32>
    %802 = vector.broadcast %0 : vector<1x324xf32> to vector<2x324xf32>
    %803 = arith.mulf %801, %802 : vector<2x324xf32>
    %804 = vector.shape_cast %803 : vector<2x324xf32> to vector<1x2x324xf32>
    %cst_164 = arith.constant dense<0.000000e+00> : vector<1xf32>
    %805 = vector.multi_reduction <add>, %804, %cst_164 [1, 2] : vector<1x2x324xf32> to vector<1xf32>
    %806 = vector.shape_cast %805 : vector<1xf32> to vector<1x1x1xf32>
    %807 = vector.extract %806[0, 0, 0] : f32 from vector<1x1x1xf32>
    %808 = vector.broadcast %807 : f32 to vector<1x1xf32>
    %cst_165 = arith.constant 4.8828125E-4 : f32
    %809 = vector.broadcast %cst_165 : f32 to vector<1x1xf32>
    %810 = arith.mulf %808, %809 : vector<1x1xf32>
    %811 = vector.broadcast %810 : vector<1x1xf32> to vector<2x324xf32>
    %812 = arith.subf %777, %811 : vector<2x324xf32>
    %813 = vector.broadcast %810 : vector<1x1xf32> to vector<2x324xf32>
    %814 = arith.subf %784, %813 : vector<2x324xf32>
    %815 = vector.broadcast %810 : vector<1x1xf32> to vector<2x324xf32>
    %816 = arith.subf %791, %815 : vector<2x324xf32>
    %817 = vector.broadcast %810 : vector<1x1xf32> to vector<2x324xf32>
    %818 = arith.subf %798, %817 : vector<2x324xf32>
    %819 = arith.mulf %812, %812 : vector<2x324xf32>
    %820 = arith.mulf %814, %814 : vector<2x324xf32>
    %821 = arith.addf %819, %820 : vector<2x324xf32>
    %822 = arith.mulf %816, %816 : vector<2x324xf32>
    %823 = arith.addf %821, %822 : vector<2x324xf32>
    %824 = arith.mulf %818, %818 : vector<2x324xf32>
    %825 = arith.addf %823, %824 : vector<2x324xf32>
    %826 = vector.broadcast %0 : vector<1x324xf32> to vector<2x324xf32>
    %827 = arith.mulf %825, %826 : vector<2x324xf32>
    %828 = vector.shape_cast %827 : vector<2x324xf32> to vector<1x2x324xf32>
    %cst_166 = arith.constant dense<0.000000e+00> : vector<1xf32>
    %829 = vector.multi_reduction <add>, %828, %cst_166 [1, 2] : vector<1x2x324xf32> to vector<1xf32>
    %830 = vector.shape_cast %829 : vector<1xf32> to vector<1x1x1xf32>
    %831 = vector.extract %830[0, 0, 0] : f32 from vector<1x1x1xf32>
    %832 = vector.broadcast %831 : f32 to vector<1x1xf32>
    %cst_167 = arith.constant 4.8828125E-4 : f32
    %833 = vector.broadcast %cst_167 : f32 to vector<1x1xf32>
    %834 = arith.mulf %832, %833 : vector<1x1xf32>
    %cst_168 = arith.constant 9.99999974E-6 : f32
    %835 = vector.broadcast %cst_168 : f32 to vector<1x1xf32>
    %836 = arith.addf %834, %835 : vector<1x1xf32>
    %837 = math.rsqrt %836 : vector<1x1xf32>
    %c2_169 = arith.constant 2 : index
    %838 = memref.load %arg6[%c2_169] : memref<3xf32, #tpu.memory_space<smem>>
    %839 = vector.broadcast %838 : f32 to vector<1x1xf32>
    %840 = arith.mulf %837, %839 : vector<1x1xf32>
    %841 = vector.broadcast %840 : vector<1x1xf32> to vector<2x324xf32>
    %842 = arith.mulf %812, %841 : vector<2x324xf32>
    %c2_170 = arith.constant 2 : index
    %843 = memref.load %arg7[%c2_170] : memref<3xf32, #tpu.memory_space<smem>>
    %844 = vector.broadcast %843 : f32 to vector<2x324xf32>
    %845 = arith.addf %842, %844 : vector<2x324xf32>
    %cst_171 = arith.constant 0.000000e+00 : f32
    %846 = vector.broadcast %cst_171 : f32 to vector<2x324xf32>
    %847 = arith.maximumf %845, %846 : vector<2x324xf32>
    %c8_172 = arith.constant 8 : index
    %c0_173 = arith.constant 0 : index
    %c0_174 = arith.constant 0 : index
    %848 = vector.load %arg8[%c8_172, %c0_173, %c0_174] : memref<12x2x324xf32, #tpu.memory_space<vmem>>, vector<1x2x324xf32>
    %849 = vector.shape_cast %848 : vector<1x2x324xf32> to vector<2x324xf32>
    %850 = vector.shape_cast %847 : vector<2x324xf32> to vector<1x2x324xf32>
    tpu.vector_store %arg8[%c8_172, %c0_173, %c0_174], %850 {strides = array<i32>} : memref<12x2x324xf32, #tpu.memory_space<vmem>>, vector<1x2x324xf32>,
    %851 = vector.broadcast %840 : vector<1x1xf32> to vector<2x324xf32>
    %852 = arith.mulf %814, %851 : vector<2x324xf32>
    %c2_175 = arith.constant 2 : index
    %853 = memref.load %arg7[%c2_175] : memref<3xf32, #tpu.memory_space<smem>>
    %854 = vector.broadcast %853 : f32 to vector<2x324xf32>
    %855 = arith.addf %852, %854 : vector<2x324xf32>
    %cst_176 = arith.constant 0.000000e+00 : f32
    %856 = vector.broadcast %cst_176 : f32 to vector<2x324xf32>
    %857 = arith.maximumf %855, %856 : vector<2x324xf32>
    %c9_177 = arith.constant 9 : index
    %c0_178 = arith.constant 0 : index
    %c0_179 = arith.constant 0 : index
    %858 = vector.load %arg8[%c9_177, %c0_178, %c0_179] : memref<12x2x324xf32, #tpu.memory_space<vmem>>, vector<1x2x324xf32>
    %859 = vector.shape_cast %858 : vector<1x2x324xf32> to vector<2x324xf32>
    %860 = vector.shape_cast %857 : vector<2x324xf32> to vector<1x2x324xf32>
    tpu.vector_store %arg8[%c9_177, %c0_178, %c0_179], %860 {strides = array<i32>} : memref<12x2x324xf32, #tpu.memory_space<vmem>>, vector<1x2x324xf32>,
    %861 = vector.broadcast %840 : vector<1x1xf32> to vector<2x324xf32>
    %862 = arith.mulf %816, %861 : vector<2x324xf32>
    %c2_180 = arith.constant 2 : index
    %863 = memref.load %arg7[%c2_180] : memref<3xf32, #tpu.memory_space<smem>>
    %864 = vector.broadcast %863 : f32 to vector<2x324xf32>
    %865 = arith.addf %862, %864 : vector<2x324xf32>
    %cst_181 = arith.constant 0.000000e+00 : f32
    %866 = vector.broadcast %cst_181 : f32 to vector<2x324xf32>
    %867 = arith.maximumf %865, %866 : vector<2x324xf32>
    %c10_182 = arith.constant 10 : index
    %c0_183 = arith.constant 0 : index
    %c0_184 = arith.constant 0 : index
    %868 = vector.load %arg8[%c10_182, %c0_183, %c0_184] : memref<12x2x324xf32, #tpu.memory_space<vmem>>, vector<1x2x324xf32>
    %869 = vector.shape_cast %868 : vector<1x2x324xf32> to vector<2x324xf32>
    %870 = vector.shape_cast %867 : vector<2x324xf32> to vector<1x2x324xf32>
    tpu.vector_store %arg8[%c10_182, %c0_183, %c0_184], %870 {strides = array<i32>} : memref<12x2x324xf32, #tpu.memory_space<vmem>>, vector<1x2x324xf32>,
    %871 = vector.broadcast %840 : vector<1x1xf32> to vector<2x324xf32>
    %872 = arith.mulf %818, %871 : vector<2x324xf32>
    %c2_185 = arith.constant 2 : index
    %873 = memref.load %arg7[%c2_185] : memref<3xf32, #tpu.memory_space<smem>>
    %874 = vector.broadcast %873 : f32 to vector<2x324xf32>
    %875 = arith.addf %872, %874 : vector<2x324xf32>
    %cst_186 = arith.constant 0.000000e+00 : f32
    %876 = vector.broadcast %cst_186 : f32 to vector<2x324xf32>
    %877 = arith.maximumf %875, %876 : vector<2x324xf32>
    %c11_187 = arith.constant 11 : index
    %c0_188 = arith.constant 0 : index
    %c0_189 = arith.constant 0 : index
    %878 = vector.load %arg8[%c11_187, %c0_188, %c0_189] : memref<12x2x324xf32, #tpu.memory_space<vmem>>, vector<1x2x324xf32>
    %879 = vector.shape_cast %878 : vector<1x2x324xf32> to vector<2x324xf32>
    %880 = vector.shape_cast %877 : vector<2x324xf32> to vector<1x2x324xf32>
    tpu.vector_store %arg8[%c11_187, %c0_188, %c0_189], %880 {strides = array<i32>} : memref<12x2x324xf32, #tpu.memory_space<vmem>>, vector<1x2x324xf32>,
    return
  }
}

</mosaic_0001>

<bundles_post_ra>
// kernel: up_block_forward.1
= control target key start
LH: loop header
LB: loop body
LE: loop exit
PB: predicated region body
PF: predicated region fallthrough
CT: control target
= control target key end

     0   :  { %13 = vsyncpa [#allocation4], 0  ;;  %s6221_s0 = inlined_call_operand.vmem [shape: f32[8,384], index: 0, kind: input, shape index: {}]   ;;  %s6222_s1 = inlined_call_operand.vmem [shape: f32[1,324], index: 1, kind: input, shape index: {}]   ;;  %s6223_s2 = inlined_call_operand.vmem [shape: f32[4,72,1], index: 2, kind: input, shape index: {}]   ;;  %s6224_s3 = inlined_call_operand.vmem [shape: f32[4], index: 3, kind: input, shape index: {}]   ;;  %s6225_s4 = inlined_call_operand.vmem [shape: f32[4], index: 4, kind: input, shape index: {}]   ;;  %s6226_s5 = inlined_call_operand.vmem [shape: f32[12,72,1], index: 5, kind: input, shape index: {}]   ;;  %s6227_s6 = inlined_call_operand.vmem [shape: f32[3], index: 6, kind: input, shape index: {}]   ;;  %s6228_s7 = inlined_call_operand.vmem [shape: f32[3], index: 7, kind: input, shape index: {}]   ;;  %s6229_s8 = inlined_call_operand.vmem [shape: f32[12,2,324], index: 8, kind: output, shape index: {}]  }
   0x1   :  { %14 = vsyncpa [#allocation6], 0  ;;  %s36_s29 = sshll.u32 %s6225_s4, 4  ;;  %s37_s29 = int_to_ptr.vmem [resolvable:$true] %s36_s29 }
   0x2   :  { %15 = vsyncpa [#allocation9], 0  ;;  %s27_s10 = sshll.u32 %s6224_s3, 4  ;;  %s3946_s11 = smov [#allocation5]   ;;  %s28_s10 = int_to_ptr.vmem [resolvable:$true] %s27_s10 }
   0x3   :  { %39 = dma.vmem_to_smem %s37_s29, 16, %s3946_s11, [#allocation6]  }
   0x4   :  { %s3947_s12 = smov [#allocation3]   ;;  %s47_s15 = sshll.u32 %s6227_s6, 4  ;;  %s48_s15 = int_to_ptr.vmem [resolvable:$true] %s47_s15 }
   0x5   :  { %30 = dma.vmem_to_smem %s28_s10, 16, %s3947_s12, [#allocation4]  }
   0x6   :  { %s56_s4 = sshll.u32 %s6228_s7, 4  ;;  %s3948_s18 = smov [#allocation7]   ;;  %s57_s4 = int_to_ptr.vmem [resolvable:$true] %s56_s4 }
   0x7   :  { %50 = dma.vmem_to_smem %s48_s15, 16, %s3948_s18, [#allocation6]  }
   0x8   :  { %s3949_s19 = smov [#allocation8]  }
   0x9   :  { %59 = dma.vmem_to_smem %s57_s4, 16, %s3949_s19, [#allocation9]  }
   0xa   :  { %3940 = dma.done.wait [#allocation4], 16  }
   0xb   :  { %3941 = vsyncadd [#allocation4], 4294967280 }
   0xc   :  { %3942 = dma.done.wait [#allocation6], 32  }
   0xd   :  { %3943 = vsyncadd [#allocation6], 4294967264 }
   0xe   :  { %3944 = dma.done.wait [#allocation9], 16  }
   0xf   :  { %3945 = vsyncadd [#allocation9], 4294967280 }
  0x10   :  { %76 = sfence }
  0x11   :  { %v88_v0 = vld [vmem:[%s6223_s2 + $0x18] sm:$0xff]  ;;  %v86_v1 = vld [vmem:[%s6223_s2 + $0x8] sm:$0xff]  ;;  %v3950_v2 = vmov 0   ;;  %v89_v4 = vld [vmem:[%s6223_s2 + $0x20] sm:$0xff]  ;;  %s3951_s18 = smov 127   ;;  %s3952_s19 = smov 126  }
  0x12   :  { %3867 = vset.pattern.permute.xlu1 %v3950_v2  ;;  %3866 = vset.pattern.permute.xlu0 %v3950_v2  ;;  %v90_v3 = vld [vmem:[%s6223_s2 + $0x28] sm:$0xff]  ;;  %v87_v5 = vld [vmem:[%s6223_s2 + $0x10] sm:$0xff]  ;;  %v93_v7 = vld [vmem:[%s6223_s2 + $0x40] sm:$0xff]  ;;  %s3953_s3 = smov 110   ;;  %s3954_s20 = smov 109   ;;  %vm119_vm0 = vcmask 1039360  }
  0x13   :  { %156 = vperm.xlu1 %3867, %v88_v0   ;;  %104 = vperm.xlu0 %3866, %v86_v1   ;;  %v91_v6 = vld [vmem:[%s6223_s2 + $0x30] sm:$0xff]  ;;  %v92_v8 = vld [vmem:[%s6223_s2 + $0x38] sm:$0xff]  ;;  %v85_v9 = vld [vmem:[%s6223_s2] sm:$0xff]  ;;  %s3955_s6 = smov 108   ;;  %s3956_s21 = smov 92   ;;  %vm145_vm1 = vcmask 1031168  }
  0x14   :  { %3868 = vset.pattern.permute.xlu2 %v3950_v2  ;;  %v4048_v10 = vld [vmem:[%s6221_s0 + $0x10] sm:$0xff]  ;;  %v4053_v11 = vld [vmem:[%s6221_s0 + $0x8] sm:$0xff]  ;;  %v4058_v12 = vld [vmem:[%s6221_s0] sm:$0xff]  ;;  %s3957_s7 = smov 91   ;;  %s3958_s24 = smov 90   ;;  %vm171_vm2 = vcmask 900096  }
  0x15   :  { %208 = vperm.xlu2 %3868, %v90_v3   ;;  %v3727_v42 = vld [vmem:[%s6223_s2 + $0x58] sm:$0xff]  ;;  %v3726_v45 = vld [vmem:[%s6223_s2 + $0x50] sm:$0xff]  ;;  %v3729_v47 = vld [vmem:[%s6223_s2 + $0x68] sm:$0xff]  ;;  %vm197_vm3 = vcmask 891904   ;;  %vm223_vm4 = vcmask 883712   ;;  %vm249_vm5 = vcmask 752640  }
  0x16   :  { %v3728_v48 = vld [vmem:[%s6223_s2 + $0x60] sm:$0xff]  ;;  %v3731_v49 = vld [vmem:[%s6223_s2 + $0x78] sm:$0xff]  ;;  %v3730_v50 = vld [vmem:[%s6223_s2 + $0x70] sm:$0xff]  ;;  %vm275_vm6 = vcmask 744448   ;;  %vm301_vm7 = vcmask 736256   ;;  %vm350_vm8 = vcmask 1041408  }
  0x17   :  { %v3733_v52 = vld [vmem:[%s6223_s2 + $0x88] sm:$0xff]  ;;  %v3732_v53 = vld [vmem:[%s6223_s2 + $0x80] sm:$0xff]  ;;  %vm354_vm9 = vcmask 549888   ;;  %s412_s27 = sld [smem:[#allocation5]] }
  0x18   :  { %v3725_v55 = vld [vmem:[%s6223_s2 + $0x48] sm:$0xff]  ;;  %s3745_s14 = sld [smem:[#allocation3 + $0x2]] }
  0x19   :  { %s3746_s15 = sld [smem:[#allocation5 + $0x2]] }
  0x1a   :  { %s3756_s29 = sld [smem:[#allocation3 + $0x3]] }
  0x1b   :  { %182 = vperm.xlu1 %3867, %v89_v4   ;;  %130 = vperm.xlu0 %3866, %v87_v5   ;;  %s5857_s12 = sld [smem:[#allocation7]] }
  0x1c   :  { %s3790_s22 = sld [smem:[#allocation8 + $0x1]] }
  0x1d   :  { %234 = vperm.xlu2 %3868, %v91_v6   ;;  %s3815_s10 = sld [smem:[#allocation8 + $0x2]] }
  0x23   :  { %286 = vperm.xlu1 %3867, %v93_v7   ;;  %260 = vperm.xlu0 %3866, %v92_v8  }
  0x25   :  { %96 = vperm.xlu2 %3868, %v85_v9  }
  0x6f   :  { %v209_v29 = vpop.permute.xlu2 %208 }
  0x70   :  { %v213_v30 = vmul.f32 %v209_v29, %v4048_v10  ;;  %v212_v31 = vmul.f32 %v209_v29, %v4053_v11  ;;  %v211_v32 = vmul.f32 %v209_v29, %v4058_v12 }
  0x77   :  { %v235_v33 = vpop.permute.xlu2 %234 }
  0x78   :  { %v239_v34 = vmul.f32 %v235_v33, %v4048_v10  ;;  %v238_v35 = vmul.f32 %v235_v33, %v4053_v11  ;;  %v237_v36 = vmul.f32 %v235_v33, %v4058_v12 }
  0x7f   :  { %v4126_v51 = vpop.permute.xlu2 %96 }
  0x85   :  { %v105_v13 = vpop.permute.xlu0 %104  ;;  %v157_v21 = vpop.permute.xlu1 %156 }
  0x86   :  { %v109_v14 = vmul.f32 %v105_v13, %v4048_v10  ;;  %v108_v15 = vmul.f32 %v105_v13, %v4053_v11  ;;  %v107_v16 = vmul.f32 %v105_v13, %v4058_v12  ;;  %v161_v22 = vmul.f32 %v157_v21, %v4048_v10 }
  0x87   :  { %v160_v23 = vmul.f32 %v157_v21, %v4053_v11  ;;  %v159_v24 = vmul.f32 %v157_v21, %v4058_v12 }
  0x88   :  { %117 = vrot.lane.b32.xlu2 %v109_v14, %s3951_s18  ;;  %115 = vrot.lane.b32.xlu1 %v108_v15, %s3951_s18 }
  0x89   :  { %113 = vrot.lane.b32.xlu0 %v107_v16, %s3951_s18 }
  0x8d   :  { %v131_v17 = vpop.permute.xlu0 %130  ;;  %v183_v25 = vpop.permute.xlu1 %182 }
  0x8e   :  { %v135_v18 = vmul.f32 %v131_v17, %v4048_v10  ;;  %v134_v19 = vmul.f32 %v131_v17, %v4053_v11  ;;  %v133_v20 = vmul.f32 %v131_v17, %v4058_v12  ;;  %v187_v26 = vmul.f32 %v183_v25, %v4048_v10 }
  0x8f   :  { %v186_v27 = vmul.f32 %v183_v25, %v4053_v11  ;;  %v185_v28 = vmul.f32 %v183_v25, %v4058_v12 }
  0x90   :  { %143 = vrot.lane.b32.xlu2 %v135_v18, %s3952_s19  ;;  %141 = vrot.lane.b32.xlu1 %v134_v19, %s3952_s19 }
  0x91   :  { %139 = vrot.lane.b32.xlu0 %v133_v20, %s3952_s19 }
  0x95   :  { %v261_v37 = vpop.permute.xlu0 %260  ;;  %v287_v41 = vpop.permute.xlu1 %286 }
  0x96   :  { %v265_v38 = vmul.f32 %v261_v37, %v4048_v10  ;;  %v264_v39 = vmul.f32 %v261_v37, %v4053_v11  ;;  %v263_v40 = vmul.f32 %v261_v37, %v4058_v12  ;;  %v290_v43 = vmul.f32 %v287_v41, %v4053_v11 }
  0x97   :  { %v289_v44 = vmul.f32 %v287_v41, %v4058_v12  ;;  %v291_v46 = vmul.f32 %v287_v41, %v4048_v10 }
  0x98   :  { %169 = vrot.lane.b32.xlu2 %v161_v22, %s3953_s3  ;;  %167 = vrot.lane.b32.xlu1 %v160_v23, %s3953_s3 }
  0x99   :  { %165 = vrot.lane.b32.xlu0 %v159_v24, %s3953_s3 }
  0xa0   :  { %195 = vrot.lane.b32.xlu2 %v187_v26, %s3954_s20  ;;  %193 = vrot.lane.b32.xlu1 %v186_v27, %s3954_s20 }
  0xa1   :  { %191 = vrot.lane.b32.xlu0 %v185_v28, %s3954_s20 }
  0xa8   :  { %221 = vrot.lane.b32.xlu2 %v213_v30, %s3955_s6  ;;  %219 = vrot.lane.b32.xlu1 %v212_v31, %s3955_s6 }
  0xa9   :  { %217 = vrot.lane.b32.xlu0 %v211_v32, %s3955_s6 }
  0xb0   :  { %247 = vrot.lane.b32.xlu2 %v239_v34, %s3956_s21  ;;  %245 = vrot.lane.b32.xlu1 %v238_v35, %s3956_s21  ;;  %v100_v35 = vmul.f32 %v4126_v51, %v4053_v11 }
  0xb1   :  { %243 = vrot.lane.b32.xlu0 %v237_v36, %s3956_s21  ;;  %v99_v36 = vmul.f32 %v4126_v51, %v4058_v12 }
  0xb8   :  { %273 = vrot.lane.b32.xlu2 %v265_v38, %s3957_s7  ;;  %271 = vrot.lane.b32.xlu1 %v264_v39, %s3957_s7 }
  0xb9   :  { %269 = vrot.lane.b32.xlu0 %v263_v40, %s3957_s7 }
  0xc0   :  { %487 = vperm.xlu2 %3868, %v3727_v42   ;;  %297 = vrot.lane.b32.xlu1 %v290_v43, %s3958_s24 }
  0xc1   :  { %295 = vrot.lane.b32.xlu0 %v289_v44, %s3958_s24 }
  0xc8   :  { %299 = vrot.lane.b32.xlu2 %v291_v46, %s3958_s24  ;;  %462 = vperm.xlu1 %3867, %v3726_v45  }
  0xd0   :  { %537 = vperm.xlu2 %3868, %v3729_v47   ;;  %512 = vperm.xlu1 %3867, %v3728_v48  }
  0xd8   :  { %587 = vperm.xlu2 %3868, %v3731_v49   ;;  %562 = vperm.xlu1 %3867, %v3730_v50   ;;  %v101_v49 = vmul.f32 %v4126_v51, %v4048_v10 }
  0xe0   :  { %637 = vperm.xlu2 %3868, %v3733_v52   ;;  %612 = vperm.xlu1 %3867, %v3732_v53  }
  0xe2   :  { %v4134_v54 = vpop.permute.xlu2 %117 }
  0xe8   :  { %454 = vperm.xlu1 %3867, %v3725_v55  }
  0xea   :  { %v4139_v56 = vpop.permute.xlu2 %143 }
  0xf2   :  { %v4141_v57 = vpop.permute.xlu2 %169 }
  0xfa   :  { %v4143_v58 = vpop.permute.xlu2 %195  ;;  %v116_v59 = vpop.permute.xlu1 %115 }
  0xfb   :  { %v114_v4 = vpop.permute.xlu0 %113  ;;  %v121_v33 = vsel %vm119_vm0, %v116_v59, %v4134_v54 }
  0xfc   :  { %v120_v34 = vsel %vm119_vm0, %v114_v4, %v116_v59  ;;  %v126_v40 = vadd.f32 %v121_v33, %v100_v35 }
  0xfd   :  { %v125_v41 = vadd.f32 %v120_v34, %v99_v36 }
 0x102   :  { %v4145_v60 = vpop.permute.xlu2 %221  ;;  %v142_v61 = vpop.permute.xlu1 %141 }
 0x103   :  { %v140_v7 = vpop.permute.xlu0 %139  ;;  %v147_v38 = vsel %vm145_vm1, %v142_v61, %v4139_v56 }
 0x104   :  { %v146_v39 = vsel %vm145_vm1, %v140_v7, %v142_v61  ;;  %v152_v45 = vadd.f32 %v147_v38, %v126_v40  ;;  %v127_v61 = vadd.f32 %v4134_v54, %v101_v49 }
 0x105   :  { %v151_v46 = vadd.f32 %v146_v39, %v125_v41 }
 0x106   :  { %v153_v4 = vadd.f32 %v4139_v56, %v127_v61 }
 0x10a   :  { %v4147_v62 = vpop.permute.xlu2 %247  ;;  %v168_v63 = vpop.permute.xlu1 %167 }
 0x10b   :  { %v166_v9 = vpop.permute.xlu0 %165  ;;  %v173_v43 = vsel %vm171_vm2, %v168_v63, %v4141_v57 }
 0x10c   :  { %v172_v44 = vsel %vm171_vm2, %v166_v9, %v168_v63  ;;  %v178_v55 = vadd.f32 %v173_v43, %v152_v45 }
 0x10d   :  { %v177_v59 = vadd.f32 %v172_v44, %v151_v46 }
 0x112   :  { %v4149_v0 = vpop.permute.xlu2 %273  ;;  %v4151_v1 = vpop.permute.xlu1 %193 }
 0x113   :  { %v192_v14 = vpop.permute.xlu0 %191  ;;  %v199_v50 = vsel %vm197_vm3, %v4151_v1, %v4143_v58 }
 0x114   :  { %v198_v52 = vsel %vm197_vm3, %v192_v14, %v4151_v1  ;;  %v204_v1 = vadd.f32 %v199_v50, %v178_v55 }
 0x11a   :  { %v488_v2 = vpop.permute.xlu2 %487  ;;  %v4153_v3 = vpop.permute.xlu1 %219 }
 0x11b   :  { %v490_v5 = vmul.f32 %v488_v2, %v4058_v12  ;;  %v218_v20 = vpop.permute.xlu0 %217  ;;  %v491_v21 = vmul.f32 %v488_v2, %v4053_v11  ;;  %v492_v26 = vmul.f32 %v488_v2, %v4048_v10  ;;  %v225_v51 = vsel %vm223_vm4, %v4153_v3, %v4145_v60 }
 0x11c   :  { %v224_v63 = vsel %vm223_vm4, %v218_v20, %v4153_v3  ;;  %v203_v2 = vadd.f32 %v198_v52, %v177_v59  ;;  %v230_v7 = vadd.f32 %v225_v51, %v204_v1  ;;  %v179_v3 = vadd.f32 %v4141_v57, %v153_v4  ;;  %v3742_v1 = vld [vmem:[%s6223_s2 + $0xc0] sm:$0xff] }
 0x11d   :  { %496 = vrot.lane.b32.xlu0 %v490_v5, %s3952_s19 }
 0x11e   :  { %v229_v9 = vadd.f32 %v224_v63, %v203_v2 }
 0x122   :  { %v4157_v6 = vpop.permute.xlu1 %245  ;;  %v4167_v18 = vpop.permute.xlu2 %299 }
 0x123   :  { %v244_v28 = vpop.permute.xlu0 %243  ;;  %v251_v5 = vsel %vm249_vm5, %v4157_v6, %v4147_v62 }
 0x124   :  { %v250_v54 = vsel %vm249_vm5, %v244_v28, %v4157_v6  ;;  %v205_v6 = vadd.f32 %v4143_v58, %v179_v3  ;;  %v3739_v3 = vld [vmem:[%s6223_s2 + $0xa8] sm:$0xff] }
 0x12a   :  { %v4159_v8 = vpop.permute.xlu1 %271  ;;  %v538_v24 = vpop.permute.xlu2 %537 }
 0x12b   :  { %v542_v27 = vmul.f32 %v538_v24, %v4048_v10  ;;  %v540_v30 = vmul.f32 %v538_v24, %v4058_v12  ;;  %v270_v37 = vpop.permute.xlu0 %269  ;;  %v541_v48 = vmul.f32 %v538_v24, %v4053_v11 }
 0x12c   :  { %v276_v56 = vsel %vm275_vm6, %v270_v37, %v4159_v8 }
 0x132   :  { %v4161_v13 = vpop.permute.xlu1 %297  ;;  %v588_v42 = vpop.permute.xlu2 %587 }
 0x133   :  { %v592_v53 = vmul.f32 %v588_v42, %v4048_v10  ;;  %v296_v14 = vpop.permute.xlu0 %295 }
 0x134   :  { %v302_v57 = vsel %vm301_vm7, %v296_v14, %v4161_v13  ;;  %v3738_v14 = vld [vmem:[%s6223_s2 + $0xa0] sm:$0xff] }
 0x13a   :  { %v463_v15 = vpop.permute.xlu1 %462  ;;  %v638_v33 = vpop.permute.xlu2 %637 }
 0x13b   :  { %v466_v16 = vmul.f32 %v463_v15, %v4053_v11  ;;  %v465_v17 = vmul.f32 %v463_v15, %v4058_v12  ;;  %v467_v22 = vmul.f32 %v463_v15, %v4048_v10  ;;  %v277_v15 = vsel %vm275_vm6, %v4159_v8, %v4149_v0 }
 0x13c   :  { %v231_v8 = vadd.f32 %v4145_v60, %v205_v6  ;;  %v641_v49 = vmul.f32 %v638_v33, %v4053_v11 }
 0x13d   :  { %473 = vrot.lane.b32.xlu1 %v466_v16, %s3951_s18  ;;  %471 = vrot.lane.b32.xlu2 %v465_v17, %s3951_s18  ;;  %v256_v16 = vadd.f32 %v251_v5, %v230_v7  ;;  %v255_v17 = vadd.f32 %v250_v54, %v229_v9  ;;  %v642_v7 = vmul.f32 %v638_v33, %v4048_v10  ;;  %v3737_v9 = vld [vmem:[%s6223_s2 + $0x98] sm:$0xff] }
 0x142   :  { %v513_v19 = vpop.permute.xlu1 %512 }
 0x143   :  { %v517_v23 = vmul.f32 %v513_v19, %v4048_v10  ;;  %v515_v25 = vmul.f32 %v513_v19, %v4058_v12  ;;  %v516_v31 = vmul.f32 %v513_v19, %v4053_v11  ;;  %v590_v19 = vmul.f32 %v588_v42, %v4058_v12 }
 0x145   :  { %498 = vrot.lane.b32.xlu1 %v491_v21, %s3952_s19  ;;  %475 = vrot.lane.b32.xlu2 %v467_v22, %s3951_s18  ;;  %v303_v21 = vsel %vm301_vm7, %v4161_v13, %v4167_v18  ;;  %v282_v22 = vadd.f32 %v277_v15, %v256_v16  ;;  %v591_v13 = vmul.f32 %v588_v42, %v4053_v11  ;;  %v3740_v15 = vld [vmem:[%s6223_s2 + $0xb0] sm:$0xff] }
 0x146   :  { %525 = vrot.lane.b32.xlu0 %v517_v23, %s3953_s3  ;;  %v281_v23 = vadd.f32 %v276_v56, %v255_v17  ;;  %v3741_v56 = vld [vmem:[%s6223_s2 + $0xb8] sm:$0xff]  ;;  %v3744_v17 = vld [vmem:[%s6223_s2 + $0xd0] sm:$0xff] }
 0x147   :  { %v308_v24 = vadd.f32 %v303_v21, %v282_v22 }
 0x149   :  { %v314_v28 = vrot.slane %v308_v24, 2  ;;  %v323_v35 = vrot.slane %v308_v24, 4  ;;  %v332_v41 = vrot.slane %v308_v24, 6 }
 0x14a   :  { %v563_v29 = vpop.permute.xlu1 %562 }
 0x14b   :  { %v567_v32 = vmul.f32 %v563_v29, %v4048_v10  ;;  %v565_v47 = vmul.f32 %v563_v29, %v4058_v12  ;;  %v566_v20 = vmul.f32 %v563_v29, %v4053_v11 }
 0x14d   :  { %521 = vrot.lane.b32.xlu1 %v515_v25, %s3953_s3  ;;  %500 = vrot.lane.b32.xlu2 %v492_v26, %s3952_s19  ;;  %v307_v25 = vadd.f32 %v302_v57, %v281_v23  ;;  %v257_v26 = vadd.f32 %v4147_v62, %v231_v8 }
 0x14e   :  { %550 = vrot.lane.b32.xlu0 %v542_v27, %s3954_s20 }
 0x14f   :  { %v283_v27 = vadd.f32 %v4149_v0, %v257_v26  ;;  %v313_v29 = vrot.slane %v307_v25, 2  ;;  %v322_v62 = vrot.slane %v307_v25, 4  ;;  %v640_v0 = vmul.f32 %v638_v33, %v4058_v12 }
 0x150   :  { %v331_v40 = vrot.slane %v307_v25, 6 }
 0x151   :  { %v319_v60 = vadd.f32 %v313_v29, %v307_v25 }
 0x152   :  { %v613_v58 = vpop.permute.xlu1 %612 }
 0x153   :  { %v616_v36 = vmul.f32 %v613_v58, %v4053_v11  ;;  %v328_v37 = vadd.f32 %v322_v62, %v319_v60  ;;  %v617_v54 = vmul.f32 %v613_v58, %v4048_v10 }
 0x155   :  { %546 = vrot.lane.b32.xlu1 %v540_v30, %s3954_s20  ;;  %523 = vrot.lane.b32.xlu2 %v516_v31, %s3953_s3  ;;  %v615_v30 = vmul.f32 %v613_v58, %v4058_v12  ;;  %v309_v31 = vadd.f32 %v4167_v18, %v283_v27  ;;  %v77_v18 = vld [vmem:[%s6222_s1] sm:$0x7]  ;;  %v4258_v44 = vadd.f32 %v331_v40, %v328_v37  ;;  %s407_s1 = sld [smem:[#allocation3]] }
 0x156   :  { %575 = vrot.lane.b32.xlu0 %v567_v32, %s3955_s6  ;;  %v320_v32 = vadd.f32 %v314_v28, %v308_v24  ;;  %v4256_v42 = vperm.slane %v77_v18, 0  ;;  %v4262_v46 = vperm.slane %v77_v18, 1  ;;  %v4275_v59 = vperm.slane %v77_v18, 2 }
 0x157   :  { %v315_v34 = vrot.slane %v309_v31, 2  ;;  %v324_v43 = vrot.slane %v309_v31, 4  ;;  %v333_v50 = vrot.slane %v309_v31, 6 }
 0x158   :  { %v329_v38 = vadd.f32 %v323_v35, %v320_v32  ;;  %6245 = vst [vmem:[#allocation13_spill] sm:$0xff] %v4256_v42  ;;  %v347_v52 = vmul.f32 %v4256_v42, %v4258_v44 }
 0x159   :  { %v321_v39 = vadd.f32 %v315_v34, %v309_v31  ;;  %6246 = vst [vmem:[#allocation14_spill] sm:$0xff] %v4262_v46 }
 0x15a   :  { %v4260_v45 = vadd.f32 %v332_v41, %v329_v38  ;;  %6247 = vst [vmem:[#allocation15_spill] sm:$0xff] %v4275_v59  ;;  %v351_v61 = vsel %vm350_vm8, %v347_v52, 0.0  ;;  %v455_v21 = vpop.permute.xlu1 %454 }
 0x15b   :  { %v457_v52 = vmul.f32 %v455_v21, %v4058_v12 }
 0x15d   :  { %571 = vrot.lane.b32.xlu1 %v565_v47, %s3955_s6  ;;  %548 = vrot.lane.b32.xlu2 %v541_v48, %s3954_s20  ;;  %v330_v47 = vadd.f32 %v324_v43, %v321_v39  ;;  %v3743_v48 = vld [vmem:[%s6223_s2 + $0xc8] sm:$0xff]  ;;  %v458_v39 = vmul.f32 %v455_v21, %v4053_v11 }
 0x15e   :  { %600 = vrot.lane.b32.xlu0 %v592_v53, %s3956_s21  ;;  %v348_v53 = vmul.f32 %v4262_v46, %v4260_v45 }
 0x15f   :  { %v4273_v55 = vadd.f32 %v333_v50, %v330_v47 }
 0x160   :  { %v352_v51 = vsel %vm350_vm8, %v348_v53, 0.0 }
 0x161   :  { %v349_v63 = vmul.f32 %v4275_v59, %v4273_v55  ;;  %v353_v2 = vadd.f32 %v352_v51, %v351_v61 }
 0x163   :  { %v355_v4 = vsel %vm354_vm9, %v349_v63, 0.0 }
 0x164   :  { %v356_v5 = vadd.f32 %v355_v4, %v353_v2 }
 0x165   :  { %596 = vrot.lane.b32.xlu1 %v590_v19, %s3956_s21  ;;  %573 = vrot.lane.b32.xlu2 %v566_v20, %s3955_s6  ;;  %v3736_v20 = vld [vmem:[%s6223_s2 + $0x90] sm:$0xff] }
 0x16d   :  { %621 = vrot.lane.b32.xlu1 %v615_v30, %s3957_s7  ;;  %598 = vrot.lane.b32.xlu2 %v591_v13, %s3956_s21 }
 0x175   :  { %646 = vrot.lane.b32.xlu1 %v640_v0, %s3958_s24  ;;  %623 = vrot.lane.b32.xlu2 %v616_v36, %s3957_s7 }
 0x17d   :  { %956 = vperm.xlu1 %3867, %v3743_v48   ;;  %648 = vrot.lane.b32.xlu2 %v641_v49, %s3958_s24 }
 0x185   :  { %931 = vperm.xlu2 %3868, %v3742_v1  }
 0x188   :  { %357 = vadd.xlane.f32.xlu0 %v356_v5  ;;  %v459_v5 = vmul.f32 %v455_v21, %v4048_v10 }
 0x18f   :  { %v497_v16 = vpop.permute.xlu0 %496 }
 0x197   :  { %v472_v6 = vpop.permute.xlu2 %471 }
 0x19c   :  { %625 = vrot.lane.b32.xlu0 %v617_v54, %s3957_s7 }
 0x19f   :  { %v476_v23 = vpop.permute.xlu2 %475 }
 0x1a4   :  { %650 = vrot.lane.b32.xlu0 %v642_v7, %s3958_s24 }
 0x1a7   :  { %v501_v25 = vpop.permute.xlu2 %500 }
 0x1ac   :  { %806 = vperm.xlu0 %3866, %v3737_v9  }
 0x1af   :  { %v474_v22 = vpop.permute.xlu1 %473  ;;  %v524_v27 = vpop.permute.xlu2 %523 }
 0x1b0   :  { %v478_v18 = vsel %vm119_vm0, %v474_v22, %v476_v23  ;;  %v477_v50 = vsel %vm119_vm0, %v472_v6, %v474_v22 }
 0x1b1   :  { %v483_v49 = vadd.f32 %v478_v18, %v458_v39  ;;  %v482_v1 = vadd.f32 %v477_v50, %v457_v52 }
 0x1b4   :  { %831 = vperm.xlu0 %3866, %v3738_v14  }
 0x1b7   :  { %v499_v24 = vpop.permute.xlu1 %498  ;;  %v549_v33 = vpop.permute.xlu2 %548 }
 0x1b8   :  { %v4307_v19 = vpop.permute.xlu0 %525  ;;  %v503_v41 = vsel %vm145_vm1, %v499_v24, %v501_v25  ;;  %v502_v51 = vsel %vm145_vm1, %v497_v16, %v499_v24 }
 0x1b9   :  { %v508_v53 = vadd.f32 %v503_v41, %v483_v49  ;;  %v528_v2 = vsel %vm171_vm2, %v524_v27, %v4307_v19  ;;  %v507_v54 = vadd.f32 %v502_v51, %v482_v1 }
 0x1bb   :  { %v533_v7 = vadd.f32 %v528_v2, %v508_v53 }
 0x1bc   :  { %856 = vperm.xlu0 %3866, %v3739_v3  }
 0x1bf   :  { %v522_v58 = vpop.permute.xlu1 %521  ;;  %v574_v0 = vpop.permute.xlu2 %573 }
 0x1c0   :  { %v4312_v57 = vpop.permute.xlu0 %550  ;;  %v527_v4 = vsel %vm171_vm2, %v522_v58, %v524_v27 }
 0x1c1   :  { %v553_v9 = vsel %vm197_vm3, %v549_v33, %v4312_v57 }
 0x1c2   :  { %v558_v21 = vadd.f32 %v553_v9, %v533_v7 }
 0x1c4   :  { %881 = vperm.xlu0 %3866, %v3740_v15  }
 0x1c7   :  { %v547_v60 = vpop.permute.xlu1 %546  ;;  %v599_v38 = vpop.permute.xlu2 %598 }
 0x1c8   :  { %v4314_v8 = vpop.permute.xlu0 %575  ;;  %v552_v3 = vsel %vm197_vm3, %v547_v60, %v549_v33 }
 0x1c9   :  { %v578_v6 = vsel %vm223_vm4, %v574_v0, %v4314_v8 }
 0x1cc   :  { %906 = vperm.xlu0 %3866, %v3741_v56  }
 0x1cf   :  { %v572_v62 = vpop.permute.xlu1 %571  ;;  %v624_v63 = vpop.permute.xlu2 %623 }
 0x1d0   :  { %v4316_v26 = vpop.permute.xlu0 %600  ;;  %v577_v22 = vsel %vm223_vm4, %v572_v62, %v574_v0 }
 0x1d1   :  { %v603_v27 = vsel %vm249_vm5, %v599_v38, %v4316_v26 }
 0x1d4   :  { %981 = vperm.xlu0 %3866, %v3744_v17   ;;  %v484_v17 = vadd.f32 %v476_v23, %v459_v5 }
 0x1d6   :  { %v509_v24 = vadd.f32 %v501_v25, %v484_v17 }
 0x1d7   :  { %v597_v37 = vpop.permute.xlu1 %596 }
 0x1d8   :  { %v602_v23 = vsel %vm249_vm5, %v597_v37, %v599_v38 }
 0x1dc   :  { %798 = vperm.xlu0 %3866, %v3736_v20   ;;  %v532_v20 = vadd.f32 %v527_v4, %v507_v54 }
 0x1de   :  { %v557_v58 = vadd.f32 %v552_v3, %v532_v20 }
 0x1df   :  { %v622_v61 = vpop.permute.xlu1 %621 }
 0x1e0   :  { %v627_v25 = vsel %vm275_vm6, %v622_v61, %v624_v63 }
 0x1fb   :  { %v358_v28 = vpop.xlane.xlu0 %357 }
 0x1fc   :  { %v359_v29 = vrot.slane %v358_v28, 4 }
 0x1fe   :  { %v360_v30 = vadd.f32 %v359_v29, %v358_v28  ;;  %v583_v28 = vadd.f32 %v578_v6, %v558_v21  ;;  %v534_v29 = vadd.f32 %v4307_v19, %v509_v24 }
 0x200   :  { %v361_v13 = vrot.slane %v360_v30, 2  ;;  %v608_v60 = vadd.f32 %v603_v27, %v583_v28  ;;  %v559_v33 = vadd.f32 %v4312_v57, %v534_v29 }
 0x202   :  { %v362_v31 = vadd.f32 %v361_v13, %v360_v30  ;;  %v582_v30 = vadd.f32 %v577_v22, %v557_v58  ;;  %v647_v13 = vpop.permute.xlu1 %646 }
 0x204   :  { %v363_v32 = vrot.slane %v362_v31, 1 }
 0x206   :  { %v364_v34 = vadd.f32 %v363_v32, %v362_v31  ;;  %v649_v32 = vpop.permute.xlu2 %648 }
 0x207   :  { %v652_v37 = vsel %vm301_vm7, %v647_v13, %v649_v32 }
 0x208   :  { %3823 = vpush %v364_v34  ;;  %v607_v34 = vadd.f32 %v602_v23, %v582_v30 }
 0x20a   :  { %v632_v39 = vadd.f32 %v627_v25, %v607_v34  ;;  %v957_v23 = vpop.permute.xlu1 %956 }
 0x20b   :  { %v959_v13 = vmul.f32 %v957_v23, %v4058_v12 }
 0x20c   :  { %v657_v57 = vadd.f32 %v652_v37, %v632_v39 }
 0x20e   :  { %v4318_v35 = vpop.permute.xlu0 %625  ;;  %v663_v49 = vrot.slane %v657_v57, 2 }
 0x20f   :  { %v628_v31 = vsel %vm275_vm6, %v624_v63, %v4318_v35  ;;  %v672_v63 = vrot.slane %v657_v57, 4 }
 0x210   :  { %v633_v19 = vadd.f32 %v628_v31, %v608_v60  ;;  %v669_v51 = vadd.f32 %v663_v49, %v657_v57 }
 0x212   :  { %v678_v4 = vadd.f32 %v672_v63, %v669_v51  ;;  %v3748_v51 = vld [vmem:[%s6223_s2 + $0xe0] sm:$0xff] }
 0x216   :  { %v4320_v36 = vpop.permute.xlu0 %650 }
 0x217   :  { %v653_v62 = vsel %vm301_vm7, %v649_v32, %v4320_v36 }
 0x218   :  { %v658_v41 = vadd.f32 %v653_v62, %v633_v19 }
 0x21a   :  { %v682_v7 = vrot.slane %v658_v41, 6 }
 0x21e   :  { %v807_v40 = vpop.permute.xlu0 %806 }
 0x21f   :  { %v811_v43 = vmul.f32 %v807_v40, %v4048_v10  ;;  %v810_v47 = vmul.f32 %v807_v40, %v4053_v11  ;;  %v809_v48 = vmul.f32 %v807_v40, %v4058_v12  ;;  %v584_v40 = vadd.f32 %v4314_v8, %v559_v33 }
 0x221   :  { %819 = vrot.lane.b32.xlu1 %v811_v43, %s3951_s18  ;;  %817 = vrot.lane.b32.xlu2 %v810_v47, %s3951_s18  ;;  %v609_v43 = vadd.f32 %v4316_v26, %v584_v40 }
 0x222   :  { %815 = vrot.lane.b32.xlu0 %v809_v48, %s3951_s18  ;;  %v664_v48 = vrot.slane %v658_v41, 2 }
 0x223   :  { %v634_v47 = vadd.f32 %v4318_v35, %v609_v43  ;;  %v673_v35 = vrot.slane %v658_v41, 4 }
 0x224   :  { %v670_v61 = vadd.f32 %v664_v48, %v658_v41 }
 0x225   :  { %v659_v52 = vadd.f32 %v4320_v36, %v634_v47 }
 0x226   :  { %v832_v14 = vpop.permute.xlu0 %831  ;;  %v679_v1 = vadd.f32 %v673_v35, %v670_v61 }
 0x227   :  { %v836_v15 = vmul.f32 %v832_v14, %v4048_v10  ;;  %v835_v56 = vmul.f32 %v832_v14, %v4053_v11  ;;  %v834_v16 = vmul.f32 %v832_v14, %v4058_v12  ;;  %v665_v26 = vrot.slane %v659_v52, 2 }
 0x228   :  { %v674_v9 = vrot.slane %v659_v52, 4  ;;  %v681_v14 = vrot.slane %v657_v57, 6  ;;  %v4384_v3 = vadd.f32 %v682_v7, %v679_v1  ;;  %v683_v17 = vrot.slane %v659_v52, 6  ;;  %v3751_v1 = vld [vmem:[%s6223_s2 + $0xf8] sm:$0xff] }
 0x229   :  { %844 = vrot.lane.b32.xlu1 %v836_v15, %s3952_s19  ;;  %842 = vrot.lane.b32.xlu2 %v835_v56, %s3952_s19  ;;  %v671_v54 = vadd.f32 %v665_v26, %v659_v52  ;;  %v3749_v26 = vld [vmem:[%s6223_s2 + $0xe8] sm:$0xff] }
 0x22a   :  { %840 = vrot.lane.b32.xlu0 %v834_v16, %s3952_s19  ;;  %v4387_v56 = vadd.f32 %v681_v14, %v678_v4  ;;  %v932_v16 = vpop.permute.xlu2 %931  ;;  %v691_v20 = vmul.f32 %v4384_v3, %v4262_v46 }
 0x22b   :  { %v680_v15 = vadd.f32 %v674_v9, %v671_v54  ;;  %v934_v22 = vmul.f32 %v932_v16, %v4058_v12  ;;  %v935_v52 = vmul.f32 %v932_v16, %v4053_v11  ;;  %v3755_v9 = vld [vmem:[%s6223_s2 + $0x118] sm:$0xff] }
 0x22c   :  { %v690_v21 = vmul.f32 %v4387_v56, %v4256_v42  ;;  %v694_v24 = vsel %vm350_vm8, %v691_v20, 0.0 }
 0x22d   :  { %v4391_v6 = vadd.f32 %v683_v17, %v680_v15  ;;  %v3747_v17 = vld [vmem:[%s6223_s2 + $0xd8] sm:$0xff] }
 0x22e   :  { %v4360_v0 = vpop.permute.xlu0 %856  ;;  %v693_v27 = vsel %vm350_vm8, %v690_v21, 0.0 }
 0x22f   :  { %v861_v38 = vmul.f32 %v4360_v0, %v4048_v10  ;;  %v859_v18 = vmul.f32 %v4360_v0, %v4058_v12  ;;  %v692_v58 = vmul.f32 %v4391_v6, %v4275_v59  ;;  %v695_v28 = vadd.f32 %v694_v24, %v693_v27 }
 0x230   :  { %v860_v57 = vmul.f32 %v4360_v0, %v4053_v11  ;;  %v936_v0 = vmul.f32 %v932_v16, %v4048_v10 }
 0x231   :  { %869 = vrot.lane.b32.xlu1 %v861_v38, %s3953_s3  ;;  %v696_v30 = vsel %vm354_vm9, %v692_v58, 0.0 }
 0x232   :  { %865 = vrot.lane.b32.xlu0 %v859_v18, %s3953_s3  ;;  %v697_v31 = vadd.f32 %v696_v30, %v695_v28 }
 0x236   :  { %v4372_v50 = vpop.permute.xlu0 %881 }
 0x237   :  { %v886_v53 = vmul.f32 %v4372_v50, %v4048_v10  ;;  %v884_v8 = vmul.f32 %v4372_v50, %v4058_v12  ;;  %v885_v48 = vmul.f32 %v4372_v50, %v4053_v11  ;;  %v961_v50 = vmul.f32 %v957_v23, %v4048_v10 }
 0x239   :  { %894 = vrot.lane.b32.xlu1 %v886_v53, %s3954_s20  ;;  %s3824_s23 = spop %3823  ;;  %v960_v53 = vmul.f32 %v957_v23, %v4053_v11 }
 0x23a   :  { %890 = vrot.lane.b32.xlu0 %v884_v8, %s3954_s20  ;;  %v366_v29 = vstv %s3824_s23 }
 0x23b   :  { %v367_v60 = vmul.f32 0.001953125, %v366_v29 }
 0x23d   :  { %v4405_v25 = vsub.f32 %v4258_v44, %v367_v60  ;;  %v4408_v33 = vsub.f32 %v4260_v45, %v367_v60  ;;  %v4417_v19 = vsub.f32 %v4273_v55, %v367_v60  ;;  %v3753_v45 = vld [vmem:[%s6223_s2 + $0x108] sm:$0xff] }
 0x23e   :  { %v907_v2 = vpop.permute.xlu0 %906 }
 0x23f   :  { %v911_v36 = vmul.f32 %v907_v2, %v4048_v10  ;;  %v909_v5 = vmul.f32 %v907_v2, %v4058_v12  ;;  %v371_v62 = vmul.f32 %v4405_v25, %v4405_v25  ;;  %v372_v37 = vmul.f32 %v4408_v33, %v4408_v33 }
 0x240   :  { %v373_v18 = vmul.f32 %v4417_v19, %v4417_v19  ;;  %v910_v49 = vmul.f32 %v907_v2, %v4053_v11 }
 0x241   :  { %919 = vrot.lane.b32.xlu1 %v911_v36, %s3955_s6  ;;  %v374_v38 = vmul.f32 %v371_v62, %v4256_v42  ;;  %v375_v44 = vmul.f32 %v372_v37, %v4262_v46 }
 0x242   :  { %915 = vrot.lane.b32.xlu0 %v909_v5, %s3955_s6  ;;  %v376_v41 = vmul.f32 %v373_v18, %v4275_v59  ;;  %v3752_v5 = vld [vmem:[%s6223_s2 + $0x100] sm:$0xff] }
 0x243   :  { %v377_v39 = vsel %vm350_vm8, %v374_v38, 0.0  ;;  %v378_v40 = vsel %vm350_vm8, %v375_v44, 0.0 }
 0x244   :  { %v379_v55 = vadd.f32 %v378_v40, %v377_v39  ;;  %v380_v43 = vsel %vm354_vm9, %v376_v41, 0.0 }
 0x246   :  { %v982_v32 = vpop.permute.xlu0 %981  ;;  %v381_v47 = vadd.f32 %v380_v43, %v379_v55 }
 0x247   :  { %v984_v34 = vmul.f32 %v982_v32, %v4058_v12  ;;  %v985_v8 = vmul.f32 %v982_v32, %v4053_v11  ;;  %v986_v61 = vmul.f32 %v982_v32, %v4048_v10  ;;  %v3750_v11 = vld [vmem:[%s6223_s2 + $0xf0] sm:$0xff] }
 0x24a   :  { %940 = vrot.lane.b32.xlu0 %v934_v22, %s3956_s21 }
 0x24e   :  { %v4459_v35 = vpop.permute.xlu0 %798 }
 0x24f   :  { %v801_v41 = vmul.f32 %v4459_v35, %v4058_v12 }
 0x252   :  { %965 = vrot.lane.b32.xlu0 %v959_v13, %s3957_s7  ;;  %698 = vadd.xlane.f32.xlu2 %v697_v31 }
 0x25a   :  { %990 = vrot.lane.b32.xlu0 %v984_v34, %s3958_s24 }
 0x262   :  { %1275 = vperm.xlu0 %3866, %v3753_v45  }
 0x26a   :  { %867 = vrot.lane.b32.xlu2 %v860_v57, %s3953_s3 }
 0x26b   :  { %382 = vadd.xlane.f32.xlu1 %v381_v47 }
 0x272   :  { %892 = vrot.lane.b32.xlu2 %v885_v48, %s3954_s20 }
 0x27a   :  { %917 = vrot.lane.b32.xlu2 %v910_v49, %s3955_s6 }
 0x27b   :  { %v818_v4 = vpop.permute.xlu2 %817 }
 0x282   :  { %942 = vrot.lane.b32.xlu2 %v935_v52, %s3956_s21 }
 0x283   :  { %v843_v7 = vpop.permute.xlu2 %842 }
 0x284   :  { %944 = vrot.lane.b32.xlu1 %v936_v0, %s3956_s21 }
 0x28a   :  { %967 = vrot.lane.b32.xlu2 %v960_v53, %s3957_s7 }
 0x28c   :  { %969 = vrot.lane.b32.xlu1 %v961_v50, %s3957_s7 }
 0x292   :  { %992 = vrot.lane.b32.xlu2 %v985_v8, %s3958_s24 }
 0x293   :  { %v4461_v63 = vpop.permute.xlu1 %819 }
 0x294   :  { %994 = vrot.lane.b32.xlu1 %v986_v61, %s3958_s24  ;;  %v816_v2 = vpop.permute.xlu0 %815 }
 0x295   :  { %v821_v40 = vsel %vm119_vm0, %v816_v2, %v818_v4  ;;  %v4493_v2 = vld [vmem:[%s6221_s0 + $0x8] sm:$0xff] }
 0x296   :  { %v826_v43 = vadd.f32 %v821_v40, %v801_v41 }
 0x29b   :  { %v4466_v36 = vpop.permute.xlu1 %844 }
 0x29c   :  { %1150 = vperm.xlu1 %3867, %v3748_v51   ;;  %v841_v54 = vpop.permute.xlu0 %840 }
 0x29d   :  { %v846_v55 = vsel %vm145_vm1, %v841_v54, %v843_v7 }
 0x29e   :  { %v851_v49 = vadd.f32 %v846_v55, %v826_v43 }
 0x2a3   :  { %v870_v14 = vpop.permute.xlu1 %869 }
 0x2a4   :  { %1175 = vperm.xlu1 %3867, %v3749_v26   ;;  %v866_v16 = vpop.permute.xlu0 %865  ;;  %v803_v26 = vmul.f32 %v4459_v35, %v4048_v10  ;;  %v847_v10 = vsel %vm145_vm1, %v843_v7, %v4466_v36 }
 0x2ab   :  { %v895_v20 = vpop.permute.xlu1 %894 }
 0x2ac   :  { %1200 = vperm.xlu1 %3867, %v3750_v11   ;;  %v891_v22 = vpop.permute.xlu0 %890  ;;  %v822_v11 = vsel %vm119_vm0, %v818_v4, %v4461_v63 }
 0x2b3   :  { %v920_v58 = vpop.permute.xlu1 %919 }
 0x2b4   :  { %1225 = vperm.xlu1 %3867, %v3751_v1   ;;  %v916_v28 = vpop.permute.xlu0 %915 }
 0x2bc   :  { %1250 = vperm.xlu1 %3867, %v3752_v5   ;;  %v941_v62 = vpop.permute.xlu0 %940  ;;  %v802_v5 = vmul.f32 %v4493_v2, %v4459_v35 }
 0x2be   :  { %v827_v4 = vadd.f32 %v822_v11, %v802_v5 }
 0x2c4   :  { %1325 = vperm.xlu1 %3867, %v3755_v9   ;;  %v966_v47 = vpop.permute.xlu0 %965 }
 0x2c5   :  { %v699_v15 = vpop.xlane.xlu2 %698 }
 0x2c6   :  { %v700_v27 = vrot.slane %v699_v15, 4 }
 0x2c8   :  { %v701_v23 = vadd.f32 %v700_v27, %v699_v15  ;;  %v828_v15 = vadd.f32 %v4461_v63, %v803_v26 }
 0x2ca   :  { %v702_v13 = vrot.slane %v701_v23, 2 }
 0x2cc   :  { %1142 = vperm.xlu1 %3867, %v3747_v17   ;;  %v703_v32 = vadd.f32 %v702_v13, %v701_v23  ;;  %v991_v54 = vpop.permute.xlu0 %990 }
 0x2cd   :  { %v868_v21 = vpop.permute.xlu2 %867 }
 0x2ce   :  { %v704_v44 = vrot.slane %v703_v32, 1  ;;  %v871_v48 = vsel %vm171_vm2, %v866_v16, %v868_v21  ;;  %v872_v27 = vsel %vm171_vm2, %v868_v21, %v870_v14 }
 0x2cf   :  { %v876_v0 = vadd.f32 %v871_v48, %v851_v49 }
 0x2d0   :  { %v705_v39 = vadd.f32 %v704_v44, %v703_v32 }
 0x2d5   :  { %v893_v24 = vpop.permute.xlu2 %892 }
 0x2d6   :  { %v896_v52 = vsel %vm197_vm3, %v891_v22, %v893_v24  ;;  %v853_v22 = vadd.f32 %v4466_v36, %v828_v15  ;;  %v897_v35 = vsel %vm197_vm3, %v893_v24, %v895_v20 }
 0x2d7   :  { %v901_v50 = vadd.f32 %v896_v52, %v876_v0 }
 0x2dd   :  { %v918_v29 = vpop.permute.xlu2 %917 }
 0x2de   :  { %v383_v30 = vpop.xlane.xlu1 %382  ;;  %v921_v53 = vsel %vm223_vm4, %v916_v28, %v918_v29  ;;  %v852_v28 = vadd.f32 %v847_v10, %v827_v4  ;;  %v922_v63 = vsel %vm223_vm4, %v918_v29, %v920_v58 }
 0x2df   :  { %v384_v31 = vrot.slane %v383_v30, 4  ;;  %v926_v61 = vadd.f32 %v921_v53, %v901_v50 }
 0x2e0   :  { %v877_v13 = vadd.f32 %v872_v27, %v852_v28 }
 0x2e1   :  { %v385_v60 = vadd.f32 %v384_v31, %v383_v30  ;;  %v878_v30 = vadd.f32 %v870_v14, %v853_v22 }
 0x2e2   :  { %v902_v32 = vadd.f32 %v897_v35, %v877_v13 }
 0x2e3   :  { %v386_v34 = vrot.slane %v385_v60, 2 }
 0x2e5   :  { %v943_v37 = vpop.permute.xlu2 %942  ;;  %v387_v38 = vadd.f32 %v386_v34, %v385_v60  ;;  %v903_v60 = vadd.f32 %v895_v20, %v878_v30 }
 0x2e6   :  { %v946_v8 = vsel %vm249_vm5, %v941_v62, %v943_v37 }
 0x2e7   :  { %v388_v45 = vrot.slane %v387_v38, 1  ;;  %v951_v9 = vadd.f32 %v946_v8, %v926_v61  ;;  %v928_v34 = vadd.f32 %v920_v58, %v903_v60  ;;  %v4515_v61 = vld [vmem:[%s6221_s0] sm:$0xff] }
 0x2e9   :  { %v389_v18 = vadd.f32 %v388_v45, %v387_v38  ;;  %v927_v38 = vadd.f32 %v922_v63, %v902_v32 }
 0x2eb   :  { %3825 = vpush %v389_v18 }
 0x2ec   :  { %3827 = vpush %v705_v39 }
 0x2ed   :  { %v968_v57 = vpop.permute.xlu2 %967 }
 0x2ee   :  { %v971_v1 = vsel %vm275_vm6, %v966_v47, %v968_v57 }
 0x2ef   :  { %v976_v17 = vadd.f32 %v971_v1, %v951_v9 }
 0x2f5   :  { %v993_v51 = vpop.permute.xlu2 %992 }
 0x2f6   :  { %v945_v12 = vpop.permute.xlu1 %944  ;;  %v996_v16 = vsel %vm301_vm7, %v991_v54, %v993_v51 }
 0x2f7   :  { %v1001_v23 = vadd.f32 %v996_v16, %v976_v17  ;;  %v947_v62 = vsel %vm249_vm5, %v943_v37, %v945_v12  ;;  %v953_v44 = vadd.f32 %v945_v12, %v928_v34 }
 0x2f8   :  { %v952_v21 = vadd.f32 %v947_v62, %v927_v38 }
 0x2f9   :  { %v1007_v7 = vrot.slane %v1001_v23, 2  ;;  %v1016_v24 = vrot.slane %v1001_v23, 4  ;;  %v1025_v58 = vrot.slane %v1001_v23, 6 }
 0x2fb   :  { %v1013_v45 = vadd.f32 %v1007_v7, %v1001_v23 }
 0x2fd   :  { %v1022_v29 = vadd.f32 %v1016_v24, %v1013_v45  ;;  %v3754_v45 = vld [vmem:[%s6223_s2 + $0x110] sm:$0xff]  ;;  %v1276_v24 = vpop.permute.xlu0 %1275 }
 0x2fe   :  { %v970_v31 = vpop.permute.xlu1 %969 }
 0x2ff   :  { %v972_v36 = vsel %vm275_vm6, %v968_v57, %v970_v31  ;;  %v978_v18 = vadd.f32 %v970_v31, %v953_v44  ;;  %v4508_v52 = vadd.f32 %v1025_v58, %v1022_v29  ;;  %v1278_v58 = vmul.f32 %v4515_v61, %v1276_v24 }
 0x300   :  { %v977_v14 = vadd.f32 %v972_v36, %v952_v21 }
 0x301   :  { %v1034_v1 = vmul.f32 %v4508_v52, %v4256_v42 }
 0x303   :  { %v1037_v9 = vsel %vm350_vm8, %v1034_v1, 0.0 }
 0x306   :  { %v995_v39 = vpop.permute.xlu1 %994 }
 0x307   :  { %v997_v40 = vsel %vm301_vm7, %v993_v51, %v995_v39  ;;  %v1003_v20 = vadd.f32 %v995_v39, %v978_v18  ;;  %v408_v39 = vstv %s407_s1 }
 0x308   :  { %v1002_v41 = vadd.f32 %v997_v40, %v977_v14 }
 0x309   :  { %v1009_v55 = vrot.slane %v1003_v20, 2  ;;  %v1018_v37 = vrot.slane %v1003_v20, 4  ;;  %v1027_v0 = vrot.slane %v1003_v20, 6 }
 0x30a   :  { %v1008_v43 = vrot.slane %v1002_v41, 2  ;;  %v1017_v49 = vrot.slane %v1002_v41, 4  ;;  %v1026_v8 = vrot.slane %v1002_v41, 6 }
 0x30b   :  { %v1015_v47 = vadd.f32 %v1009_v55, %v1003_v20 }
 0x30c   :  { %v1014_v48 = vadd.f32 %v1008_v43, %v1002_v41  ;;  %v413_v41 = vstv %s412_s27 }
 0x30d   :  { %v1024_v57 = vadd.f32 %v1018_v37, %v1015_v47  ;;  %v4559_v47 = vld [vmem:[%s6221_s0 + $0x10] sm:$0xff]  ;;  %s3959_s0 = smov 19  }
 0x30e   :  { %v4510_v53 = vpop.permute.xlu1 %1150  ;;  %v1023_v50 = vadd.f32 %v1017_v49, %v1014_v48 }
 0x30f   :  { %v1153_v51 = vmul.f32 %v4515_v61, %v4510_v53  ;;  %v1154_v12 = vmul.f32 %v4493_v2, %v4510_v53  ;;  %v4521_v26 = vadd.f32 %v1027_v0, %v1024_v57  ;;  %v1155_v37 = vmul.f32 %v4559_v47, %v4510_v53 }
 0x310   :  { %v4523_v11 = vadd.f32 %v1026_v8, %v1023_v50 }
 0x311   :  { %1159 = vrot.lane.b32.xlu1 %v1153_v51, %s3951_s18  ;;  %1161 = vrot.lane.b32.xlu0 %v1154_v12, %s3951_s18  ;;  %v1036_v54 = vmul.f32 %v4521_v26, %v4275_v59 }
 0x312   :  { %v1035_v5 = vmul.f32 %v4523_v11, %v4262_v46 }
 0x313   :  { %v1040_v4 = vsel %vm354_vm9, %v1036_v54, 0.0 }
 0x314   :  { %v1038_v15 = vsel %vm350_vm8, %v1035_v5, 0.0 }
 0x315   :  { %v1039_v10 = vadd.f32 %v1038_v15, %v1037_v9 }
 0x316   :  { %v1176_v16 = vpop.permute.xlu1 %1175 }
 0x317   :  { %v1178_v17 = vmul.f32 %v4515_v61, %v1176_v16  ;;  %v1179_v22 = vmul.f32 %v4493_v2, %v1176_v16  ;;  %v1041_v27 = vadd.f32 %v1040_v4, %v1039_v10  ;;  %v1180_v0 = vmul.f32 %v4559_v47, %v1176_v16 }
 0x318   :  { %v1280_v4 = vmul.f32 %v4559_v47, %v1276_v24 }
 0x319   :  { %1184 = vrot.lane.b32.xlu1 %v1178_v17, %s3952_s19  ;;  %1186 = vrot.lane.b32.xlu0 %v1179_v22, %s3952_s19  ;;  %v1279_v22 = vmul.f32 %v4493_v2, %v1276_v24 }
 0x31a   :  { %1042 = vadd.xlane.f32.xlu2 %v1041_v27 }
 0x31c   :  { %s3826_s26 = spop %3825 }
 0x31d   :  { %v391_v28 = vstv %s3826_s26  ;;  %s3828_s30 = spop %3827 }
 0x31e   :  { %v392_v23 = vmul.f32 0.001953125, %v391_v28  ;;  %v1201_v30 = vpop.permute.xlu1 %1200  ;;  %v707_v43 = vstv %s3828_s30  ;;  %s3757_s30 = sld [smem:[#allocation5 + $0x3]] }
 0x31f   :  { %v1203_v35 = vmul.f32 %v4515_v61, %v1201_v30  ;;  %v1204_v13 = vmul.f32 %v4493_v2, %v1201_v30 }
 0x320   :  { %v393_v31 = vadd.f32 1e-05, %v392_v23 }
 0x321   :  { %1209 = vrot.lane.b32.xlu1 %v1203_v35, %s3953_s3  ;;  %1211 = vrot.lane.b32.xlu0 %v1204_v13, %s3953_s3 }
 0x322   :  { %3869 = vrsqrt.f32 %v393_v31  ;;  %vm400_vm11 = vweird.f32 %v393_v31 }
 0x326   :  { %v1226_v60 = vpop.permute.xlu1 %1225 }
 0x327   :  { %v1228_v63 = vmul.f32 %v4515_v61, %v1226_v60  ;;  %v1229_v32 = vmul.f32 %v4493_v2, %v1226_v60 }
 0x328   :  { %v3870_v7 = vpop.eup %3869 }
 0x329   :  { %v395_v34 = vmul.f32 %v3870_v7, %v393_v31  ;;  %1234 = vrot.lane.b32.xlu1 %v1228_v63, %s3954_s20  ;;  %1236 = vrot.lane.b32.xlu0 %v1229_v32, %s3954_s20  ;;  %vm401_vm10 = vweird.f32 %v3870_v7 }
 0x32a   :  { %vm402_vm12 = vmor %vm400_vm11, %vm401_vm10 }
 0x32b   :  { %v396_v62 = vmul.f32 %v3870_v7, %v395_v34 }
 0x32d   :  { %v397_v38 = vmul.f32 0.5, %v396_v62 }
 0x32e   :  { %v1251_v44 = vpop.permute.xlu1 %1250 }
 0x32f   :  { %v398_v36 = vsub.f32 1.5, %v397_v38  ;;  %v1253_v21 = vmul.f32 %v4515_v61, %v1251_v44  ;;  %v1255_v16 = vmul.f32 %v4559_v47, %v1251_v44  ;;  %v1254_v17 = vmul.f32 %v4493_v2, %v1251_v44 }
 0x331   :  { %v399_v18 = vmul.f32 %v3870_v7, %v398_v36  ;;  %1259 = vrot.lane.b32.xlu1 %v1253_v21, %s3955_s6  ;;  %v1477_v36 = vld [vmem:[%s6226_s5] sm:$0xff] }
 0x332   :  { %1300 = vperm.xlu2 %3868, %v3754_v45   ;;  %v3759_v45 = vld [vmem:[%s6226_s5 + $0x58] sm:$0xff] }
 0x333   :  { %v403_v14 = vsel %vm402_vm12, %v3870_v7, %v399_v18  ;;  %v1480_v18 = vld [vmem:[%s6226_s5 + $0x20] sm:$0xff]  ;;  %vm781_vm12 = vcmask 1043610  }
 0x334   :  { %v404_v40 = vmul.f32 %v403_v14, %v4405_v25  ;;  %v405_v20 = vmul.f32 %v403_v14, %v4408_v33  ;;  %v708_v33 = vmul.f32 0.001953125, %v707_v43  ;;  %v406_v13 = vmul.f32 %v403_v14, %v4417_v19 }
 0x336   :  { %v409_v29 = vmul.f32 %v408_v39, %v404_v40  ;;  %v410_v55 = vmul.f32 %v408_v39, %v405_v20  ;;  %v4570_v49 = vsub.f32 %v4387_v56, %v708_v33  ;;  %v4573_v57 = vsub.f32 %v4384_v3, %v708_v33  ;;  %v3763_v20 = vld [vmem:[%s6226_s5 + $0xb0] sm:$0xff] }
 0x337   :  { %v4582_v8 = vsub.f32 %v4391_v6, %v708_v33  ;;  %v1205_v3 = vmul.f32 %v4559_v47, %v1201_v30  ;;  %v1230_v6 = vmul.f32 %v4559_v47, %v1226_v60  ;;  %v411_v31 = vmul.f32 %v408_v39, %v406_v13  ;;  %v1326_v60 = vpop.permute.xlu1 %1325 }
 0x338   :  { %v4563_v48 = vadd.f32 %v413_v41, %v409_v29  ;;  %v4565_v25 = vadd.f32 %v413_v41, %v410_v55  ;;  %v712_v53 = vmul.f32 %v4570_v49, %v4570_v49  ;;  %v713_v50 = vmul.f32 %v4573_v57, %v4573_v57 }
 0x339   :  { %1284 = vrot.lane.b32.xlu1 %v1278_v58, %s3956_s21  ;;  %v714_v12 = vmul.f32 %v4582_v8, %v4582_v8  ;;  %v1330_v63 = vmul.f32 %v4559_v47, %v1326_v60  ;;  %v1329_v32 = vmul.f32 %v4493_v2, %v1326_v60  ;;  %v416_v7 = vadd.f32 %v413_v41, %v411_v31 }
 0x33a   :  { %1163 = vrot.lane.b32.xlu2 %v1155_v37, %s3951_s18  ;;  %v715_v51 = vmul.f32 %v712_v53, %v4256_v42  ;;  %v716_v56 = vmul.f32 %v713_v50, %v4262_v46  ;;  %v1328_v34 = vmul.f32 %v4515_v61, %v1326_v60 }
 0x33b   :  { %v717_v54 = vmul.f32 %v714_v12, %v4275_v59  ;;  %v419_v19 = vmax.f32 %v416_v7, 0.0 }
 0x33c   :  { %v718_v1 = vsel %vm350_vm8, %v715_v51, 0.0  ;;  %v719_v5 = vsel %vm350_vm8, %v716_v56, 0.0 }
 0x33d   :  { %v720_v9 = vadd.f32 %v719_v5, %v718_v1  ;;  %v721_v15 = vsel %vm354_vm9, %v717_v54, 0.0  ;;  %v422_v38 = vmul.f32 %v419_v19, %v4275_v59  ;;  %v3769_v5 = vld [vmem:[%s6226_s5 + $0x118] sm:$0xff] }
 0x33f   :  { %v722_v10 = vadd.f32 %v721_v15, %v720_v9  ;;  %v1143_v43 = vpop.permute.xlu1 %1142 }
 0x342   :  { %1188 = vrot.lane.b32.xlu2 %v1180_v0, %s3952_s19  ;;  %v3764_v0 = vld [vmem:[%s6226_s5 + $0xc0] sm:$0xff] }
 0x34a   :  { %1213 = vrot.lane.b32.xlu2 %v1205_v3, %s3953_s3 }
 0x352   :  { %1238 = vrot.lane.b32.xlu2 %v1230_v6, %s3954_s20  ;;  %v3766_v6 = vld [vmem:[%s6226_s5 + $0xf8] sm:$0xff] }
 0x353   :  { %723 = vadd.xlane.f32.xlu0 %v722_v10 }
 0x35a   :  { %1263 = vrot.lane.b32.xlu2 %v1255_v16, %s3955_s6  ;;  %v3778_v16 = vld [vmem:[%s6226_s5 + $0x178] sm:$0xff] }
 0x362   :  { %1288 = vrot.lane.b32.xlu2 %v1280_v4, %s3956_s21 }
 0x367   :  { %1261 = vrot.lane.b32.xlu0 %v1254_v17, %s3955_s6  ;;  %v3782_v17 = vld [vmem:[%s6226_s5 + $0x1d0] sm:$0xff]  ;;  %s3734_s6 = sld [smem:[#allocation3 + $0x1]] }
 0x36f   :  { %1286 = vrot.lane.b32.xlu0 %v1279_v22, %s3956_s21 }
 0x383   :  { %v4614_v62 = vpop.permute.xlu0 %1161  ;;  %v1160_v3 = vpop.permute.xlu1 %1159 }
 0x38b   :  { %v4621_v44 = vpop.permute.xlu0 %1186  ;;  %v1185_v9 = vpop.permute.xlu1 %1184 }
 0x38d   :  { %v1043_v27 = vpop.xlane.xlu2 %1042 }
 0x38e   :  { %v1044_v14 = vrot.slane %v1043_v27, 4 }
 0x390   :  { %v1045_v24 = vadd.f32 %v1044_v14, %v1043_v27 }
 0x392   :  { %v1046_v29 = vrot.slane %v1045_v24, 2 }
 0x393   :  { %v4626_v21 = vpop.permute.xlu0 %1211  ;;  %v1210_v10 = vpop.permute.xlu1 %1209 }
 0x394   :  { %v1047_v37 = vadd.f32 %v1046_v29, %v1045_v24 }
 0x395   :  { %v1301_v28 = vpop.permute.xlu2 %1300 }
 0x396   :  { %v1305_v23 = vmul.f32 %v4559_v47, %v1301_v28  ;;  %v1304_v30 = vmul.f32 %v4493_v2, %v1301_v28  ;;  %v1303_v35 = vmul.f32 %v4515_v61, %v1301_v28  ;;  %v1048_v51 = vrot.slane %v1047_v37, 1 }
 0x398   :  { %1313 = vrot.lane.b32.xlu2 %v1305_v23, %s3957_s7  ;;  %1311 = vrot.lane.b32.xlu0 %v1304_v30, %s3957_s7  ;;  %v1049_v1 = vadd.f32 %v1048_v51, %v1047_v37  ;;  %v1147_v30 = vmul.f32 %v4559_v47, %v1143_v43  ;;  %v1190_v47 = vsel %vm145_vm1, %v1185_v9, %v4621_v44 }
 0x399   :  { %1309 = vrot.lane.b32.xlu1 %v1303_v35, %s3957_s7 }
 0x39b   :  { %v4634_v39 = vpop.permute.xlu0 %1236  ;;  %v1235_v22 = vpop.permute.xlu1 %1234 }
 0x39c   :  { %v1240_v29 = vsel %vm197_vm3, %v1235_v22, %v4634_v39 }
 0x39d   :  { %v1164_v40 = vpop.permute.xlu2 %1163 }
 0x39e   :  { %v1172_v35 = vadd.f32 %v1164_v40, %v1147_v30  ;;  %v1166_v7 = vsel %vm119_vm0, %v4614_v62, %v1164_v40 }
 0x3a0   :  { %1338 = vrot.lane.b32.xlu2 %v1330_v63, %s3958_s24  ;;  %1336 = vrot.lane.b32.xlu0 %v1329_v32, %s3958_s24  ;;  %v1165_v32 = vsel %vm119_vm0, %v1160_v3, %v4614_v62  ;;  %v1215_v62 = vsel %vm171_vm2, %v1210_v10, %v4626_v21 }
 0x3a1   :  { %1334 = vrot.lane.b32.xlu1 %v1328_v34, %s3958_s24  ;;  %s3735_s24 = sld [smem:[#allocation5 + $0x1]] }
 0x3a3   :  { %v1260_v23 = vpop.permute.xlu1 %1259 }
 0x3a5   :  { %v1189_v50 = vpop.permute.xlu2 %1188 }
 0x3a6   :  { %v1197_v31 = vadd.f32 %v1189_v50, %v1172_v35 }
 0x3a8   :  { %430 = vrot.lane.b32.xlu2 %v422_v38, %s3959_s0  ;;  %v1145_v38 = vmul.f32 %v4515_v61, %v1143_v43 }
 0x3aa   :  { %v1170_v14 = vadd.f32 %v1165_v32, %v1145_v38 }
 0x3ab   :  { %v1285_v34 = vpop.permute.xlu1 %1284 }
 0x3ad   :  { %v1214_v54 = vpop.permute.xlu2 %1213 }
 0x3ae   :  { %v1222_v60 = vadd.f32 %v1214_v54, %v1197_v31  ;;  %v1216_v61 = vsel %vm171_vm2, %v4626_v21, %v1214_v54 }
 0x3b0   :  { %1498 = vperm.xlu2 %3868, %v1477_v36   ;;  %v1146_v36 = vmul.f32 %v4493_v2, %v1143_v43 }
 0x3b2   :  { %v1171_v24 = vadd.f32 %v1166_v7, %v1146_v36 }
 0x3b5   :  { %v1239_v15 = vpop.permute.xlu2 %1238 }
 0x3b6   :  { %v1247_v19 = vadd.f32 %v1239_v15, %v1222_v60 }
 0x3b8   :  { %1539 = vperm.xlu2 %3868, %v3759_v45   ;;  %v1191_v45 = vsel %vm145_vm1, %v4621_v44, %v1189_v50  ;;  %v1241_v44 = vsel %vm197_vm3, %v4634_v39, %v1239_v15  ;;  %vm78_vm1 = vcmask 154624  }
 0x3bd   :  { %v1264_v4 = vpop.permute.xlu2 %1263 }
 0x3c0   :  { %1597 = vperm.xlu2 %3868, %v1480_v18   ;;  %v1272_v18 = vadd.f32 %v1264_v4, %v1247_v19 }
 0x3c5   :  { %v1289_v27 = vpop.permute.xlu2 %1288 }
 0x3c6   :  { %v724_v41 = vpop.xlane.xlu0 %723  ;;  %v1297_v2 = vadd.f32 %v1289_v27, %v1272_v18 }
 0x3c7   :  { %v725_v55 = vrot.slane %v724_v41, 4 }
 0x3c8   :  { %1647 = vperm.xlu2 %3868, %v3763_v20  }
 0x3c9   :  { %v726_v58 = vadd.f32 %v725_v55, %v724_v41  ;;  %v1195_v41 = vadd.f32 %v1190_v47, %v1170_v14  ;;  %v1196_v55 = vadd.f32 %v1191_v45, %v1171_v24 }
 0x3cb   :  { %v727_v33 = vrot.slane %v726_v58, 2 }
 0x3cd   :  { %v728_v53 = vadd.f32 %v727_v33, %v726_v58 }
 0x3cf   :  { %v729_v56 = vrot.slane %v728_v53, 1 }
 0x3d0   :  { %1730 = vperm.xlu2 %3868, %v3764_v0   ;;  %v1220_v0 = vadd.f32 %v1215_v62, %v1195_v41 }
 0x3d1   :  { %v730_v12 = vadd.f32 %v729_v56, %v728_v53  ;;  %v1221_v53 = vadd.f32 %v1216_v61, %v1196_v55 }
 0x3d3   :  { %3829 = vpush %v730_v12 }
 0x3d4   :  { %3831 = vpush %v1049_v1  ;;  %v1246_v1 = vadd.f32 %v1241_v44, %v1221_v53 }
 0x3d8   :  { %1805 = vperm.xlu2 %3868, %v3769_v5  }
 0x3d9   :  { %v1262_v28 = vpop.permute.xlu0 %1261 }
 0x3da   :  { %v1265_v50 = vsel %vm223_vm4, %v1260_v23, %v1262_v28  ;;  %v1266_v51 = vsel %vm223_vm4, %v1262_v28, %v1264_v4  ;;  %vm80_vm4 = vcmask 1048248  }
 0x3db   :  { %v1271_v10 = vadd.f32 %v1266_v51, %v1246_v1 }
 0x3e0   :  { %1672 = vperm.xlu2 %3868, %v3766_v6  }
 0x3e1   :  { %v1287_v63 = vpop.permute.xlu0 %1286 }
 0x3e2   :  { %v1291_v5 = vsel %vm249_vm5, %v1287_v63, %v1289_v27 }
 0x3e3   :  { %v1296_v23 = vadd.f32 %v1291_v5, %v1271_v10  ;;  %v417_v5 = vmax.f32 %v4563_v48, 0.0  ;;  %v1479_v48 = vld [vmem:[%s6226_s5 + $0x18] sm:$0xff] }
 0x3e8   :  { %2289 = vperm.xlu2 %3868, %v3778_v16   ;;  %v1290_v16 = vsel %vm249_vm5, %v1285_v34, %v1287_v63  ;;  %vm437_vm5 = vcmask 1041560  }
 0x3f0   :  { %2397 = vperm.xlu2 %3868, %v3782_v17  }
 0x3f2   :  { %v1314_v13 = vpop.permute.xlu2 %1313 }
 0x3f3   :  { %v1322_v58 = vadd.f32 %v1314_v13, %v1297_v2 }
 0x3fa   :  { %v1339_v43 = vpop.permute.xlu2 %1338 }
 0x3fb   :  { %v1347_v3 = vadd.f32 %v1339_v43, %v1322_v58 }
 0x3fd   :  { %v1353_v4 = vrot.slane %v1347_v3, 2  ;;  %v1362_v45 = vrot.slane %v1347_v3, 4 }
 0x3ff   :  { %v1359_v34 = vadd.f32 %v1353_v4, %v1347_v3 }
 0x401   :  { %v1368_v24 = vadd.f32 %v1362_v45, %v1359_v34  ;;  %v3768_v34 = vld [vmem:[%s6226_s5 + $0x110] sm:$0xff]  ;;  %v3779_v45 = vld [vmem:[%s6226_s5 + $0x188] sm:$0xff] }
 0x404   :  { %s4661_s1 = spop %3829 }
 0x405   :  { %s3832_s27 = spop %3831  ;;  %v732_v58 = vstv %s4661_s1 }
 0x406   :  { %v1051_v20 = vstv %s3832_s27  ;;  %v733_v51 = vmul.f32 0.001953125, %v732_v58  ;;  %v3960_v58 = vmov 0.0  }
 0x407   :  { %v1052_v40 = vmul.f32 0.001953125, %v1051_v20  ;;  %79 = vst.msk [vmem:[#allocation2] sm:$0xff] %vm78_vm1, %v3960_v58 }
 0x408   :  { %81 = vst.msk [vmem:[#allocation2 + $0x10] sm:$0xff] %vm80_vm4, %v3960_v58  ;;  %v1098_v58 = vstv %s3746_s15 }
 0x409   :  { %v4676_v37 = vsub.f32 %v4508_v52, %v1052_v40  ;;  %v4679_v33 = vsub.f32 %v4523_v11, %v1052_v40  ;;  %v4682_v21 = vsub.f32 %v4521_v26, %v1052_v40  ;;  %v1245_v26 = vadd.f32 %v1240_v29, %v1220_v0 }
 0x40a   :  { %v1312_v56 = vpop.permute.xlu0 %1311  ;;  %v1371_v40 = vrot.slane %v1347_v3, 6 }
 0x40b   :  { %v1056_v39 = vmul.f32 %v4676_v37, %v4676_v37  ;;  %v1057_v52 = vmul.f32 %v4679_v33, %v4679_v33  ;;  %v1058_v11 = vmul.f32 %v4682_v21, %v4682_v21  ;;  %v1310_v12 = vpop.permute.xlu1 %1309  ;;  %v1270_v15 = vadd.f32 %v1265_v50, %v1245_v26 }
 0x40c   :  { %v1316_v17 = vsel %vm275_vm6, %v1312_v56, %v1314_v13  ;;  %v1315_v27 = vsel %vm275_vm6, %v1310_v12, %v1312_v56  ;;  %v734_v12 = vadd.f32 1e-05, %v733_v51  ;;  %vm440_vm6 = vcmask 705536  }
 0x40d   :  { %v1059_v54 = vmul.f32 %v1056_v39, %v4256_v42  ;;  %v1060_v9 = vmul.f32 %v1057_v52, %v4262_v46  ;;  %v1061_v6 = vmul.f32 %v1058_v11, %v4275_v59  ;;  %v1295_v35 = vadd.f32 %v1290_v16, %v1270_v15  ;;  %v1478_v15 = vld [vmem:[%s6226_s5 + $0x8] sm:$0xff] }
 0x40e   :  { %v1321_v60 = vadd.f32 %v1316_v17, %v1296_v23  ;;  %3871 = vrsqrt.f32 %v734_v12  ;;  %v418_v16 = vmax.f32 %v4565_v25, 0.0  ;;  %vm741_vm14 = vweird.f32 %v734_v12  ;;  %v3760_v25 = vld [vmem:[%s6226_s5 + $0x68] sm:$0xff] }
 0x40f   :  { %v1062_v22 = vsel %vm350_vm8, %v1059_v54, 0.0  ;;  %v1063_v28 = vsel %vm350_vm8, %v1060_v9, 0.0  ;;  %v1065_v31 = vsel %vm354_vm9, %v1061_v6, 0.0  ;;  %v1320_v19 = vadd.f32 %v1315_v27, %v1295_v35  ;;  %v3762_v35 = vld [vmem:[%s6226_s5 + $0xa8] sm:$0xff] }
 0x410   :  { %v1064_v30 = vadd.f32 %v1063_v28, %v1062_v22  ;;  %v420_v54 = vmul.f32 %v417_v5, %v4256_v42  ;;  %v421_v17 = vmul.f32 %v418_v16, %v4262_v46  ;;  %v3758_v28 = vld [vmem:[%s6226_s5 + $0x50] sm:$0xff]  ;;  %v3775_v5 = vld [vmem:[%s6226_s5 + $0x138] sm:$0xff] }
 0x411   :  { %v3785_v16 = vld [vmem:[%s6226_s5 + $0x218] sm:$0xff] }
 0x412   :  { %v1337_v32 = vpop.permute.xlu0 %1336  ;;  %v1066_v7 = vadd.f32 %v1065_v31, %v1064_v30  ;;  %v749_v31 = vstv %s3734_s6 }
 0x413   :  { %v1335_v38 = vpop.permute.xlu1 %1334  ;;  %v1341_v63 = vsel %vm301_vm7, %v1337_v32, %v1339_v43  ;;  %v4704_v43 = vadd.f32 %v1371_v40, %v1368_v24 }
 0x414   :  { %v1340_v13 = vsel %vm301_vm7, %v1335_v38, %v1337_v32  ;;  %v1346_v36 = vadd.f32 %v1341_v63, %v1321_v60  ;;  %1067 = vadd.xlane.f32.xlu1 %v1066_v7  ;;  %v3872_v9 = vpop.eup %3871  ;;  %v3761_v60 = vld [vmem:[%s6226_s5 + $0x70] sm:$0xff]  ;;  %v754_v7 = vstv %s3735_s24  ;;  %s3814_s24 = sld [smem:[#allocation7 + $0x2]] }
 0x415   :  { %v1345_v47 = vadd.f32 %v1340_v13, %v1320_v19  ;;  %v1380_v3 = vmul.f32 %v4704_v43, %v4275_v59  ;;  %v736_v6 = vmul.f32 %v3872_v9, %v734_v12  ;;  %vm742_vm13 = vweird.f32 %v3872_v9  ;;  %v3767_v19 = vld [vmem:[%s6226_s5 + $0x100] sm:$0xff]  ;;  %v3777_v12 = vld [vmem:[%s6226_s5 + $0x170] sm:$0xff] }
 0x416   :  { %v1352_v18 = vrot.slane %v1346_v36, 2  ;;  %v1361_v62 = vrot.slane %v1346_v36, 4  ;;  %v1370_v29 = vrot.slane %v1346_v36, 6  ;;  %vm743_vm15 = vmor %vm741_vm14, %vm742_vm13  ;;  %vm784_vm13 = vcmask 707586  }
 0x417   :  { %v1351_v14 = vrot.slane %v1345_v47, 2  ;;  %v1360_v2 = vrot.slane %v1345_v47, 4  ;;  %v1369_v44 = vrot.slane %v1345_v47, 6  ;;  %v1384_v26 = vsel %vm354_vm9, %v1380_v3, 0.0 }
 0x418   :  { %v1358_v20 = vadd.f32 %v1352_v18, %v1346_v36  ;;  %v737_v10 = vmul.f32 %v3872_v9, %v736_v6  ;;  %vm1128_vm14 = vcmask 709636  }
 0x419   :  { %v1357_v61 = vadd.f32 %v1351_v14, %v1345_v47  ;;  %v3774_v14 = vld [vmem:[%s6226_s5 + $0x128] sm:$0xff] }
 0x41a   :  { %v1367_v41 = vadd.f32 %v1361_v62, %v1358_v20  ;;  %v738_v4 = vmul.f32 0.5, %v737_v10 }
 0x41b   :  { %v1366_v55 = vadd.f32 %v1360_v2, %v1357_v61  ;;  %v3776_v2 = vld [vmem:[%s6226_s5 + $0x140] sm:$0xff] }
 0x41c   :  { %v4707_v0 = vadd.f32 %v1370_v29, %v1367_v41  ;;  %v739_v22 = vsub.f32 1.5, %v738_v4 }
 0x41d   :  { %v4709_v53 = vadd.f32 %v1369_v44, %v1366_v55 }
 0x41e   :  { %v1379_v50 = vmul.f32 %v4707_v0, %v4262_v46  ;;  %v740_v23 = vmul.f32 %v3872_v9, %v739_v22  ;;  %v431_v22 = vpop.permute.xlu2 %430 }
 0x41f   :  { %v1378_v56 = vmul.f32 %v4709_v53, %v4256_v42 }
 0x420   :  { %v1382_v39 = vsel %vm350_vm8, %v1379_v50, 0.0  ;;  %v744_v27 = vsel %vm743_vm15, %v3872_v9, %v740_v23  ;;  %v3783_v50 = vld [vmem:[%s6226_s5 + $0x1e0] sm:$0xff]  ;;  %vm1125_vm15 = vcmask 1045660  }
 0x421   :  { %v1381_v52 = vsel %vm350_vm8, %v1378_v56, 0.0  ;;  %v746_v30 = vmul.f32 %v744_v27, %v4573_v57  ;;  %v3765_v57 = vld [vmem:[%s6226_s5 + $0xc8] sm:$0xff]  ;;  %v745_v47 = vmul.f32 %v744_v27, %v4570_v49  ;;  %v747_v24 = vmul.f32 %v744_v27, %v4582_v8  ;;  %v3780_v49 = vld [vmem:[%s6226_s5 + $0x190] sm:$0xff] }
 0x422   :  { %v1383_v11 = vadd.f32 %v1382_v39, %v1381_v52  ;;  %v3787_v56 = vld [vmem:[%s6226_s5 + $0x230] sm:$0xff] }
 0x423   :  { %v751_v32 = vmul.f32 %v749_v31, %v746_v30  ;;  %v750_v18 = vmul.f32 %v749_v31, %v745_v47  ;;  %v752_v61 = vmul.f32 %v749_v31, %v747_v24 }
 0x424   :  { %v1385_v1 = vadd.f32 %v1384_v26, %v1383_v11 }
 0x425   :  { %v756_v38 = vadd.f32 %v754_v7, %v751_v32  ;;  %v755_v20 = vadd.f32 %v754_v7, %v750_v18  ;;  %v757_v41 = vadd.f32 %v754_v7, %v752_v61 }
 0x426   :  { %1386 = vadd.xlane.f32.xlu0 %v1385_v1 }
 0x427   :  { %v759_v63 = vmax.f32 %v756_v38, 0.0  ;;  %v758_v62 = vmax.f32 %v755_v20, 0.0  ;;  %v760_v55 = vmax.f32 %v757_v41, 0.0 }
 0x429   :  { %v762_v13 = vmul.f32 %v759_v63, %v4262_v46  ;;  %v761_v40 = vmul.f32 %v758_v62, %v4256_v42  ;;  %v763_v8 = vmul.f32 %v760_v55, %v4275_v59 }
 0x42b   :  { %v768_v36 = vrot.slane %v762_v13, 6  ;;  %v767_v29 = vrot.slane %v761_v40, 6  ;;  %v769_v44 = vrot.slane %v763_v8, 6 }
 0x42d   :  { %426 = vrot.lane.b32.xlu1 %v420_v54, %s3959_s0 }
 0x435   :  { %1506 = vperm.xlu1 %3867, %v1478_v15  }
 0x43a   :  { %428 = vrot.lane.b32.xlu0 %v421_v17, %s3959_s0 }
 0x43d   :  { %1564 = vperm.xlu1 %3867, %v1479_v48  }
 0x442   :  { %1531 = vperm.xlu0 %3866, %v3758_v28  }
 0x445   :  { %1622 = vperm.xlu1 %3867, %v3760_v25  }
 0x44a   :  { %1589 = vperm.xlu0 %3866, %v3762_v35  }
 0x44d   :  { %1680 = vperm.xlu1 %3867, %v3761_v60  }
 0x452   :  { %1705 = vperm.xlu0 %3866, %v3767_v19  }
 0x455   :  { %1755 = vperm.xlu1 %3867, %v3765_v57  }
 0x45a   :  { %1780 = vperm.xlu0 %3866, %v3768_v34  }
 0x45d   :  { %772 = vrot.lane.b32.xlu1 %v768_v36, %s3959_s0 }
 0x462   :  { %2372 = vperm.xlu0 %3866, %v3779_v45  }
 0x465   :  { %2256 = vperm.xlu1 %3867, %v3774_v14  }
 0x46a   :  { %2430 = vperm.xlu0 %3866, %v3780_v49  }
 0x46d   :  { %2347 = vperm.xlu1 %3867, %v3776_v2  }
 0x472   :  { %770 = vrot.lane.b32.xlu0 %v767_v29, %s3959_s0  ;;  %v1093_v29 = vstv %s3745_s14 }
 0x47a   :  { %774 = vrot.lane.b32.xlu0 %v769_v44, %s3959_s0 }
 0x482   :  { %2480 = vperm.xlu0 %3866, %v3783_v50  }
 0x487   :  { %v1068_v51 = vpop.xlane.xlu1 %1067 }
 0x488   :  { %v1069_v3 = vrot.slane %v1068_v51, 4 }
 0x48a   :  { %v1070_v39 = vadd.f32 %v1069_v3, %v1068_v51  ;;  %2530 = vperm.xlu0 %3866, %v3787_v56  }
 0x48c   :  { %v1071_v52 = vrot.slane %v1070_v39, 2 }
 0x48e   :  { %v1072_v11 = vadd.f32 %v1071_v52, %v1070_v39 }
 0x490   :  { %v1073_v26 = vrot.slane %v1072_v11, 1 }
 0x492   :  { %2281 = vperm.xlu0 %3866, %v3777_v12   ;;  %v1074_v1 = vadd.f32 %v1073_v26, %v1072_v11 }
 0x494   :  { %3833 = vpush %v1074_v1 }
 0x499   :  { %v1387_v54 = vpop.xlane.xlu0 %1386 }
 0x49a   :  { %v1388_v9 = vrot.slane %v1387_v54, 4  ;;  %2314 = vperm.xlu0 %3866, %v3775_v5  }
 0x49c   :  { %v1389_v6 = vadd.f32 %v1388_v9, %v1387_v54 }
 0x49e   :  { %v1390_v15 = vrot.slane %v1389_v6, 2 }
 0x49f   :  { %v427_v10 = vpop.permute.xlu1 %426 }
 0x4a0   :  { %438 = vst.msk [vmem:[#allocation2] sm:$0x3] %vm437_vm5, %v427_v10  ;;  %v1391_v4 = vadd.f32 %v1390_v15, %v1389_v6 }
 0x4a2   :  { %2422 = vperm.xlu0 %3866, %v3785_v16   ;;  %v1392_v17 = vrot.slane %v1391_v4, 1 }
 0x4a4   :  { %v1393_v48 = vadd.f32 %v1392_v17, %v1391_v4 }
 0x4a6   :  { %3835 = vpush %v1393_v48 }
 0x4a7   :  { %v4792_v27 = vpop.permute.xlu1 %1506 }
 0x4ac   :  { %v429_v28 = vpop.permute.xlu0 %428 }
 0x4ad   :  { %v432_v23 = vsel %vm78_vm1, %v427_v10, %v429_v28  ;;  %v433_v25 = vsel %vm78_vm1, %v429_v28, %v431_v22  ;;  %v3786_v22 = vld [vmem:[%s6226_s5 + $0x220] sm:$0xff]  ;;  %v4846_v28 = vpop.permute.xlu2 %1498 }
 0x4ae   :  { %439 = vst [vmem:[#allocation2 + $0x8] sm:$0x3] %v432_v23  ;;  %v3784_v23 = vld [vmem:[%s6226_s5 + $0x1e8] sm:$0xff] }
 0x4af   :  { %441 = vst.msk [vmem:[#allocation2 + $0x10] sm:$0x3] %vm440_vm6, %v433_v25  ;;  %v4796_v35 = vpop.permute.xlu1 %1564 }
 0x4b4   :  { %v4794_v30 = vpop.permute.xlu0 %1531 }
 0x4b7   :  { %v4802_v32 = vpop.permute.xlu1 %1622 }
 0x4bc   :  { %v4798_v31 = vpop.permute.xlu0 %1589 }
 0x4bf   :  { %v4806_v63 = vpop.permute.xlu1 %1680 }
 0x4c4   :  { %v4800_v60 = vpop.permute.xlu0 %1705 }
 0x4c5   :  { %s3834_s13 = spop %3833 }
 0x4c6   :  { %v1076_v7 = vstv %s3834_s13  ;;  %s2129_s13 = sld [smem:[#allocation8]] }
 0x4c7   :  { %v1077_v19 = vmul.f32 0.001953125, %v1076_v7  ;;  %v4810_v49 = vpop.permute.xlu1 %1755  ;;  %v4852_v7 = vpop.permute.xlu2 %1539 }
 0x4c9   :  { %v1078_v38 = vadd.f32 1e-05, %v1077_v19  ;;  %v3788_v19 = vld [vmem:[%s6226_s5 + $0x238] sm:$0xff] }
 0x4cb   :  { %3873 = vrsqrt.f32 %v1078_v38  ;;  %vm1085_vm10 = vweird.f32 %v1078_v38 }
 0x4cc   :  { %v4804_v57 = vpop.permute.xlu0 %1780 }
 0x4cf   :  { %v773_v1 = vpop.permute.xlu1 %772 }
 0x4d1   :  { %v3874_v34 = vpop.eup %3873 }
 0x4d2   :  { %v1080_v13 = vmul.f32 %v3874_v34, %v1078_v38  ;;  %vm1086_vm7 = vweird.f32 %v3874_v34 }
 0x4d3   :  { %vm1087_vm11 = vmor %vm1085_vm10, %vm1086_vm7  ;;  %vm1469_vm7 = vcmask 1047710   ;;  %vm1472_vm10 = vcmask 711686  }
 0x4d4   :  { %v1081_v36 = vmul.f32 %v3874_v34, %v1080_v13  ;;  %v4808_v47 = vpop.permute.xlu0 %2372  ;;  %v3781_v13 = vld [vmem:[%s6226_s5 + $0x1c8] sm:$0xff] }
 0x4d6   :  { %v1082_v45 = vmul.f32 0.5, %v1081_v36 }
 0x4d7   :  { %s3836_s16 = spop %3835 }
 0x4d8   :  { %v1083_v18 = vsub.f32 1.5, %v1082_v45  ;;  %v1395_v14 = vstv %s3836_s16  ;;  %v4860_v45 = vpop.permute.xlu2 %1597 }
 0x4d9   :  { %v1396_v24 = vmul.f32 0.001953125, %v1395_v14 }
 0x4da   :  { %v1084_v20 = vmul.f32 %v3874_v34, %v1083_v18 }
 0x4db   :  { %v4813_v62 = vsub.f32 %v4709_v53, %v1396_v24  ;;  %v4816_v61 = vsub.f32 %v4707_v0, %v1396_v24  ;;  %v4819_v2 = vsub.f32 %v4704_v43, %v1396_v24 }
 0x4dc   :  { %v1088_v40 = vsel %vm1087_vm11, %v3874_v34, %v1084_v20  ;;  %v4821_v41 = vpop.permute.xlu0 %2430 }
 0x4dd   :  { %v1090_v55 = vmul.f32 %v1088_v40, %v4679_v33  ;;  %v1091_v8 = vmul.f32 %v1088_v40, %v4682_v21  ;;  %v1400_v44 = vmul.f32 %v4813_v62, %v4813_v62  ;;  %v1401_v53 = vmul.f32 %v4816_v61, %v4816_v61 }
 0x4de   :  { %v1402_v0 = vmul.f32 %v4819_v2, %v4819_v2  ;;  %v1089_v25 = vmul.f32 %v1088_v40, %v4676_v37 }
 0x4df   :  { %v1403_v43 = vmul.f32 %v1400_v44, %v4256_v42  ;;  %v1095_v50 = vmul.f32 %v1093_v29, %v1090_v55  ;;  %v1096_v51 = vmul.f32 %v1093_v29, %v1091_v8  ;;  %v1404_v56 = vmul.f32 %v1401_v53, %v4262_v46  ;;  %v4880_v53 = vpop.permute.xlu1 %2256 }
 0x4e0   :  { %v1405_v33 = vmul.f32 %v1402_v0, %v4275_v59  ;;  %v1094_v38 = vmul.f32 %v1093_v29, %v1089_v25  ;;  %v4864_v14 = vpop.permute.xlu2 %1647 }
 0x4e1   :  { %v1406_v21 = vsel %vm350_vm8, %v1403_v43, 0.0  ;;  %v1100_v3 = vadd.f32 %v1098_v58, %v1095_v50  ;;  %v1101_v39 = vadd.f32 %v1098_v58, %v1096_v51  ;;  %v1407_v52 = vsel %vm350_vm8, %v1404_v56, 0.0 }
 0x4e2   :  { %v1408_v11 = vadd.f32 %v1407_v52, %v1406_v21  ;;  %v1409_v54 = vsel %vm354_vm9, %v1405_v33, 0.0  ;;  %v1099_v34 = vadd.f32 %v1098_v58, %v1094_v38 }
 0x4e3   :  { %v1103_v12 = vmax.f32 %v1100_v3, 0.0  ;;  %v1104_v26 = vmax.f32 %v1101_v39, 0.0 }
 0x4e4   :  { %v771_v5 = vpop.permute.xlu0 %770  ;;  %v1410_v6 = vadd.f32 %v1409_v54, %v1408_v11  ;;  %v1102_v36 = vmax.f32 %v1099_v34, 0.0  ;;  %v1437_v34 = vstv %s3756_s29 }
 0x4e5   :  { %v776_v9 = vsel %vm78_vm1, %v771_v5, %v773_v1  ;;  %782 = vst.msk [vmem:[#allocation2] sm:$0xc] %vm781_vm12, %v771_v5  ;;  %v1106_v15 = vmul.f32 %v1103_v12, %v4262_v46  ;;  %v1107_v10 = vmul.f32 %v1104_v26, %v4275_v59 }
 0x4e6   :  { %783 = vst [vmem:[#allocation2 + $0x8] sm:$0xc] %v776_v9  ;;  %1411 = vadd.xlane.f32.xlu2 %v1410_v6  ;;  %v1105_v18 = vmul.f32 %v1102_v36, %v4256_v42 }
 0x4e7   :  { %v1112_v16 = vrot.slane %v1106_v15, 4  ;;  %v1113_v4 = vrot.slane %v1107_v10, 4  ;;  %v4886_v43 = vpop.permute.xlu1 %2347 }
 0x4e8   :  { %v1111_v37 = vrot.slane %v1105_v18, 4  ;;  %v4866_v24 = vpop.permute.xlu2 %1730 }
 0x4e9   :  { %1116 = vrot.lane.b32.xlu1 %v1112_v16, %s3959_s0  ;;  %1118 = vrot.lane.b32.xlu0 %v1113_v4, %s3959_s0 }
 0x4ec   :  { %v775_v17 = vpop.permute.xlu0 %774 }
 0x4ed   :  { %v777_v48 = vsel %vm78_vm1, %v773_v1, %v775_v17 }
 0x4ee   :  { %785 = vst.msk [vmem:[#allocation2 + $0x10] sm:$0xc] %vm784_vm13, %v777_v48  ;;  %vm2143_vm13 = vcmask 1043456  }
 0x4f0   :  { %v4870_v40 = vpop.permute.xlu2 %1805 }
 0x4f4   :  { %v4868_v20 = vpop.permute.xlu0 %2480 }
 0x4f8   :  { %v4874_v55 = vpop.permute.xlu2 %1672 }
 0x4fc   :  { %v4872_v29 = vpop.permute.xlu0 %2530 }
 0x4fe   :  { %2455 = vperm.xlu2 %3868, %v3786_v22  }
 0x500   :  { %v4878_v44 = vpop.permute.xlu2 %2289 }
 0x504   :  { %v4876_v8 = vpop.permute.xlu0 %2281 }
 0x506   :  { %2505 = vperm.xlu2 %3868, %v3784_v23  }
 0x508   :  { %v4884_v58 = vpop.permute.xlu2 %2397 }
 0x50c   :  { %v4882_v0 = vpop.permute.xlu0 %2314 }
 0x50e   :  { %2555 = vperm.xlu2 %3868, %v3788_v19  }
 0x514   :  { %v4888_v50 = vpop.permute.xlu0 %2422 }
 0x515   :  { %6248 = vst [vmem:[#allocation16_spill] sm:$0xff] %v4888_v50 }
 0x516   :  { %2339 = vperm.xlu2 %3868, %v3781_v13  }
 0x51e   :  { %1114 = vrot.lane.b32.xlu2 %v1111_v37, %s3959_s0  ;;  %v1442_v37 = vstv %s3757_s30 }
 0x559   :  { %v1412_v51 = vpop.xlane.xlu2 %1411 }
 0x55a   :  { %v1413_v56 = vrot.slane %v1412_v51, 4 }
 0x55b   :  { %v1117_v33 = vpop.permute.xlu1 %1116  ;;  %v1119_v21 = vpop.permute.xlu0 %1118 }
 0x55c   :  { %v1121_v3 = vsel %vm78_vm1, %v1117_v33, %v1119_v21  ;;  %v1414_v39 = vadd.f32 %v1413_v56, %v1412_v51 }
 0x55d   :  { %1129 = vst.msk [vmem:[#allocation2 + $0x10] sm:$0x30] %vm1128_vm14, %v1121_v3  ;;  %vm2146_vm14 = vcmask 1043458  }
 0x55e   :  { %v1415_v52 = vrot.slane %v1414_v39, 2 }
 0x560   :  { %v1416_v11 = vadd.f32 %v1415_v52, %v1414_v39 }
 0x561   :  { %v4891_v12 = vpop.permute.xlu2 %2455 }
 0x562   :  { %v1417_v26 = vrot.slane %v1416_v11, 1 }
 0x564   :  { %v1418_v1 = vadd.f32 %v1417_v26, %v1416_v11 }
 0x566   :  { %3837 = vpush %v1418_v1 }
 0x569   :  { %v4893_v5 = vpop.permute.xlu2 %2505 }
 0x571   :  { %v4895_v54 = vpop.permute.xlu2 %2555 }
 0x579   :  { %v4897_v9 = vpop.permute.xlu2 %2339 }
 0x581   :  { %v1115_v6 = vpop.permute.xlu2 %1114 }
 0x582   :  { %v1120_v15 = vsel %vm78_vm1, %v1115_v6, %v1117_v33  ;;  %1126 = vst.msk [vmem:[#allocation2] sm:$0x30] %vm1125_vm15, %v1115_v6  ;;  %vm2148_vm15 = vcmask 553988  }
 0x583   :  { %1127 = vst [vmem:[#allocation2 + $0x8] sm:$0x30] %v1120_v15 }
 0x597   :  { %s3838_s28 = spop %3837 }
 0x598   :  { %v1420_v10 = vstv %s3838_s28 }
 0x599   :  { %v1421_v16 = vmul.f32 0.001953125, %v1420_v10 }
 0x59b   :  { %v1422_v4 = vadd.f32 1e-05, %v1421_v16 }
 0x59d   :  { %3875 = vrsqrt.f32 %v1422_v4  ;;  %vm1429_vm5 = vweird.f32 %v1422_v4 }
 0x5a3   :  { %v3876_v17 = vpop.eup %3875 }
 0x5a4   :  { %v1424_v48 = vmul.f32 %v3876_v17, %v1422_v4  ;;  %vm1430_vm4 = vweird.f32 %v3876_v17 }
 0x5a5   :  { %vm1431_vm6 = vmor %vm1429_vm5, %vm1430_vm4 }
 0x5a6   :  { %v1425_v22 = vmul.f32 %v3876_v17, %v1424_v48  ;;  %vm5907_vm4 = vmor %vm2146_vm14, %vm350_vm8 }
 0x5a7   :  { %vm5919_vm5 = vmor %vm2148_vm15, %vm5907_vm4 }
 0x5a8   :  { %v1426_v23 = vmul.f32 0.5, %v1425_v22 }
 0x5aa   :  { %v1427_v25 = vsub.f32 1.5, %v1426_v23 }
 0x5ac   :  { %v1428_v19 = vmul.f32 %v3876_v17, %v1427_v25 }
 0x5ae   :  { %v1432_v38 = vsel %vm1431_vm6, %v3876_v17, %v1428_v19 }
 0x5af   :  { %v1433_v13 = vmul.f32 %v1432_v38, %v4813_v62  ;;  %v1434_v36 = vmul.f32 %v1432_v38, %v4816_v61  ;;  %v1435_v18 = vmul.f32 %v1432_v38, %v4819_v2 }
 0x5b1   :  { %v1440_v51 = vmul.f32 %v1437_v34, %v1435_v18  ;;  %v1439_v56 = vmul.f32 %v1437_v34, %v1434_v36  ;;  %v1438_v33 = vmul.f32 %v1437_v34, %v1433_v13 }
 0x5b3   :  { %v1445_v21 = vadd.f32 %v1442_v37, %v1440_v51  ;;  %v1444_v3 = vadd.f32 %v1442_v37, %v1439_v56  ;;  %v1443_v39 = vadd.f32 %v1442_v37, %v1438_v33 }
 0x5b5   :  { %v1448_v52 = vmax.f32 %v1445_v21, 0.0  ;;  %v1447_v11 = vmax.f32 %v1444_v3, 0.0  ;;  %v1446_v26 = vmax.f32 %v1443_v39, 0.0 }
 0x5b7   :  { %v1451_v1 = vmul.f32 %v1448_v52, %v4275_v59  ;;  %v1450_v6 = vmul.f32 %v1447_v11, %v4262_v46  ;;  %v1449_v62 = vmul.f32 %v1446_v26, %v4256_v42 }
 0x5b9   :  { %v1457_v15 = vrot.slane %v1451_v1, 2  ;;  %v1456_v61 = vrot.slane %v1450_v6, 2  ;;  %v1455_v10 = vrot.slane %v1449_v62, 2 }
 0x5bb   :  { %1462 = vrot.lane.b32.xlu0 %v1457_v15, %s3959_s0  ;;  %1460 = vrot.lane.b32.xlu1 %v1456_v61, %s3959_s0 }
 0x5bc   :  { %1458 = vrot.lane.b32.xlu2 %v1455_v10, %s3959_s0 }
 0x616   :  { %v1459_v2 = vpop.permute.xlu2 %1458 }
 0x617   :  { %1470 = vst.msk [vmem:[#allocation2] sm:$0xc0] %vm1469_vm7, %v1459_v2 }
 0x61e   :  { %v4909_v16 = vld [vmem:[#allocation2] sm:$0xff] }
 0x61f   :  { %v1509_v4 = vmul.f32 %v4792_v27, %v4909_v16  ;;  %v1542_v17 = vmul.f32 %v4852_v7, %v4909_v16  ;;  %v1650_v48 = vmul.f32 %v4864_v14, %v4909_v16  ;;  %v1600_v22 = vmul.f32 %v4860_v45, %v4909_v16 }
 0x620   :  { %v1567_v23 = vmul.f32 %v4796_v35, %v4909_v16  ;;  %v2292_v25 = vmul.f32 %v4878_v44, %v4909_v16  ;;  %v1683_v36 = vmul.f32 %v4806_v63, %v4909_v16  ;;  %v1625_v18 = vmul.f32 %v4802_v32, %v4909_v16 }
 0x621   :  { %1548 = vrot.lane.b32.xlu1 %v1542_v17, %s3951_s18  ;;  %1515 = vrot.lane.b32.xlu0 %v1509_v4, %s3951_s18  ;;  %v2433_v37 = vmul.f32 %v4821_v41, %v4909_v16  ;;  %v1708_v56 = vmul.f32 %v4800_v60, %v4909_v16  ;;  %v2458_v21 = vmul.f32 %v4891_v12, %v4909_v16 }
 0x622   :  { %1656 = vrot.lane.b32.xlu2 %v1650_v48, %s3951_s18  ;;  %v1733_v3 = vmul.f32 %v4866_v24, %v4909_v16  ;;  %v1758_v26 = vmul.f32 %v4810_v49, %v4909_v16  ;;  %v1783_v62 = vmul.f32 %v4804_v57, %v4909_v16  ;;  %v2375_v4 = vmul.f32 %v4808_v47, %v4909_v16 }
 0x629   :  { %1606 = vrot.lane.b32.xlu1 %v1600_v22, %s3954_s20  ;;  %1573 = vrot.lane.b32.xlu0 %v1567_v23, %s3953_s3 }
 0x62a   :  { %2298 = vrot.lane.b32.xlu2 %v2292_v25, %s3951_s18 }
 0x62d   :  { %v1461_v19 = vpop.permute.xlu1 %1460  ;;  %v1463_v38 = vpop.permute.xlu0 %1462 }
 0x62e   :  { %v1464_v34 = vsel %vm78_vm1, %v1459_v2, %v1461_v19  ;;  %v1465_v13 = vsel %vm78_vm1, %v1461_v19, %v1463_v38 }
 0x62f   :  { %1471 = vst [vmem:[#allocation2 + $0x8] sm:$0xc0] %v1464_v34 }
 0x630   :  { %1473 = vst.msk [vmem:[#allocation2 + $0x10] sm:$0xc0] %vm1472_vm10, %v1465_v13 }
 0x631   :  { %1689 = vrot.lane.b32.xlu1 %v1683_v36, %s3954_s20  ;;  %1631 = vrot.lane.b32.xlu0 %v1625_v18, %s3953_s3 }
 0x632   :  { %2439 = vrot.lane.b32.xlu2 %v2433_v37, %s3954_s20 }
 0x636   :  { %v4940_v51 = vld [vmem:[#allocation2 + $0x8] sm:$0xff] }
 0x637   :  { %v1543_v33 = vmul.f32 %v4852_v7, %v4940_v51  ;;  %v1601_v39 = vmul.f32 %v4860_v45, %v4940_v51  ;;  %v1510_v52 = vmul.f32 %v4792_v27, %v4940_v51  ;;  %v4960_v11 = vld [vmem:[#allocation2 + $0x10] sm:$0xff]  ;;  %v1568_v61 = vmul.f32 %v4796_v35, %v4940_v51 }
 0x638   :  { %v1627_v1 = vmul.f32 %v4802_v32, %v4960_v11  ;;  %v1544_v6 = vmul.f32 %v4852_v7, %v4960_v11  ;;  %v1652_v15 = vmul.f32 %v4864_v14, %v4960_v11  ;;  %v1808_v7 = vmul.f32 %v4870_v40, %v4909_v16 }
 0x639   :  { %1714 = vrot.lane.b32.xlu1 %v1708_v56, %s3951_s18  ;;  %1550 = vrot.lane.b32.xlu0 %v1543_v33, %s3951_s18  ;;  %v1684_v10 = vmul.f32 %v4806_v63, %v4940_v51  ;;  %v1602_v2 = vmul.f32 %v4860_v45, %v4960_v11  ;;  %v1709_v17 = vmul.f32 %v4800_v60, %v4940_v51 }
 0x63a   :  { %2464 = vrot.lane.b32.xlu2 %v2458_v21, %s3951_s18  ;;  %v1685_v48 = vmul.f32 %v4806_v63, %v4960_v11  ;;  %v2400_v45 = vmul.f32 %v4884_v58, %v4909_v16  ;;  %v1734_v22 = vmul.f32 %v4866_v24, %v4940_v51  ;;  %v1710_v23 = vmul.f32 %v4800_v60, %v4960_v11 }
 0x63b   :  { %v1511_v63 = vmul.f32 %v4792_v27, %v4960_v11  ;;  %v1759_v25 = vmul.f32 %v4810_v49, %v4940_v51  ;;  %v1735_v19 = vmul.f32 %v4866_v24, %v4960_v11  ;;  %v1569_v60 = vmul.f32 %v4796_v35, %v4960_v11 }
 0x63c   :  { %v1784_v38 = vmul.f32 %v4804_v57, %v4940_v51  ;;  %v1760_v27 = vmul.f32 %v4810_v49, %v4960_v11  ;;  %v1626_v34 = vmul.f32 %v4802_v32, %v4940_v51  ;;  %v1809_v35 = vmul.f32 %v4870_v40, %v4940_v51 }
 0x63d   :  { %v1785_v13 = vmul.f32 %v4804_v57, %v4960_v11  ;;  %v1651_v36 = vmul.f32 %v4864_v14, %v4940_v51  ;;  %v2293_v32 = vmul.f32 %v4878_v44, %v4940_v51  ;;  %v1810_v18 = vmul.f32 %v4870_v40, %v4960_v11 }
 0x63e   :  { %v2434_v37 = vmul.f32 %v4821_v41, %v4940_v51  ;;  %v2376_v14 = vmul.f32 %v4808_v47, %v4940_v51  ;;  %v2294_v56 = vmul.f32 %v4878_v44, %v4960_v11  ;;  %v2377_v44 = vmul.f32 %v4808_v47, %v4960_v11 }
 0x63f   :  { %v2402_v47 = vmul.f32 %v4884_v58, %v4960_v11 }
 0x641   :  { %1739 = vrot.lane.b32.xlu1 %v1733_v3, %s3953_s3  ;;  %1608 = vrot.lane.b32.xlu0 %v1601_v39, %s3954_s20  ;;  %v2459_v3 = vmul.f32 %v4891_v12, %v4940_v51  ;;  %v2401_v39 = vmul.f32 %v4884_v58, %v4940_v51 }
 0x642   :  { %1517 = vrot.lane.b32.xlu2 %v1510_v52, %s3951_s18 }
 0x649   :  { %1764 = vrot.lane.b32.xlu1 %v1758_v26, %s3954_s20  ;;  %1635 = vrot.lane.b32.xlu0 %v1627_v1, %s3953_s3 }
 0x64a   :  { %1552 = vrot.lane.b32.xlu2 %v1544_v6, %s3951_s18  ;;  %v2484_v6 = vmul.f32 %v4868_v20, %v4940_v51 }
 0x651   :  { %1789 = vrot.lane.b32.xlu1 %v1783_v62, %s3953_s3  ;;  %1660 = vrot.lane.b32.xlu0 %v1652_v15, %s3951_s18  ;;  %v2435_v62 = vmul.f32 %v4821_v41, %v4960_v11  ;;  %v2460_v41 = vmul.f32 %v4891_v12, %v4960_v11 }
 0x652   :  { %1575 = vrot.lane.b32.xlu2 %v1568_v61, %s3953_s3 }
 0x659   :  { %1814 = vrot.lane.b32.xlu1 %v1808_v7, %s3954_s20  ;;  %1691 = vrot.lane.b32.xlu0 %v1684_v10, %s3954_s20  ;;  %v2509_v10 = vmul.f32 %v4893_v5, %v4940_v51 }
 0x65a   :  { %1610 = vrot.lane.b32.xlu2 %v1602_v2, %s3954_s20 }
 0x661   :  { %2381 = vrot.lane.b32.xlu1 %v2375_v4, %s3953_s3  ;;  %1716 = vrot.lane.b32.xlu0 %v1709_v17, %s3951_s18  ;;  %v2534_v17 = vmul.f32 %v4872_v29, %v4940_v51 }
 0x662   :  { %1693 = vrot.lane.b32.xlu2 %v1685_v48, %s3954_s20  ;;  %v2485_v48 = vmul.f32 %v4868_v20, %v4960_v11 }
 0x669   :  { %2406 = vrot.lane.b32.xlu1 %v2400_v45, %s3951_s18  ;;  %1741 = vrot.lane.b32.xlu0 %v1734_v22, %s3953_s3 }
 0x66a   :  { %1718 = vrot.lane.b32.xlu2 %v1710_v23, %s3951_s18  ;;  %v2510_v23 = vmul.f32 %v4893_v5, %v4960_v11 }
 0x671   :  { %1519 = vrot.lane.b32.xlu1 %v1511_v63, %s3951_s18  ;;  %1766 = vrot.lane.b32.xlu0 %v1759_v25, %s3954_s20  ;;  %v1536_v63 = vmul.f32 %v4794_v30, %v4960_v11 }
 0x672   :  { %1743 = vrot.lane.b32.xlu2 %v1735_v19, %s3953_s3 }
 0x679   :  { %1577 = vrot.lane.b32.xlu1 %v1569_v60, %s3953_s3  ;;  %1791 = vrot.lane.b32.xlu0 %v1784_v38, %s3953_s3 }
 0x67a   :  { %1768 = vrot.lane.b32.xlu2 %v1760_v27, %s3954_s20 }
 0x67c   :  { %v5025_v24 = vpop.permute.xlu2 %1656 }
 0x681   :  { %1633 = vrot.lane.b32.xlu1 %v1626_v34, %s3953_s3  ;;  %1816 = vrot.lane.b32.xlu0 %v1809_v35, %s3954_s20 }
 0x682   :  { %1793 = vrot.lane.b32.xlu2 %v1785_v13, %s3953_s3 }
 0x684   :  { %v5036_v49 = vpop.permute.xlu2 %2298 }
 0x689   :  { %1658 = vrot.lane.b32.xlu1 %v1651_v36, %s3951_s18  ;;  %2300 = vrot.lane.b32.xlu0 %v2293_v32, %s3951_s18 }
 0x68a   :  { %1818 = vrot.lane.b32.xlu2 %v1810_v18, %s3954_s20 }
 0x68c   :  { %v5047_v57 = vpop.permute.xlu2 %2439 }
 0x691   :  { %2441 = vrot.lane.b32.xlu1 %v2434_v37, %s3954_s20  ;;  %2383 = vrot.lane.b32.xlu0 %v2376_v14, %s3953_s3 }
 0x692   :  { %2302 = vrot.lane.b32.xlu2 %v2294_v56, %s3951_s18 }
 0x693   :  { %v5058_v40 = vpop.permute.xlu1 %1548  ;;  %v5060_v33 = vpop.permute.xlu0 %1515 }
 0x694   :  { %v5062_v21 = vpop.permute.xlu2 %2464 }
 0x695   :  { %6249 = vst [vmem:[#allocation17_spill] sm:$0xff] %v5062_v21 }
 0x699   :  { %2466 = vrot.lane.b32.xlu1 %v2459_v3, %s3951_s18  ;;  %2408 = vrot.lane.b32.xlu0 %v2401_v39, %s3951_s18 }
 0x69a   :  { %2385 = vrot.lane.b32.xlu2 %v2377_v44, %s3953_s3 }
 0x69b   :  { %v5073_v52 = vpop.permute.xlu1 %1606  ;;  %v5075_v26 = vpop.permute.xlu0 %1573 }
 0x69c   :  { %v5077_v1 = vpop.permute.xlu2 %1517 }
 0x6a1   :  { %2491 = vrot.lane.b32.xlu1 %v2484_v6, %s3953_s3  ;;  %2443 = vrot.lane.b32.xlu0 %v2435_v62, %s3954_s20  ;;  %v1594_v62 = vmul.f32 %v4798_v31, %v4960_v11 }
 0x6a2   :  { %2410 = vrot.lane.b32.xlu2 %v2402_v47, %s3951_s18 }
 0x6a3   :  { %v5088_v15 = vpop.permute.xlu1 %1689  ;;  %v5090_v61 = vpop.permute.xlu0 %1631 }
 0x6a4   :  { %v5092_v7 = vpop.permute.xlu2 %1552 }
 0x6a5   :  { %v1561_v25 = vadd.f32 %v5092_v7, %v1536_v63 }
 0x6a9   :  { %2516 = vrot.lane.b32.xlu1 %v2509_v10, %s3954_s20  ;;  %2468 = vrot.lane.b32.xlu0 %v2460_v41, %s3951_s18 }
 0x6ab   :  { %v5100_v58 = vpop.permute.xlu1 %1714  ;;  %v5102_v2 = vpop.permute.xlu0 %1550 }
 0x6ac   :  { %v5104_v4 = vpop.permute.xlu2 %1575 }
 0x6b1   :  { %2541 = vrot.lane.b32.xlu1 %v2534_v17, %s3953_s3  ;;  %2493 = vrot.lane.b32.xlu0 %v2485_v48, %s3953_s3 }
 0x6b3   :  { %v5112_v12 = vpop.permute.xlu1 %1739  ;;  %v5114_v45 = vpop.permute.xlu0 %1608 }
 0x6b4   :  { %v5116_v22 = vpop.permute.xlu2 %1610 }
 0x6b9   :  { %2518 = vrot.lane.b32.xlu0 %v2510_v23, %s3954_s20 }
 0x6bb   :  { %v5124_v19 = vpop.permute.xlu1 %1764  ;;  %v1636_v60 = vpop.permute.xlu0 %1635 }
 0x6bc   :  { %v5126_v38 = vpop.permute.xlu2 %1693  ;;  %v1644_v27 = vadd.f32 %v1636_v60, %v1561_v25 }
 0x6be   :  { %v1702_v34 = vadd.f32 %v5126_v38, %v1644_v27 }
 0x6c0   :  { %v1863_v35 = vrot.slane %v1702_v34, 2  ;;  %v1872_v32 = vrot.slane %v1702_v34, 4  ;;  %v1881_v56 = vrot.slane %v1702_v34, 6 }
 0x6c2   :  { %v1869_v36 = vadd.f32 %v1863_v35, %v1702_v34 }
 0x6c3   :  { %v5129_v13 = vpop.permute.xlu1 %1789  ;;  %v5131_v18 = vpop.permute.xlu0 %1660 }
 0x6c4   :  { %v1719_v37 = vpop.permute.xlu2 %1718  ;;  %v1878_v14 = vadd.f32 %v1872_v32, %v1869_v36  ;;  %v1669_v47 = vadd.f32 %v5131_v18, %v1594_v62  ;;  %v1677_v62 = vmul.f32 %v4874_v55, %v4960_v11 }
 0x6c6   :  { %v5133_v3 = vadd.f32 %v1881_v56, %v1878_v14 }
 0x6c8   :  { %6250 = vst [vmem:[#allocation18_spill] sm:$0xff] %v5133_v3  ;;  %1955 = vrot.lane.b32.xlu2 %v5133_v3, %s3951_s18 }
 0x6cb   :  { %v5137_v39 = vpop.permute.xlu1 %1814  ;;  %v1692_v44 = vpop.permute.xlu0 %1691 }
 0x6cc   :  { %v5139_v6 = vpop.permute.xlu2 %1743 }
 0x6cd   :  { %v1752_v41 = vadd.f32 %v5139_v6, %v1669_v47  ;;  %v1727_v47 = vadd.f32 %v1719_v37, %v1677_v62  ;;  %v1554_v62 = vsel %vm119_vm0, %v5058_v40, %v5102_v2 }
 0x6d3   :  { %v5144_v10 = vpop.permute.xlu1 %2381  ;;  %v1717_v17 = vpop.permute.xlu0 %1716 }
 0x6d4   :  { %v5147_v48 = vpop.permute.xlu2 %1768 }
 0x6d5   :  { %v1777_v23 = vadd.f32 %v5147_v48, %v1752_v41 }
 0x6d7   :  { %v1893_v63 = vrot.slane %v1777_v23, 2  ;;  %v1902_v27 = vrot.slane %v1777_v23, 4  ;;  %v1911_v32 = vrot.slane %v1777_v23, 6 }
 0x6d9   :  { %v1899_v25 = vadd.f32 %v1893_v63, %v1777_v23 }
 0x6db   :  { %v5150_v34 = vpop.permute.xlu1 %2406  ;;  %v1742_v35 = vpop.permute.xlu0 %1741  ;;  %v1908_v36 = vadd.f32 %v1902_v27, %v1899_v25 }
 0x6dc   :  { %v1794_v14 = vpop.permute.xlu2 %1793 }
 0x6dd   :  { %v5152_v56 = vadd.f32 %v1911_v32, %v1908_v36  ;;  %v1802_v41 = vadd.f32 %v1794_v14, %v1727_v47  ;;  %v1555_v47 = vsel %vm119_vm0, %v5102_v2, %v5092_v7  ;;  %v1675_v2 = vmul.f32 %v4874_v55, %v4909_v16 }
 0x6df   :  { %6251 = vst [vmem:[#allocation19_spill] sm:$0xff] %v5152_v56  ;;  %1972 = vrot.lane.b32.xlu2 %v5152_v56, %s3953_s3 }
 0x6e3   :  { %v5158_v3 = vpop.permute.xlu1 %1519  ;;  %v5160_v63 = vpop.permute.xlu0 %1766 }
 0x6e4   :  { %v1819_v46 = vpop.permute.xlu2 %1818 }
 0x6e5   :  { %v1827_v42 = vadd.f32 %v1819_v46, %v1802_v41  ;;  %v1534_v41 = vmul.f32 %v4794_v30, %v4909_v16 }
 0x6e7   :  { %v1923_v59 = vrot.slane %v1827_v42, 2  ;;  %v1932_v23 = vrot.slane %v1827_v42, 4  ;;  %v1941_v50 = vrot.slane %v1827_v42, 6 }
 0x6e9   :  { %v1929_v25 = vadd.f32 %v1923_v59, %v1827_v42  ;;  %v1535_v59 = vmul.f32 %v4794_v30, %v4940_v51  ;;  %v1559_v42 = vadd.f32 %v1554_v62, %v1534_v41  ;;  %v1695_v30 = vsel %vm197_vm3, %v5088_v15, %v1692_v44 }
 0x6ea   :  { %v1720_v62 = vsel %vm119_vm0, %v5100_v58, %v1717_v17  ;;  %v1676_v15 = vmul.f32 %v4874_v55, %v4940_v51 }
 0x6eb   :  { %v5162_v27 = vpop.permute.xlu1 %1577  ;;  %v1792_v36 = vpop.permute.xlu0 %1791  ;;  %v1938_v32 = vadd.f32 %v1932_v23, %v1929_v25  ;;  %v1725_v58 = vadd.f32 %v1720_v62, %v1675_v2 }
 0x6ec   :  { %v1795_v55 = vsel %vm171_vm2, %v5129_v13, %v1792_v36 }
 0x6ed   :  { %v5164_v21 = vadd.f32 %v1941_v50, %v1938_v32  ;;  %v1560_v50 = vadd.f32 %v1555_v47, %v1535_v59  ;;  %v1592_v59 = vmul.f32 %v4798_v31, %v4909_v16 }
 0x6ef   :  { %6252 = vst [vmem:[#allocation20_spill] sm:$0xff] %v5164_v21  ;;  %1989 = vrot.lane.b32.xlu2 %v5164_v21, %s3954_s20  ;;  %v1696_v21 = vsel %vm197_vm3, %v1692_v44, %v5126_v38  ;;  %v1593_v38 = vmul.f32 %v4798_v31, %v4940_v51  ;;  %v1796_v31 = vsel %vm171_vm2, %v1792_v36, %v1794_v14 }
 0x6f0   :  { %v1800_v36 = vadd.f32 %v1795_v55, %v1725_v58 }
 0x6f3   :  { %v1634_v25 = vpop.permute.xlu1 %1633  ;;  %v1817_v32 = vpop.permute.xlu0 %1816 }
 0x6f4   :  { %v1637_v23 = vsel %vm171_vm2, %v5090_v61, %v1634_v25  ;;  %v1638_v40 = vsel %vm171_vm2, %v1634_v25, %v1636_v60  ;;  %v2483_v61 = vmul.f32 %v4868_v20, %v4909_v16  ;;  %v1721_v60 = vsel %vm119_vm0, %v1717_v17, %v1719_v37 }
 0x6f5   :  { %v1642_v56 = vadd.f32 %v1637_v23, %v1559_v42  ;;  %v1643_v7 = vadd.f32 %v1638_v40, %v1560_v50  ;;  %v2508_v42 = vmul.f32 %v4893_v5, %v4909_v16  ;;  %v1726_v37 = vadd.f32 %v1721_v60, %v1676_v15 }
 0x6f6   :  { %v1746_v17 = vsel %vm171_vm2, %v1742_v35, %v5139_v6  ;;  %v1770_v5 = vsel %vm197_vm3, %v5124_v19, %v5160_v63  ;;  %v1820_v23 = vsel %vm197_vm3, %v5137_v39, %v1817_v32  ;;  %v1821_v40 = vsel %vm197_vm3, %v1817_v32, %v1819_v46 }
 0x6f7   :  { %v1700_v47 = vadd.f32 %v1695_v30, %v1642_v56  ;;  %v1701_v41 = vadd.f32 %v1696_v21, %v1643_v7  ;;  %2489 = vrot.lane.b32.xlu2 %v2483_v61, %s3953_s3  ;;  %v1745_v21 = vsel %vm171_vm2, %v5112_v12, %v1742_v35  ;;  %v1801_v2 = vadd.f32 %v1796_v31, %v1726_v37 }
 0x6f9   :  { %v1862_v20 = vrot.slane %v1701_v41, 2  ;;  %v1861_v44 = vrot.slane %v1700_v47, 2  ;;  %v1871_v19 = vrot.slane %v1701_v41, 4  ;;  %v1870_v14 = vrot.slane %v1700_v47, 4 }
 0x6fa   :  { %v1880_v62 = vrot.slane %v1701_v41, 6  ;;  %v1879_v15 = vrot.slane %v1700_v47, 6 }
 0x6fb   :  { %v1659_v56 = vpop.permute.xlu1 %1658  ;;  %v1868_v50 = vadd.f32 %v1862_v20, %v1701_v41  ;;  %v1867_v25 = vadd.f32 %v1861_v44, %v1700_v47  ;;  %v5217_v35 = vpop.permute.xlu0 %2300  ;;  %v1826_v20 = vadd.f32 %v1821_v40, %v1801_v2 }
 0x6fc   :  { %v1662_v12 = vsel %vm119_vm0, %v5025_v24, %v1659_v56  ;;  %v1663_v6 = vsel %vm119_vm0, %v1659_v56, %v5131_v18  ;;  %v1771_v24 = vsel %vm197_vm3, %v5160_v63, %v5147_v48  ;;  %v1825_v18 = vadd.f32 %v1820_v23, %v1800_v36 }
 0x6fd   :  { %v1667_v13 = vadd.f32 %v1662_v12, %v1592_v59  ;;  %v1668_v7 = vadd.f32 %v1663_v6, %v1593_v38  ;;  %v1877_v30 = vadd.f32 %v1871_v19, %v1868_v50  ;;  %v1876_v60 = vadd.f32 %v1870_v14, %v1867_v25 }
 0x6fe   :  { %v1921_v38 = vrot.slane %v1825_v18, 2  ;;  %v1922_v48 = vrot.slane %v1826_v20, 2  ;;  %v1931_v6 = vrot.slane %v1826_v20, 4  ;;  %v1930_v19 = vrot.slane %v1825_v18, 4 }
 0x6ff   :  { %v1750_v61 = vadd.f32 %v1745_v21, %v1667_v13  ;;  %v1751_v39 = vadd.f32 %v1746_v17, %v1668_v7  ;;  %v5223_v44 = vadd.f32 %v1880_v62, %v1877_v30  ;;  %2514 = vrot.lane.b32.xlu2 %v2508_v42, %s3954_s20  ;;  %v5226_v59 = vadd.f32 %v1879_v15, %v1876_v60  ;;  %v2303_v60 = vpop.permute.xlu2 %2302  ;;  %v3773_v15 = vld [vmem:[%s6226_s5 + $0x120] sm:$0xff] }
 0x700   :  { %v2533_v42 = vmul.f32 %v4872_v29, %v4909_v16  ;;  %v1928_v23 = vadd.f32 %v1922_v48, %v1826_v20  ;;  %v1927_v12 = vadd.f32 %v1921_v38, %v1825_v18  ;;  %v2558_v14 = vmul.f32 %v4895_v54, %v4909_v16 }
 0x701   :  { %v1775_v46 = vadd.f32 %v1770_v5, %v1750_v61  ;;  %v1776_v32 = vadd.f32 %v1771_v24, %v1751_v39  ;;  %1953 = vrot.lane.b32.xlu0 %v5223_v44, %s3951_s18  ;;  %1951 = vrot.lane.b32.xlu1 %v5226_v59, %s3951_s18  ;;  %v1940_v2 = vrot.slane %v1826_v20, 6  ;;  %v1939_v30 = vrot.slane %v1825_v18, 6 }
 0x702   :  { %v1937_v13 = vadd.f32 %v1931_v6, %v1928_v23  ;;  %v1936_v7 = vadd.f32 %v1930_v19, %v1927_v12  ;;  %v2559_v24 = vmul.f32 %v4895_v54, %v4940_v51  ;;  %v2535_v18 = vmul.f32 %v4872_v29, %v4960_v11 }
 0x703   :  { %v1892_v47 = vrot.slane %v1776_v32, 2  ;;  %v1891_v41 = vrot.slane %v1775_v46, 2  ;;  %v2384_v63 = vpop.permute.xlu0 %2383  ;;  %v1901_v37 = vrot.slane %v1776_v32, 4  ;;  %v1900_v17 = vrot.slane %v1775_v46, 4  ;;  %v2442_v36 = vpop.permute.xlu1 %2441 }
 0x704   :  { %v1910_v55 = vrot.slane %v1776_v32, 6  ;;  %v1909_v56 = vrot.slane %v1775_v46, 6  ;;  %v5248_v62 = vadd.f32 %v1940_v2, %v1937_v13  ;;  %v5250_v61 = vadd.f32 %v1939_v30, %v1936_v7 }
 0x705   :  { %v1898_v58 = vadd.f32 %v1892_v47, %v1776_v32  ;;  %v1897_v21 = vadd.f32 %v1891_v41, %v1775_v46  ;;  %v2304_v32 = vsel %vm119_vm0, %v5036_v49, %v5217_v35  ;;  %v2284_v47 = vmul.f32 %v4876_v8, %v4909_v16 }
 0x706   :  { %v2261_v41 = vmul.f32 %v4880_v53, %v4960_v11  ;;  %v2387_v38 = vsel %vm171_vm2, %v5144_v10, %v2384_v63  ;;  %v2259_v48 = vmul.f32 %v4880_v53, %v4909_v16  ;;  %v2305_v49 = vsel %vm119_vm0, %v5217_v35, %v2303_v60 }
 0x707   :  { %v1907_v5 = vadd.f32 %v1901_v37, %v1898_v58  ;;  %v1906_v31 = vadd.f32 %v1900_v17, %v1897_v21  ;;  %2539 = vrot.lane.b32.xlu2 %v2533_v42, %s3953_s3  ;;  %v2386_v29 = vpop.permute.xlu2 %2385  ;;  %v2560_v58 = vmul.f32 %v4895_v54, %v4960_v11  ;;  %v2309_v37 = vadd.f32 %v2304_v32, %v2284_v47 }
 0x708   :  { %v2285_v21 = vmul.f32 %v4876_v8, %v4940_v51  ;;  %v2388_v10 = vsel %vm171_vm2, %v2384_v63, %v2386_v29  ;;  %v2319_v35 = vmul.f32 %v4882_v0, %v4960_v11  ;;  %v2317_v12 = vmul.f32 %v4882_v0, %v4909_v16 }
 0x709   :  { %v5235_v50 = vadd.f32 %v1910_v55, %v1907_v5  ;;  %v5237_v25 = vadd.f32 %v1909_v56, %v1906_v31  ;;  %v2392_v17 = vadd.f32 %v2387_v38, %v2309_v37  ;;  %v2445_v55 = vsel %vm197_vm3, %v5047_v57, %v2442_v36 }
 0x70a   :  { %v2310_v54 = vadd.f32 %v2305_v49, %v2285_v21  ;;  %v2260_v6 = vmul.f32 %v4880_v53, %v4940_v51  ;;  %v2343_v13 = vmul.f32 %v4897_v9, %v4940_v51  ;;  %v2286_v7 = vmul.f32 %v4876_v8, %v4960_v11 }
 0x70b   :  { %1970 = vrot.lane.b32.xlu0 %v5235_v50, %s3953_s3  ;;  %1968 = vrot.lane.b32.xlu1 %v5237_v25, %s3953_s3  ;;  %v5243_v40 = vpop.permute.xlu0 %2408  ;;  %v5263_v20 = vpop.permute.xlu1 %2466  ;;  %v2450_v23 = vadd.f32 %v2445_v55, %v2392_v17  ;;  %v2352_v32 = vmul.f32 %v4886_v43, %v4960_v11  ;;  %v2350_v38 = vmul.f32 %v4886_v43, %v4909_v16 }
 0x70c   :  { %v2393_v56 = vadd.f32 %v2388_v10, %v2310_v54  ;;  %v2311_v2 = vadd.f32 %v2303_v60, %v2286_v7  ;;  %v2344_v21 = vmul.f32 %v4897_v9, %v4960_v11 }
 0x70d   :  { %v2620_v60 = vrot.slane %v2450_v23, 4 }
 0x70e   :  { %v2394_v47 = vadd.f32 %v2386_v29, %v2311_v2 }
 0x70f   :  { %2564 = vrot.lane.b32.xlu2 %v2558_v14, %s3954_s20  ;;  %v2411_v19 = vpop.permute.xlu2 %2410  ;;  %v2611_v14 = vrot.slane %v2450_v23, 2 }
 0x710   :  { %v2413_v57 = vsel %vm119_vm0, %v5243_v40, %v2411_v19  ;;  %v2419_v10 = vadd.f32 %v2411_v19, %v2344_v21 }
 0x711   :  { %v2418_v30 = vadd.f32 %v2413_v57, %v2343_v13 }
 0x713   :  { %1987 = vrot.lane.b32.xlu0 %v5248_v62, %s3954_s20  ;;  %1985 = vrot.lane.b32.xlu1 %v5250_v61, %s3954_s20  ;;  %v2444_v39 = vpop.permute.xlu0 %2443  ;;  %v5287_v42 = vpop.permute.xlu1 %2491 }
 0x714   :  { %v2446_v31 = vsel %vm197_vm3, %v2442_v36, %v2444_v39 }
 0x715   :  { %v2451_v63 = vadd.f32 %v2446_v31, %v2393_v56  ;;  %v2629_v31 = vrot.slane %v2450_v23, 6 }
 0x717   :  { %2248 = vperm.xlu2 %3868, %v3773_v15   ;;  %v2612_v15 = vrot.slane %v2451_v63, 2  ;;  %v2621_v17 = vrot.slane %v2451_v63, 4  ;;  %v2630_v56 = vrot.slane %v2451_v63, 6 }
 0x719   :  { %v2618_v49 = vadd.f32 %v2612_v15, %v2451_v63 }
 0x71b   :  { %2543 = vrot.lane.b32.xlu0 %v2535_v18, %s3953_s3  ;;  %2566 = vrot.lane.b32.xlu1 %v2559_v24, %s3954_s20  ;;  %v5267_v46 = vpop.permute.xlu0 %2468  ;;  %v2517_v24 = vpop.permute.xlu1 %2516 }
 0x71f   :  { %2269 = vrot.lane.b32.xlu2 %v2261_v41, %s3951_s18  ;;  %v2617_v41 = vadd.f32 %v2611_v14, %v2450_v23 }
 0x721   :  { %v2626_v29 = vadd.f32 %v2620_v60, %v2617_v41 }
 0x722   :  { %v5332_v19 = vpop.permute.xlu2 %1955 }
 0x723   :  { %2568 = vrot.lane.b32.xlu0 %v2560_v58, %s3954_s20  ;;  %2265 = vrot.lane.b32.xlu1 %v2259_v48, %s3951_s18  ;;  %v2494_v5 = vpop.permute.xlu0 %2493  ;;  %v2318_v48 = vmul.f32 %v4882_v0, %v4940_v51  ;;  %v2452_v58 = vadd.f32 %v2444_v39, %v2394_v47  ;;  %v2627_v0 = vadd.f32 %v2621_v17, %v2618_v49 }
 0x724   :  { %v2496_v53 = vsel %vm171_vm2, %v5287_v42, %v2494_v5  ;;  %v2502_v39 = vadd.f32 %v2494_v5, %v2419_v10 }
 0x725   :  { %v2501_v8 = vadd.f32 %v2496_v53, %v2418_v30  ;;  %v2613_v54 = vrot.slane %v2452_v58, 2  ;;  %v5330_v57 = vadd.f32 %v2630_v56, %v2627_v0  ;;  %v2622_v5 = vrot.slane %v2452_v58, 4 }
 0x726   :  { %v2631_v53 = vrot.slane %v2452_v58, 6 }
 0x727   :  { %2327 = vrot.lane.b32.xlu2 %v2319_v35, %s3953_s3  ;;  %v5324_v35 = vadd.f32 %v2629_v31, %v2626_v29  ;;  %v2619_v13 = vadd.f32 %v2613_v54, %v2452_v58  ;;  %v2412_v58 = vsel %vm119_vm0, %v5150_v34, %v5243_v40  ;;  %v1503_v34 = vmul.f32 %v4846_v28, %v4960_v11 }
 0x728   :  { %v1502_v40 = vmul.f32 %v4846_v28, %v4940_v51 }
 0x729   :  { %v2628_v14 = vadd.f32 %v2622_v5, %v2619_v13  ;;  %v1579_v5 = vsel %vm171_vm2, %v5075_v26, %v5104_v4 }
 0x72b   :  { %2267 = vrot.lane.b32.xlu0 %v2260_v6, %s3951_s18  ;;  %2323 = vrot.lane.b32.xlu1 %v2317_v12, %s3953_s3  ;;  %v2519_v36 = vpop.permute.xlu0 %2518  ;;  %v2351_v12 = vmul.f32 %v4886_v43, %v4940_v51  ;;  %v5337_v2 = vadd.f32 %v2631_v53, %v2628_v14 }
 0x72c   :  { %v2521_v18 = vsel %vm197_vm3, %v2517_v24, %v2519_v36  ;;  %v2527_v6 = vadd.f32 %v2519_v36, %v2502_v39 }
 0x72d   :  { %v2526_v37 = vadd.f32 %v2521_v18, %v2501_v8 }
 0x72e   :  { %v2643_v63 = vrot.slane %v2527_v6, 2  ;;  %v2661_v8 = vrot.slane %v2527_v6, 6 }
 0x72f   :  { %2360 = vrot.lane.b32.xlu2 %v2352_v32, %s3954_s20  ;;  %v2642_v55 = vrot.slane %v2526_v37, 2  ;;  %v2651_v23 = vrot.slane %v2526_v37, 4  ;;  %v2660_v36 = vrot.slane %v2526_v37, 6  ;;  %v2652_v32 = vrot.slane %v2527_v6, 4 }
 0x730   :  { %v2649_v15 = vadd.f32 %v2643_v63, %v2527_v6  ;;  %v1501_v6 = vmul.f32 %v4846_v28, %v4909_v16  ;;  %v5385_v63 = vpop.permute.xlu1 %2541  ;;  %v1613_v28 = vsel %vm197_vm3, %v5114_v45, %v5116_v22 }
 0x731   :  { %v2648_v7 = vadd.f32 %v2642_v55, %v2526_v37  ;;  %v2342_v37 = vmul.f32 %v4897_v9, %v4909_v16  ;;  %v1522_v9 = vsel %vm119_vm0, %v5077_v1, %v5158_v3 }
 0x732   :  { %v2658_v47 = vadd.f32 %v2652_v32, %v2649_v15  ;;  %v1527_v13 = vadd.f32 %v1522_v9, %v1502_v40 }
 0x733   :  { %2325 = vrot.lane.b32.xlu0 %v2318_v48, %s3953_s3  ;;  %2356 = vrot.lane.b32.xlu1 %v2350_v38, %s3954_s20  ;;  %v2657_v43 = vadd.f32 %v2651_v23, %v2648_v7  ;;  %v2417_v49 = vadd.f32 %v2412_v58, %v2342_v37 }
 0x734   :  { %v5347_v41 = vadd.f32 %v2661_v8, %v2658_v47 }
 0x735   :  { %v5339_v30 = vadd.f32 %v2660_v36, %v2657_v43 }
 0x737   :  { %2701 = vrot.lane.b32.xlu2 %v5324_v35, %s3951_s18 }
 0x739   :  { %v5341_v18 = vpop.permute.xlu2 %1972 }
 0x73b   :  { %2358 = vrot.lane.b32.xlu0 %v2351_v12, %s3954_s20  ;;  %2703 = vrot.lane.b32.xlu1 %v5330_v57, %s3951_s18  ;;  %v1580_v12 = vsel %vm171_vm2, %v5104_v4, %v5162_v27 }
 0x743   :  { %2705 = vrot.lane.b32.xlu0 %v5337_v2, %s3951_s18  ;;  %2720 = vrot.lane.b32.xlu1 %v5339_v30, %s3953_s3 }
 0x749   :  { %v5349_v38 = vpop.permute.xlu2 %1989 }
 0x74b   :  { %2722 = vrot.lane.b32.xlu0 %v5347_v41, %s3953_s3 }
 0x751   :  { %v2490_v48 = vpop.permute.xlu2 %2489 }
 0x752   :  { %v2495_v60 = vsel %vm171_vm2, %v2490_v48, %v5287_v42  ;;  %v1528_v42 = vadd.f32 %v5158_v3, %v1503_v34  ;;  %v1585_v3 = vadd.f32 %v1580_v12, %v1527_v13 }
 0x753   :  { %v2500_v21 = vadd.f32 %v2495_v60, %v2417_v49 }
 0x754   :  { %v1586_v7 = vadd.f32 %v5162_v27, %v1528_v42  ;;  %v1618_v43 = vadd.f32 %v1613_v28, %v1585_v3  ;;  %v6254_v28 = vld [vmem:[#allocation16_spill] sm:$0xff] }
 0x756   :  { %v1619_v14 = vadd.f32 %v5116_v22, %v1586_v7  ;;  %v1832_v4 = vrot.slane %v1618_v43, 2  ;;  %v1841_v37 = vrot.slane %v1618_v43, 4 }
 0x758   :  { %v1833_v53 = vrot.slane %v1619_v14, 2  ;;  %v1842_v47 = vrot.slane %v1619_v14, 4  ;;  %v1838_v48 = vadd.f32 %v1832_v4, %v1618_v43  ;;  %v1851_v60 = vrot.slane %v1619_v14, 6  ;;  %v6257_v4 = vld [vmem:[#allocation14_spill] sm:$0xff] }
 0x759   :  { %v2515_v29 = vpop.permute.xlu2 %2514 }
 0x75a   :  { %v2520_v17 = vsel %vm197_vm3, %v2515_v29, %v2517_v24  ;;  %v1521_v24 = vsel %vm119_vm0, %v5060_v33, %v5077_v1  ;;  %v1612_v33 = vsel %vm197_vm3, %v5073_v52, %v5114_v45  ;;  %v1839_v32 = vadd.f32 %v1833_v53, %v1619_v14  ;;  %v6253_v14 = vld [vmem:[#allocation17_spill] sm:$0xff] }
 0x75b   :  { %v2525_v10 = vadd.f32 %v2520_v17, %v2500_v21  ;;  %v1526_v23 = vadd.f32 %v1521_v24, %v1501_v6  ;;  %v1847_v21 = vadd.f32 %v1841_v37, %v1838_v48 }
 0x75c   :  { %v1848_v58 = vadd.f32 %v1842_v47, %v1839_v32 }
 0x75d   :  { %v2641_v54 = vrot.slane %v2525_v10, 2  ;;  %v2650_v31 = vrot.slane %v2525_v10, 4  ;;  %v2659_v39 = vrot.slane %v2525_v10, 6  ;;  %v1584_v1 = vadd.f32 %v1579_v5, %v1526_v23 }
 0x75e   :  { %v5394_v45 = vadd.f32 %v1851_v60, %v1848_v58 }
 0x75f   :  { %v2647_v55 = vadd.f32 %v2641_v54, %v2525_v10  ;;  %v1617_v27 = vadd.f32 %v1612_v33, %v1584_v1  ;;  %v1850_v10 = vrot.slane %v1618_v43, 6  ;;  %v6255_v43 = vld [vmem:[#allocation15_spill] sm:$0xff] }
 0x761   :  { %v2656_v0 = vadd.f32 %v2650_v31, %v2647_v55  ;;  %v1831_v26 = vrot.slane %v1617_v27, 2  ;;  %v1840_v52 = vrot.slane %v1617_v27, 4  ;;  %v1849_v22 = vrot.slane %v1617_v27, 6  ;;  %v2540_v34 = vpop.permute.xlu2 %2539 }
 0x762   :  { %v1964_v31 = vadd.f32 %v5332_v19, %v5394_v45  ;;  %v2545_v32 = vsel %vm171_vm2, %v2540_v34, %v5385_v63 }
 0x763   :  { %v5361_v56 = vadd.f32 %v2659_v39, %v2656_v0  ;;  %v1837_v8 = vadd.f32 %v1831_v26, %v1617_v27  ;;  %v5403_v39 = vadd.f32 %v1850_v10, %v1847_v21  ;;  %v2425_v27 = vmul.f32 %v6254_v28, %v4909_v16 }
 0x764   :  { %v1981_v42 = vadd.f32 %v5341_v18, %v1964_v31  ;;  %v2426_v10 = vmul.f32 %v6254_v28, %v4940_v51 }
 0x765   :  { %2718 = vrot.lane.b32.xlu2 %v5361_v56, %s3953_s3  ;;  %v1846_v49 = vadd.f32 %v1840_v52, %v1837_v8 }
 0x766   :  { %v1998_v6 = vadd.f32 %v5349_v38, %v1981_v42 }
 0x767   :  { %v5401_v0 = vadd.f32 %v1849_v22, %v1846_v49  ;;  %v2471_v22 = vsel %vm119_vm0, %v5263_v20, %v5267_v46 }
 0x768   :  { %v2001_v53 = vmul.f32 %v1998_v6, %v6255_v43  ;;  %v2476_v34 = vadd.f32 %v2471_v22, %v2426_v10 }
 0x769   :  { %v2565_v48 = vpop.permute.xlu2 %2564 }
 0x76a   :  { %v2005_v16 = vsel %vm354_vm9, %v2001_v53, 0.0 }
 0x773   :  { %v1952_v36 = vpop.permute.xlu1 %1951  ;;  %v1954_v15 = vpop.permute.xlu0 %1953 }
 0x774   :  { %v1957_v54 = vsel %vm119_vm0, %v1952_v36, %v1954_v15  ;;  %v1958_v55 = vsel %vm119_vm0, %v1954_v15, %v5332_v19  ;;  %v6256_v36 = vld [vmem:[#allocation13_spill] sm:$0xff] }
 0x775   :  { %v1962_v24 = vadd.f32 %v1957_v54, %v5401_v0  ;;  %v1963_v12 = vadd.f32 %v1958_v55, %v5403_v39 }
 0x77d   :  { %v1969_v29 = vpop.permute.xlu1 %1968  ;;  %v1971_v17 = vpop.permute.xlu0 %1970 }
 0x77e   :  { %v1974_v9 = vsel %vm171_vm2, %v1969_v29, %v1971_v17  ;;  %v1975_v40 = vsel %vm171_vm2, %v1971_v17, %v5341_v18  ;;  %v2470_v18 = vsel %vm119_vm0, %v6253_v14, %v5263_v20  ;;  %v2427_v17 = vmul.f32 %v6254_v28, %v4960_v11 }
 0x77f   :  { %v1979_v13 = vadd.f32 %v1974_v9, %v1962_v24  ;;  %v1980_v19 = vadd.f32 %v1975_v40, %v1963_v12  ;;  %v2475_v47 = vadd.f32 %v2470_v18, %v2425_v27  ;;  %v3803_v27 = vld [vmem:[%s6226_s5 + $0x298] sm:$0xff] }
 0x780   :  { %v2477_v55 = vadd.f32 %v5267_v46, %v2427_v17 }
 0x781   :  { %v2550_v52 = vadd.f32 %v2545_v32, %v2475_v47  ;;  %v3807_v32 = vld [vmem:[%s6226_s5 + $0x2f0] sm:$0xff] }
 0x782   :  { %v3805_v47 = vld [vmem:[%s6226_s5 + $0x2b0] sm:$0xff] }
 0x785   :  { %v1986_v7 = vpop.permute.xlu1 %1985  ;;  %v1988_v5 = vpop.permute.xlu0 %1987 }
 0x786   :  { %v1991_v23 = vsel %vm197_vm3, %v1986_v7, %v1988_v5  ;;  %v1992_v3 = vsel %vm197_vm3, %v1988_v5, %v5349_v38 }
 0x787   :  { %v1996_v33 = vadd.f32 %v1991_v23, %v1979_v13  ;;  %v1997_v1 = vadd.f32 %v1992_v3, %v1980_v19 }
 0x789   :  { %v1999_v26 = vmul.f32 %v1996_v33, %v6256_v36  ;;  %v2000_v15 = vmul.f32 %v1997_v1, %v6257_v4  ;;  %v3808_v1 = vld [vmem:[%s6226_s5 + $0x300] sm:$0xff] }
 0x78b   :  { %v2002_v38 = vsel %vm350_vm8, %v1999_v26, 0.0  ;;  %v2003_v8 = vsel %vm350_vm8, %v2000_v15, 0.0  ;;  %v3804_v15 = vld [vmem:[%s6226_s5 + $0x2a8] sm:$0xff] }
 0x78c   :  { %v2004_v58 = vadd.f32 %v2003_v8, %v2002_v38  ;;  %v3811_v38 = vld [vmem:[%s6226_s5 + $0x340] sm:$0xff]  ;;  %v3809_v8 = vld [vmem:[%s6226_s5 + $0x308] sm:$0xff] }
 0x78d   :  { %v2567_v37 = vpop.permute.xlu1 %2566  ;;  %v2544_v60 = vpop.permute.xlu0 %2543 }
 0x78e   :  { %v2570_v49 = vsel %vm197_vm3, %v2565_v48, %v2567_v37  ;;  %v2006_v21 = vadd.f32 %v2005_v16, %v2004_v58  ;;  %v2546_v31 = vsel %vm171_vm2, %v5385_v63, %v2544_v60  ;;  %v2552_v42 = vadd.f32 %v2544_v60, %v2477_v55  ;;  %v5475_v55 = vld [vmem:[#allocation2] sm:$0xff] }
 0x78f   :  { %v2575_v29 = vadd.f32 %v2570_v49, %v2550_v52  ;;  %v2551_v24 = vadd.f32 %v2546_v31, %v2476_v34  ;;  %v2249_v52 = vpop.permute.xlu2 %2248  ;;  %v5478_v34 = vld [vmem:[#allocation2 + $0x8] sm:$0xff] }
 0x790   :  { %2007 = vadd.xlane.f32.xlu1 %v2006_v21  ;;  %v2251_v31 = vmul.f32 %v5475_v55, %v2249_v52 }
 0x791   :  { %v2671_v54 = vrot.slane %v2575_v29, 2  ;;  %v2680_v40 = vrot.slane %v2575_v29, 4  ;;  %v2689_v6 = vrot.slane %v2575_v29, 6 }
 0x793   :  { %v2677_v9 = vadd.f32 %v2671_v54, %v2575_v29 }
 0x795   :  { %v2569_v11 = vpop.permute.xlu0 %2568  ;;  %v2686_v12 = vadd.f32 %v2680_v40, %v2677_v9  ;;  %v2266_v48 = vpop.permute.xlu1 %2265  ;;  %v2252_v9 = vmul.f32 %v5478_v34, %v2249_v52  ;;  %v5481_v40 = vld [vmem:[#allocation2 + $0x10] sm:$0xff] }
 0x796   :  { %v2571_v20 = vsel %vm197_vm3, %v2567_v37, %v2569_v11  ;;  %v2577_v13 = vadd.f32 %v2569_v11, %v2552_v42  ;;  %v2253_v42 = vmul.f32 %v5481_v40, %v2249_v52 }
 0x797   :  { %v2576_v19 = vadd.f32 %v2571_v20, %v2551_v24  ;;  %v5440_v7 = vadd.f32 %v2689_v6, %v2686_v12  ;;  %v2270_v16 = vpop.permute.xlu2 %2269 }
 0x798   :  { %v2673_v51 = vrot.slane %v2577_v13, 2  ;;  %v2682_v63 = vrot.slane %v2577_v13, 4  ;;  %v2691_v3 = vrot.slane %v2577_v13, 6  ;;  %v2278_v12 = vadd.f32 %v2270_v16, %v2253_v42 }
 0x799   :  { %2735 = vrot.lane.b32.xlu2 %v5440_v7, %s3954_s20  ;;  %v2672_v5 = vrot.slane %v2576_v19, 2  ;;  %v2681_v18 = vrot.slane %v2576_v19, 4  ;;  %v2690_v53 = vrot.slane %v2576_v19, 6 }
 0x79a   :  { %v2679_v46 = vadd.f32 %v2673_v51, %v2577_v13 }
 0x79b   :  { %v2678_v14 = vadd.f32 %v2672_v5, %v2576_v19 }
 0x79c   :  { %v2688_v23 = vadd.f32 %v2682_v63, %v2679_v46 }
 0x79d   :  { %v2687_v28 = vadd.f32 %v2681_v18, %v2678_v14  ;;  %v2324_v58 = vpop.permute.xlu1 %2323  ;;  %v2268_v60 = vpop.permute.xlu0 %2267 }
 0x79e   :  { %v5444_v33 = vadd.f32 %v2691_v3, %v2688_v23  ;;  %v2271_v10 = vsel %vm119_vm0, %v2266_v48, %v2268_v60  ;;  %v2272_v54 = vsel %vm119_vm0, %v2268_v60, %v2270_v16 }
 0x79f   :  { %v5454_v26 = vadd.f32 %v2690_v53, %v2687_v28  ;;  %v2328_v29 = vpop.permute.xlu2 %2327  ;;  %v2276_v20 = vadd.f32 %v2271_v10, %v2251_v31  ;;  %v2277_v13 = vadd.f32 %v2272_v54, %v2252_v9 }
 0x7a0   :  { %2739 = vrot.lane.b32.xlu0 %v5444_v33, %s3954_s20  ;;  %v2336_v46 = vadd.f32 %v2328_v29, %v2278_v12 }
 0x7a1   :  { %3226 = vperm.xlu2 %3868, %v3808_v1  }
 0x7a5   :  { %v2357_v37 = vpop.permute.xlu1 %2356  ;;  %v2326_v21 = vpop.permute.xlu0 %2325 }
 0x7a6   :  { %v2329_v24 = vsel %vm171_vm2, %v2324_v58, %v2326_v21  ;;  %v2330_v11 = vsel %vm171_vm2, %v2326_v21, %v2328_v29 }
 0x7a7   :  { %v2361_v6 = vpop.permute.xlu2 %2360  ;;  %v2334_v63 = vadd.f32 %v2329_v24, %v2276_v20  ;;  %v2335_v5 = vadd.f32 %v2330_v11, %v2277_v13 }
 0x7a8   :  { %3035 = vperm.xlu0 %3866, %v3803_v27   ;;  %v2369_v1 = vadd.f32 %v2361_v6, %v2336_v46 }
 0x7a9   :  { %2737 = vrot.lane.b32.xlu1 %v5454_v26, %s3954_s20 }
 0x7aa   :  { %v2592_v21 = vrot.slane %v2369_v1, 4  ;;  %v2601_v42 = vrot.slane %v2369_v1, 6 }
 0x7ad   :  { %v2704_v49 = vpop.permute.xlu1 %2703  ;;  %v2359_v22 = vpop.permute.xlu0 %2358 }
 0x7ae   :  { %v2362_v19 = vsel %vm197_vm3, %v2357_v37, %v2359_v22  ;;  %v2363_v51 = vsel %vm197_vm3, %v2359_v22, %v2361_v6 }
 0x7af   :  { %v2367_v14 = vadd.f32 %v2362_v19, %v2334_v63  ;;  %v2368_v18 = vadd.f32 %v2363_v51, %v2335_v5 }
 0x7b0   :  { %3118 = vperm.xlu0 %3866, %v3804_v15  }
 0x7b1   :  { %v2581_v15 = vrot.slane %v2367_v14, 2  ;;  %v2591_v16 = vrot.slane %v2368_v18, 4  ;;  %v2590_v29 = vrot.slane %v2367_v14, 4  ;;  %v2600_v9 = vrot.slane %v2368_v18, 6 }
 0x7b2   :  { %v2599_v11 = vrot.slane %v2367_v14, 6 }
 0x7b3   :  { %v2587_v37 = vadd.f32 %v2581_v15, %v2367_v14 }
 0x7b5   :  { %v2721_v17 = vpop.permute.xlu1 %2720  ;;  %v2706_v28 = vpop.permute.xlu0 %2705  ;;  %v2596_v31 = vadd.f32 %v2590_v29, %v2587_v37 }
 0x7b6   :  { %v2708_v51 = vsel %vm119_vm0, %v2704_v49, %v2706_v28 }
 0x7b7   :  { %v5492_v20 = vadd.f32 %v2599_v11, %v2596_v31 }
 0x7b8   :  { %3143 = vperm.xlu0 %3866, %v3807_v32   ;;  %v2582_v32 = vrot.slane %v2368_v18, 2 }
 0x7ba   :  { %v2588_v58 = vadd.f32 %v2582_v32, %v2368_v18 }
 0x7bc   :  { %v2597_v10 = vadd.f32 %v2591_v16, %v2588_v58 }
 0x7bd   :  { %v2723_v22 = vpop.permute.xlu0 %2722 }
 0x7be   :  { %v5488_v12 = vadd.f32 %v2600_v9, %v2597_v10  ;;  %v2725_v46 = vsel %vm171_vm2, %v2721_v17, %v2723_v22 }
 0x7c0   :  { %3176 = vperm.xlu0 %3866, %v3805_v47   ;;  %v2583_v47 = vrot.slane %v2369_v1, 2  ;;  %6258 = vst [vmem:[#allocation17_spill] sm:$0xff] %v5488_v12 }
 0x7c2   :  { %v2589_v52 = vadd.f32 %v2583_v47, %v2369_v1 }
 0x7c4   :  { %v2598_v54 = vadd.f32 %v2592_v21, %v2589_v52 }
 0x7c6   :  { %v5490_v6 = vadd.f32 %v2601_v42, %v2598_v54 }
 0x7c8   :  { %3201 = vperm.xlu0 %3866, %v3811_v38   ;;  %v2714_v13 = vadd.f32 %v2706_v28, %v5490_v6 }
 0x7d0   :  { %3251 = vperm.xlu0 %3866, %v3809_v8   ;;  %v2702_v8 = vpop.permute.xlu2 %2701 }
 0x7d1   :  { %v2707_v19 = vsel %vm119_vm0, %v2702_v8, %v2704_v49 }
 0x7d2   :  { %v2712_v1 = vadd.f32 %v2707_v19, %v5492_v20 }
 0x7d8   :  { %v2719_v24 = vpop.permute.xlu2 %2718 }
 0x7d9   :  { %v2724_v63 = vsel %vm171_vm2, %v2719_v24, %v2721_v17 }
 0x7da   :  { %v2729_v18 = vadd.f32 %v2724_v63, %v2712_v1 }
 0x803   :  { %v2008_v23 = vpop.xlane.xlu1 %2007 }
 0x804   :  { %v2009_v3 = vrot.slane %v2008_v23, 4 }
 0x806   :  { %v2010_v27 = vadd.f32 %v2009_v3, %v2008_v23  ;;  %v2713_v23 = vadd.f32 %v2708_v51, %v5488_v12  ;;  %v2731_v3 = vadd.f32 %v2723_v22, %v2714_v13  ;;  %v3802_v51 = vld [vmem:[%s6226_s5 + $0x290] sm:$0xff] }
 0x808   :  { %v2011_v53 = vrot.slane %v2010_v27, 2  ;;  %v2730_v14 = vadd.f32 %v2725_v46, %v2713_v23 }
 0x80a   :  { %v2012_v38 = vadd.f32 %v2011_v53, %v2010_v27  ;;  %v2736_v27 = vpop.permute.xlu2 %2735 }
 0x80c   :  { %v2013_v48 = vrot.slane %v2012_v38, 1 }
 0x80e   :  { %v2014_v60 = vadd.f32 %v2013_v48, %v2012_v38 }
 0x810   :  { %3839 = vpush %v2014_v60 }
 0x812   :  { %v2740_v5 = vpop.permute.xlu0 %2739 }
 0x813   :  { %v2748_v53 = vadd.f32 %v2740_v5, %v2731_v3  ;;  %v3812_v3 = vld [vmem:[%s6226_s5 + $0x350] sm:$0xff] }
 0x815   :  { %v2751_v38 = vmul.f32 %v2748_v53, %v6255_v43  ;;  %v6261_v53 = vld [vmem:[#allocation20_spill] sm:$0xff] }
 0x817   :  { %v2755_v37 = vsel %vm354_vm9, %v2751_v38, 0.0  ;;  %v3801_v38 = vld [vmem:[%s6226_s5 + $0x260] sm:$0xff] }
 0x81a   :  { %v3036_v63 = vpop.permute.xlu0 %3035 }
 0x81b   :  { %v2738_v15 = vpop.permute.xlu1 %2737  ;;  %v3040_v23 = vmul.f32 %v5481_v40, %v3036_v63 }
 0x81c   :  { %v2741_v32 = vsel %vm197_vm3, %v2736_v27, %v2738_v15  ;;  %v2742_v47 = vsel %vm197_vm3, %v2738_v15, %v2740_v5  ;;  %v3039_v27 = vmul.f32 %v5478_v34, %v3036_v63 }
 0x81d   :  { %v2746_v49 = vadd.f32 %v2741_v32, %v2729_v18  ;;  %v2747_v28 = vadd.f32 %v2742_v47, %v2730_v14  ;;  %v3799_v14 = vld [vmem:[%s6226_s5 + $0x248] sm:$0xff] }
 0x81f   :  { %v2749_v17 = vmul.f32 %v2746_v49, %v6256_v36  ;;  %v2750_v8 = vmul.f32 %v2747_v28, %v6257_v4  ;;  %v3806_v28 = vld [vmem:[%s6226_s5 + $0x2e8] sm:$0xff] }
 0x821   :  { %v2752_v48 = vsel %vm350_vm8, %v2749_v17, 0.0  ;;  %v2753_v58 = vsel %vm350_vm8, %v2750_v8, 0.0  ;;  %v3038_v17 = vmul.f32 %v5475_v55, %v3036_v63 }
 0x822   :  { %v2754_v52 = vadd.f32 %v2753_v58, %v2752_v48  ;;  %v3119_v1 = vpop.permute.xlu0 %3118  ;;  %v3800_v58 = vld [vmem:[%s6226_s5 + $0x258] sm:$0xff] }
 0x823   :  { %v3121_v18 = vmul.f32 %v5475_v55, %v3119_v1  ;;  %v3123_v8 = vmul.f32 %v5481_v40, %v3119_v1 }
 0x824   :  { %v2756_v60 = vadd.f32 %v2755_v37, %v2754_v52 }
 0x826   :  { %2757 = vadd.xlane.f32.xlu1 %v2756_v60 }
 0x82a   :  { %v3144_v32 = vpop.permute.xlu0 %3143 }
 0x82b   :  { %v3146_v47 = vmul.f32 %v5475_v55, %v3144_v32  ;;  %v3148_v37 = vmul.f32 %v5481_v40, %v3144_v32 }
 0x832   :  { %v3177_v48 = vpop.permute.xlu0 %3176 }
 0x833   :  { %v3180_v52 = vmul.f32 %v5478_v34, %v3177_v48  ;;  %v3181_v63 = vmul.f32 %v5481_v40, %v3177_v48 }
 0x83a   :  { %v3202_v60 = vpop.permute.xlu0 %3201 }
 0x841   :  { %s3840_s4 = spop %3839 }
 0x842   :  { %v2016_v16 = vstv %s3840_s4  ;;  %s3789_s4 = sld [smem:[#allocation7 + $0x1]] }
 0x843   :  { %v5509_v21 = vmul.f32 0.00048828125, %v2016_v16  ;;  %v3122_v16 = vmul.f32 %v5478_v34, %v3119_v1 }
 0x845   :  { %v5513_v29 = vsub.f32 %v5237_v25, %v5509_v21  ;;  %v5517_v22 = vsub.f32 %v5226_v59, %v5509_v21  ;;  %v5521_v10 = vsub.f32 %v5223_v44, %v5509_v21  ;;  %v5534_v59 = vsub.f32 %v5250_v61, %v5509_v21  ;;  %v6259_v44 = vld [vmem:[#allocation18_spill] sm:$0xff]  ;;  %v6260_v61 = vld [vmem:[#allocation19_spill] sm:$0xff] }
 0x846   :  { %v5538_v25 = vsub.f32 %v6259_v44, %v5509_v21  ;;  %v5542_v42 = vsub.f32 %v5235_v50, %v5509_v21  ;;  %v5555_v19 = vsub.f32 %v6260_v61, %v5509_v21  ;;  %v5559_v50 = vsub.f32 %v5248_v62, %v5509_v21  ;;  %v3813_v62 = vld [vmem:[%s6226_s5 + $0x358] sm:$0xff] }
 0x847   :  { %v2053_v54 = vmul.f32 %v5513_v29, %v5513_v29  ;;  %v2033_v31 = vmul.f32 %v5517_v22, %v5517_v22  ;;  %v2034_v9 = vmul.f32 %v5521_v10, %v5521_v10  ;;  %v2073_v24 = vmul.f32 %v5534_v59, %v5534_v59  ;;  %v3810_v61 = vld [vmem:[%s6226_s5 + $0x338] sm:$0xff] }
 0x848   :  { %v2035_v11 = vmul.f32 %v5538_v25, %v5538_v25  ;;  %v2054_v13 = vmul.f32 %v5542_v42, %v5542_v42  ;;  %v2055_v46 = vmul.f32 %v5555_v19, %v5555_v19  ;;  %v2074_v5 = vmul.f32 %v5559_v50, %v5559_v50 }
 0x849   :  { %2059 = vrot.lane.b32.xlu2 %v2053_v54, %s3953_s3  ;;  %2039 = vrot.lane.b32.xlu0 %v2033_v31, %s3951_s18  ;;  %v5587_v15 = vsub.f32 %v6261_v53, %v5509_v21  ;;  %v3205_v54 = vmul.f32 %v5478_v34, %v3202_v60  ;;  %v3179_v31 = vmul.f32 %v5475_v55, %v3177_v48 }
 0x84a   :  { %2041 = vrot.lane.b32.xlu1 %v2034_v9, %s3951_s18  ;;  %v3227_v9 = vpop.permute.xlu2 %3226 }
 0x84b   :  { %v2075_v49 = vmul.f32 %v5587_v15, %v5587_v15  ;;  %v3230_v44 = vmul.f32 %v5478_v34, %v3227_v9 }
 0x851   :  { %2079 = vrot.lane.b32.xlu2 %v2073_v24, %s3954_s20  ;;  %2043 = vrot.lane.b32.xlu0 %v2035_v11, %s3951_s18  ;;  %v3147_v24 = vmul.f32 %v5478_v34, %v3144_v32  ;;  %v3204_v11 = vmul.f32 %v5475_v55, %v3202_v60 }
 0x852   :  { %2061 = vrot.lane.b32.xlu1 %v2054_v13, %s3953_s3  ;;  %v3252_v13 = vpop.permute.xlu0 %3251 }
 0x859   :  { %3027 = vperm.xlu2 %3868, %v3802_v51   ;;  %2063 = vrot.lane.b32.xlu0 %v2055_v46, %s3953_s3  ;;  %v3255_v51 = vmul.f32 %v5478_v34, %v3252_v13  ;;  %v3229_v46 = vmul.f32 %v5475_v55, %v3227_v9 }
 0x85a   :  { %2081 = vrot.lane.b32.xlu1 %v2074_v5, %s3954_s20  ;;  %v3254_v5 = vmul.f32 %v5475_v55, %v3252_v13 }
 0x861   :  { %3301 = vperm.xlu0 %3866, %v3813_v62   ;;  %3048 = vrot.lane.b32.xlu2 %v3040_v23, %s3951_s18  ;;  %v3206_v62 = vmul.f32 %v5481_v40, %v3202_v60  ;;  %v3231_v23 = vmul.f32 %v5481_v40, %v3227_v9 }
 0x862   :  { %3276 = vperm.xlu1 %3867, %v3812_v3  }
 0x869   :  { %3002 = vperm.xlu0 %3866, %v3799_v14   ;;  %3127 = vrot.lane.b32.xlu2 %v3121_v18, %s3953_s3  ;;  %v3256_v14 = vmul.f32 %v5481_v40, %v3252_v13 }
 0x86a   :  { %3046 = vrot.lane.b32.xlu1 %v3039_v27, %s3951_s18 }
 0x871   :  { %2083 = vrot.lane.b32.xlu0 %v2075_v49, %s3954_s20  ;;  %3152 = vrot.lane.b32.xlu2 %v3146_v47, %s3951_s18 }
 0x872   :  { %3085 = vperm.xlu1 %3867, %v3806_v28  }
 0x879   :  { %3044 = vrot.lane.b32.xlu0 %v3038_v17, %s3951_s18  ;;  %3093 = vperm.xlu2 %3868, %v3801_v38  }
 0x87a   :  { %3131 = vrot.lane.b32.xlu1 %v3123_v8, %s3953_s3 }
 0x881   :  { %3060 = vperm.xlu0 %3866, %v3800_v58   ;;  %3187 = vrot.lane.b32.xlu2 %v3180_v52, %s3954_s20 }
 0x882   :  { %3156 = vrot.lane.b32.xlu1 %v3148_v37, %s3951_s18 }
 0x889   :  { %3129 = vrot.lane.b32.xlu0 %v3122_v16, %s3953_s3  ;;  %3212 = vrot.lane.b32.xlu2 %v3205_v54, %s3951_s18 }
 0x88a   :  { %3185 = vrot.lane.b32.xlu1 %v3179_v31, %s3954_s20 }
 0x891   :  { %3154 = vrot.lane.b32.xlu0 %v3147_v24, %s3951_s18  ;;  %3237 = vrot.lane.b32.xlu2 %v3230_v44, %s3953_s3 }
 0x892   :  { %3210 = vrot.lane.b32.xlu1 %v3204_v11, %s3951_s18  ;;  %v5670_v11 = vsub.f32 %v5403_v39, %v5509_v21 }
 0x894   :  { %v2031_v39 = vmul.f32 %v5670_v11, %v5670_v11 }
 0x899   :  { %3168 = vperm.xlu0 %3866, %v3810_v61   ;;  %3262 = vrot.lane.b32.xlu2 %v3255_v51, %s3954_s20  ;;  %v5638_v3 = vpop.xlane.xlu1 %2757  ;;  %v3798_v61 = vld [vmem:[%s6226_s5 + $0x240] sm:$0xff] }
 0x89a   :  { %3235 = vrot.lane.b32.xlu1 %v3229_v46, %s3953_s3  ;;  %v5681_v46 = vsub.f32 %v5401_v0, %v5509_v21 }
 0x8a1   :  { %3189 = vrot.lane.b32.xlu0 %v3181_v63, %s3954_s20 }
 0x8a2   :  { %3260 = vrot.lane.b32.xlu1 %v3254_v5, %s3954_s20 }
 0x8a3   :  { %v2060_v1 = vpop.permute.xlu2 %2059 }
 0x8a9   :  { %3214 = vrot.lane.b32.xlu0 %v3206_v62, %s3951_s18 }
 0x8ab   :  { %v2080_v53 = vpop.permute.xlu2 %2079 }
 0x8b1   :  { %3239 = vrot.lane.b32.xlu0 %v3231_v23, %s3953_s3  ;;  %v2030_v23 = vmul.f32 %v5681_v46, %v5681_v46 }
 0x8b3   :  { %v5642_v49 = vpop.permute.xlu2 %3027 }
 0x8b9   :  { %3264 = vrot.lane.b32.xlu0 %v3256_v14, %s3954_s20  ;;  %v5693_v14 = vsub.f32 %v5394_v45, %v5509_v21 }
 0x8bb   :  { %v2040_v18 = vpop.permute.xlu0 %2039  ;;  %v5644_v17 = vpop.permute.xlu2 %3048  ;;  %v2032_v45 = vmul.f32 %v5693_v14, %v5693_v14 }
 0x8bc   :  { %v2042_v27 = vpop.permute.xlu1 %2041 }
 0x8bd   :  { %v2045_v5 = vsel %vm119_vm0, %v2040_v18, %v2042_v27 }
 0x8c3   :  { %v2044_v32 = vpop.permute.xlu0 %2043  ;;  %v5656_v16 = vpop.permute.xlu2 %3127 }
 0x8c4   :  { %v2062_v47 = vpop.permute.xlu1 %2061  ;;  %v2046_v63 = vsel %vm119_vm0, %v2042_v27, %v2044_v32 }
 0x8c5   :  { %v2051_v0 = vadd.f32 %v2046_v63, %v2031_v39 }
 0x8cb   :  { %v2064_v28 = vpop.permute.xlu0 %2063  ;;  %v5677_v51 = vpop.permute.xlu2 %3152 }
 0x8cc   :  { %v2082_v38 = vpop.permute.xlu1 %2081  ;;  %v2066_v62 = vsel %vm171_vm2, %v2062_v47, %v2064_v28 }
 0x8cd   :  { %v2085_v18 = vsel %vm197_vm3, %v2080_v53, %v2082_v38 }
 0x8d3   :  { %v5646_v8 = vpop.permute.xlu0 %3301 }
 0x8d4   :  { %v3277_v48 = vpop.permute.xlu1 %3276  ;;  %v3306_v31 = vmul.f32 %v5481_v40, %v5646_v8  ;;  %v3304_v9 = vmul.f32 %v5475_v55, %v5646_v8 }
 0x8d5   :  { %v3279_v58 = vmul.f32 %v5475_v55, %v3277_v48  ;;  %v3280_v52 = vmul.f32 %v5478_v34, %v3277_v48  ;;  %v3281_v37 = vmul.f32 %v5481_v40, %v3277_v48 }
 0x8d7   :  { %3289 = vrot.lane.b32.xlu0 %v3281_v37, %s3953_s3  ;;  %3287 = vrot.lane.b32.xlu2 %v3280_v52, %s3953_s3 }
 0x8d8   :  { %3285 = vrot.lane.b32.xlu1 %v3279_v58, %s3953_s3  ;;  %v2065_v58 = vsel %vm171_vm2, %v2060_v1, %v2062_v47  ;;  %v2052_v1 = vadd.f32 %v2044_v32, %v2032_v45 }
 0x8da   :  { %v2072_v63 = vadd.f32 %v2064_v28, %v2052_v1 }
 0x8db   :  { %v5654_v60 = vpop.permute.xlu0 %3002 }
 0x8dc   :  { %v5658_v54 = vpop.permute.xlu1 %3046  ;;  %v3006_v13 = vmul.f32 %v5478_v34, %v5654_v60  ;;  %v3007_v27 = vmul.f32 %v5481_v40, %v5654_v60 }
 0x8df   :  { %3314 = vrot.lane.b32.xlu0 %v3306_v31, %s3954_s20  ;;  %v2050_v31 = vadd.f32 %v2045_v5, %v2030_v23 }
 0x8e0   :  { %3310 = vrot.lane.b32.xlu1 %v3304_v9, %s3954_s20  ;;  %v2071_v9 = vadd.f32 %v2066_v62, %v2051_v0 }
 0x8e3   :  { %v2084_v44 = vpop.permute.xlu0 %2083 }
 0x8e4   :  { %v5666_v24 = vpop.permute.xlu1 %3085  ;;  %v2086_v52 = vsel %vm197_vm3, %v2082_v38, %v2084_v44  ;;  %v2092_v0 = vadd.f32 %v2084_v44, %v2072_v63 }
 0x8e5   :  { %v2091_v21 = vadd.f32 %v2086_v52, %v2071_v9 }
 0x8e7   :  { %3013 = vrot.lane.b32.xlu0 %v3006_v13, %s3951_s18  ;;  %v2070_v13 = vadd.f32 %v2065_v58, %v2050_v31  ;;  %v2094_v39 = vmul.f32 %v2091_v21, %v6257_v4  ;;  %v2095_v58 = vmul.f32 %v2092_v0, %v6255_v43 }
 0x8e8   :  { %2994 = vperm.xlu1 %3867, %v3798_v61   ;;  %v5704_v61 = vpop.permute.xlu2 %3093 }
 0x8e9   :  { %v2090_v47 = vadd.f32 %v2085_v18, %v2070_v13  ;;  %v2097_v32 = vsel %vm350_vm8, %v2094_v39, 0.0  ;;  %v3097_v18 = vmul.f32 %v5478_v34, %v5704_v61  ;;  %v2099_v44 = vsel %vm354_vm9, %v2095_v58, 0.0 }
 0x8ea   :  { %v3098_v13 = vmul.f32 %v5481_v40, %v5704_v61 }
 0x8eb   :  { %v5695_v48 = vpop.permute.xlu0 %3044  ;;  %v2093_v23 = vmul.f32 %v2090_v47, %v6256_v36 }
 0x8ec   :  { %v3132_v37 = vpop.permute.xlu1 %3131 }
 0x8ed   :  { %v2096_v28 = vsel %vm350_vm8, %v2093_v23, 0.0  ;;  %v3051_v23 = vsel %vm119_vm0, %v5658_v54, %v5644_v17 }
 0x8ee   :  { %v2098_v31 = vadd.f32 %v2097_v32, %v2096_v28  ;;  %v3031_v32 = vmul.f32 %v5478_v34, %v5642_v49 }
 0x8f0   :  { %3015 = vrot.lane.b32.xlu1 %v3007_v27, %s3951_s18  ;;  %v5722_v52 = vpop.permute.xlu2 %3187  ;;  %v2100_v45 = vadd.f32 %v2099_v44, %v2098_v31  ;;  %v3056_v31 = vadd.f32 %v3051_v23, %v3031_v32 }
 0x8f3   :  { %v5708_v5 = vpop.permute.xlu0 %3060 }
 0x8f4   :  { %v5710_v53 = vpop.permute.xlu1 %3156  ;;  %v3064_v38 = vmul.f32 %v5478_v34, %v5708_v5  ;;  %v3065_v62 = vmul.f32 %v5481_v40, %v5708_v5 }
 0x8f6   :  { %3071 = vrot.lane.b32.xlu0 %v3064_v38, %s3953_s3 }
 0x8f8   :  { %3073 = vrot.lane.b32.xlu1 %v3065_v62, %s3953_s3  ;;  %v3213_v1 = vpop.permute.xlu2 %3212  ;;  %v3032_v62 = vmul.f32 %v5481_v40, %v5642_v49 }
 0x8fa   :  { %v3057_v28 = vadd.f32 %v5644_v17, %v3032_v62 }
 0x8fb   :  { %v3130_v9 = vpop.permute.xlu0 %3129 }
 0x8fc   :  { %v3186_v27 = vpop.permute.xlu1 %3185  ;;  %v3134_v58 = vsel %vm171_vm2, %v3130_v9, %v3132_v37 }
 0x8fd   :  { %v3139_v44 = vadd.f32 %v3134_v58, %v3056_v31 }
 0x8fe   :  { %3104 = vrot.lane.b32.xlu0 %v3097_v18, %s3954_s20  ;;  %v3140_v18 = vadd.f32 %v3132_v37, %v3057_v28 }
 0x900   :  { %3106 = vrot.lane.b32.xlu1 %v3098_v13, %s3954_s20  ;;  %2101 = vadd.xlane.f32.xlu2 %v2100_v45 }
 0x903   :  { %v3155_v21 = vpop.permute.xlu0 %3154 }
 0x904   :  { %v3211_v47 = vpop.permute.xlu1 %3210 }
 0x905   :  { %v3216_v63 = vsel %vm119_vm0, %v3211_v47, %v3213_v1 }
 0x90b   :  { %v3169_v39 = vpop.permute.xlu0 %3168 }
 0x90c   :  { %v3171_v38 = vmul.f32 %v5475_v55, %v3169_v39  ;;  %v3173_v37 = vmul.f32 %v5481_v40, %v3169_v39  ;;  %v3172_v28 = vmul.f32 %v5478_v34, %v3169_v39 }
 0x90e   :  { %v5738_v0 = vadd.f32 %v3216_v63, %v3171_v38  ;;  %v3305_v63 = vmul.f32 %v5478_v34, %v5646_v8 }
 0x913   :  { %v3190_v13 = vpop.permute.xlu0 %3189 }
 0x914   :  { %v3192_v45 = vsel %vm197_vm3, %v5722_v52, %v3190_v13  ;;  %v3198_v47 = vadd.f32 %v3190_v13, %v3140_v18 }
 0x915   :  { %v3197_v4 = vadd.f32 %v3192_v45, %v3139_v44 }
 0x916   :  { %v3359_v38 = vrot.slane %v3198_v47, 2  ;;  %v3368_v12 = vrot.slane %v3198_v47, 4  ;;  %v3377_v32 = vrot.slane %v3198_v47, 6 }
 0x917   :  { %v3358_v36 = vrot.slane %v3197_v4, 2  ;;  %v3367_v62 = vrot.slane %v3197_v4, 4  ;;  %v3376_v18 = vrot.slane %v3197_v4, 6 }
 0x918   :  { %v3365_v43 = vadd.f32 %v3359_v38, %v3198_v47  ;;  %3312 = vrot.lane.b32.xlu2 %v3305_v63, %s3954_s20  ;;  %v3063_v38 = vmul.f32 %v5475_v55, %v5708_v5 }
 0x919   :  { %v3364_v17 = vadd.f32 %v3358_v36, %v3197_v4  ;;  %v3050_v36 = vsel %vm119_vm0, %v5695_v48, %v5658_v54  ;;  %v3005_v4 = vmul.f32 %v5475_v55, %v5654_v60  ;;  %v3238_v54 = vpop.permute.xlu2 %3237  ;;  %v3090_v60 = vmul.f32 %v5481_v40, %v5666_v24 }
 0x91a   :  { %v3374_v23 = vadd.f32 %v3368_v12, %v3365_v43  ;;  %v3030_v43 = vmul.f32 %v5475_v55, %v5642_v49  ;;  %v3236_v12 = vpop.permute.xlu1 %3235  ;;  %v3191_v49 = vsel %vm197_vm3, %v3186_v27, %v5722_v52 }
 0x91b   :  { %v3215_v58 = vpop.permute.xlu0 %3214  ;;  %v3373_v31 = vadd.f32 %v3367_v62, %v3364_v17  ;;  %v3158_v62 = vsel %vm119_vm0, %v5677_v51, %v3155_v21  ;;  %v3165_v52 = vadd.f32 %v5710_v53, %v3090_v60 }
 0x91c   :  { %v3217_v44 = vsel %vm119_vm0, %v3213_v1, %v3215_v58  ;;  %v5752_v8 = vadd.f32 %v3215_v58, %v3173_v37  ;;  %v5754_v13 = vadd.f32 %v3377_v32, %v3374_v23  ;;  %v3133_v1 = vsel %vm171_vm2, %v5656_v16, %v3130_v9 }
 0x91d   :  { %v5759_v45 = vadd.f32 %v3217_v44, %v3172_v28  ;;  %v5761_v63 = vadd.f32 %v3376_v18, %v3373_v31  ;;  %v3055_v48 = vadd.f32 %v3050_v36, %v3030_v43  ;;  %v3159_v16 = vsel %vm119_vm0, %v3155_v21, %v5710_v53 }
 0x91e   :  { %3451 = vrot.lane.b32.xlu1 %v5754_v13, %s3951_s18  ;;  %v3089_v9 = vmul.f32 %v5478_v34, %v5666_v24  ;;  %v3088_v37 = vmul.f32 %v5475_v55, %v5666_v24  ;;  %v3241_v23 = vsel %vm171_vm2, %v3236_v12, %v3238_v54  ;;  %v3096_v36 = vmul.f32 %v5475_v55, %v5704_v61 }
 0x91f   :  { %3449 = vrot.lane.b32.xlu0 %v5761_v63, %s3951_s18  ;;  %v3138_v39 = vadd.f32 %v3133_v1, %v3055_v48 }
 0x920   :  { %3011 = vrot.lane.b32.xlu2 %v3005_v4, %s3951_s18  ;;  %v3164_v5 = vadd.f32 %v3159_v16, %v3089_v9  ;;  %v3163_v58 = vadd.f32 %v3158_v62, %v3088_v37 }
 0x921   :  { %v3196_v17 = vadd.f32 %v3191_v49, %v3138_v39  ;;  %v3263_v32 = vpop.permute.xlu2 %3262 }
 0x922   :  { %v3261_v27 = vpop.permute.xlu1 %3260  ;;  %v3246_v18 = vadd.f32 %v3241_v23, %v3163_v58 }
 0x923   :  { %v3240_v47 = vpop.permute.xlu0 %3239  ;;  %v3357_v28 = vrot.slane %v3196_v17, 2  ;;  %v3266_v31 = vsel %vm197_vm3, %v3261_v27, %v3263_v32  ;;  %v3366_v39 = vrot.slane %v3196_v17, 4  ;;  %v3375_v55 = vrot.slane %v3196_v17, 6 }
 0x924   :  { %v3242_v40 = vsel %vm171_vm2, %v3238_v54, %v3240_v47  ;;  %v3248_v34 = vadd.f32 %v3240_v47, %v3165_v52  ;;  %v3271_v43 = vadd.f32 %v3266_v31, %v3246_v18 }
 0x925   :  { %v3247_v51 = vadd.f32 %v3242_v40, %v3164_v5  ;;  %v3363_v1 = vadd.f32 %v3357_v28, %v3196_v17 }
 0x926   :  { %v3387_v60 = vrot.slane %v3271_v43, 2  ;;  %v3396_v5 = vrot.slane %v3271_v43, 4 }
 0x927   :  { %v3372_v9 = vadd.f32 %v3366_v39, %v3363_v1 }
 0x928   :  { %3069 = vrot.lane.b32.xlu2 %v3063_v38, %s3953_s3  ;;  %v3393_v27 = vadd.f32 %v3387_v60, %v3271_v43 }
 0x929   :  { %v5803_v40 = vadd.f32 %v3375_v55, %v3372_v9 }
 0x92a   :  { %v3402_v23 = vadd.f32 %v3396_v5, %v3393_v27 }
 0x92b   :  { %v3265_v21 = vpop.permute.xlu0 %3264 }
 0x92c   :  { %v3267_v24 = vsel %vm197_vm3, %v3263_v32, %v3265_v21  ;;  %v3273_v53 = vadd.f32 %v3265_v21, %v3248_v34  ;;  %v3405_v32 = vrot.slane %v3271_v43, 6 }
 0x92d   :  { %v3272_v44 = vadd.f32 %v3267_v24, %v3247_v51  ;;  %v2759_v24 = vrot.slane %v5638_v3, 4 }
 0x92e   :  { %v3389_v4 = vrot.slane %v3273_v53, 2  ;;  %v3398_v48 = vrot.slane %v3273_v53, 4  ;;  %v3407_v16 = vrot.slane %v3273_v53, 6  ;;  %v5809_v28 = vadd.f32 %v3405_v32, %v3402_v23 }
 0x92f   :  { %v3388_v12 = vrot.slane %v3272_v44, 2  ;;  %v3397_v49 = vrot.slane %v3272_v44, 4  ;;  %v3406_v37 = vrot.slane %v3272_v44, 6 }
 0x930   :  { %v3395_v54 = vadd.f32 %v3389_v4, %v3273_v53  ;;  %3102 = vrot.lane.b32.xlu2 %v3096_v36, %s3954_s20  ;;  %v2760_v53 = vadd.f32 %v2759_v24, %v5638_v3 }
 0x931   :  { %v3394_v47 = vadd.f32 %v3388_v12, %v3272_v44  ;;  %v3288_v17 = vpop.permute.xlu2 %3287 }
 0x932   :  { %v3404_v38 = vadd.f32 %v3398_v48, %v3395_v54  ;;  %v2761_v44 = vrot.slane %v2760_v53, 2 }
 0x933   :  { %v3403_v62 = vadd.f32 %v3397_v49, %v3394_v47 }
 0x934   :  { %v5797_v52 = vadd.f32 %v3407_v16, %v3404_v38  ;;  %v2762_v1 = vadd.f32 %v2761_v44, %v2760_v53 }
 0x935   :  { %v5799_v61 = vadd.f32 %v3406_v37, %v3403_v62 }
 0x936   :  { %3468 = vrot.lane.b32.xlu1 %v5797_v52, %s3953_s3  ;;  %v2763_v48 = vrot.slane %v2762_v1, 1 }
 0x937   :  { %3466 = vrot.lane.b32.xlu0 %v5799_v61, %s3953_s3 }
 0x938   :  { %3447 = vrot.lane.b32.xlu2 %v5803_v40, %s3951_s18  ;;  %v2764_v49 = vadd.f32 %v2763_v48, %v2762_v1 }
 0x940   :  { %3464 = vrot.lane.b32.xlu2 %v5809_v28, %s3953_s3 }
 0x949   :  { %v3290_v58 = vpop.permute.xlu0 %3289 }
 0x94a   :  { %v3286_v34 = vpop.permute.xlu1 %3285  ;;  %v3292_v31 = vsel %vm171_vm2, %v3288_v17, %v3290_v58  ;;  %v3298_v62 = vadd.f32 %v3290_v58, %v5752_v8 }
 0x94b   :  { %v3291_v51 = vsel %vm171_vm2, %v3286_v34, %v3288_v17  ;;  %v3297_v21 = vadd.f32 %v3292_v31, %v5759_v45 }
 0x94c   :  { %v3296_v18 = vadd.f32 %v3291_v51, %v5738_v0 }
 0x951   :  { %v3315_v16 = vpop.permute.xlu0 %3314 }
 0x952   :  { %v3311_v3 = vpop.permute.xlu1 %3310  ;;  %v3323_v17 = vadd.f32 %v3315_v16, %v3298_v62  ;;  %v2124_v62 = vstv %s5857_s12 }
 0x973   :  { %v2102_v36 = vpop.xlane.xlu2 %2101 }
 0x974   :  { %v2103_v43 = vrot.slane %v2102_v36, 4 }
 0x976   :  { %v2104_v4 = vadd.f32 %v2103_v43, %v2102_v36 }
 0x978   :  { %v2105_v12 = vrot.slane %v2104_v4, 2 }
 0x97a   :  { %v2106_v54 = vadd.f32 %v2105_v12, %v2104_v4 }
 0x97b   :  { %v3313_v45 = vpop.permute.xlu2 %3312 }
 0x97c   :  { %v2107_v39 = vrot.slane %v2106_v54, 1  ;;  %v3316_v37 = vsel %vm197_vm3, %v3311_v3, %v3313_v45  ;;  %v3317_v27 = vsel %vm197_vm3, %v3313_v45, %v3315_v16 }
 0x97d   :  { %v3321_v34 = vadd.f32 %v3316_v37, %v3296_v18  ;;  %v3322_v31 = vadd.f32 %v3317_v27, %v3297_v21  ;;  %v3437_v37 = vrot.slane %v3323_v17, 6 }
 0x97e   :  { %v2108_v47 = vadd.f32 %v2107_v39, %v2106_v54 }
 0x97f   :  { %v3417_v53 = vrot.slane %v3321_v34, 2  ;;  %v3418_v44 = vrot.slane %v3322_v31, 2  ;;  %v3427_v39 = vrot.slane %v3322_v31, 4  ;;  %v3435_v27 = vrot.slane %v3321_v34, 6 }
 0x980   :  { %3841 = vpush %v2108_v47 }
 0x981   :  { %3843 = vpush %v2764_v49  ;;  %v3423_v1 = vadd.f32 %v3417_v53, %v3321_v34  ;;  %v3424_v12 = vadd.f32 %v3418_v44, %v3322_v31 }
 0x983   :  { %v3433_v3 = vadd.f32 %v3427_v39, %v3424_v12 }
 0x9b1   :  { %s3842_s5 = spop %3841 }
 0x9b2   :  { %v2110_v0 = vstv %s3842_s5  ;;  %s3844_s11 = spop %3843 }
 0x9b3   :  { %v2111_v60 = vmul.f32 0.00048828125, %v2110_v0  ;;  %v2766_v38 = vstv %s3844_s11 }
 0x9b4   :  { %v5819_v9 = vmul.f32 0.00048828125, %v2766_v38 }
 0x9b5   :  { %v2112_v55 = vadd.f32 1e-05, %v2111_v60 }
 0x9b6   :  { %v5826_v5 = vsub.f32 %v5324_v35, %v5819_v9  ;;  %v5830_v23 = vsub.f32 %v5337_v2, %v5819_v9  ;;  %v5834_v32 = vsub.f32 %v5330_v57, %v5819_v9  ;;  %v3419_v2 = vrot.slane %v3323_v17, 2 }
 0x9b7   :  { %3877 = vrsqrt.f32 %v2112_v55  ;;  %v5847_v57 = vsub.f32 %v5361_v56, %v5819_v9  ;;  %v5851_v51 = vsub.f32 %v5347_v41, %v5819_v9  ;;  %v5855_v21 = vsub.f32 %v5339_v30, %v5819_v9 }
 0x9b8   :  { %v2783_v8 = vmul.f32 %v5826_v5, %v5826_v5  ;;  %v2785_v58 = vmul.f32 %v5830_v23, %v5830_v23  ;;  %v2784_v35 = vmul.f32 %v5834_v32, %v5834_v32  ;;  %v3425_v36 = vadd.f32 %v3419_v2, %v3323_v17 }
 0x9b9   :  { %v2803_v56 = vmul.f32 %v5847_v57, %v5847_v57  ;;  %v2805_v4 = vmul.f32 %v5851_v51, %v5851_v51  ;;  %v3428_v41 = vrot.slane %v3323_v17, 4  ;;  %v2804_v54 = vmul.f32 %v5855_v21, %v5855_v21 }
 0x9ba   :  { %2789 = vrot.lane.b32.xlu2 %v2783_v8, %s3951_s18  ;;  %2793 = vrot.lane.b32.xlu1 %v2785_v58, %s3951_s18  ;;  %v3426_v30 = vrot.slane %v3321_v34, 4  ;;  %v5870_v45 = vsub.f32 %v5440_v7, %v5819_v9  ;;  %v5874_v0 = vsub.f32 %v5444_v33, %v5819_v9  ;;  %v5878_v60 = vsub.f32 %v5454_v26, %v5819_v9 }
 0x9bb   :  { %2791 = vrot.lane.b32.xlu0 %v2784_v35, %s3951_s18  ;;  %v3434_v47 = vadd.f32 %v3428_v41, %v3425_v36  ;;  %vm2119_vm11 = vweird.f32 %v2112_v55  ;;  %v3436_v8 = vrot.slane %v3322_v31, 6  ;;  %v2130_v17 = vstv %s2129_s13 }
 0x9bc   :  { %v3432_v38 = vadd.f32 %v3426_v30, %v3423_v1  ;;  %v2823_v7 = vmul.f32 %v5870_v45, %v5870_v45  ;;  %v2825_v33 = vmul.f32 %v5874_v0, %v5874_v0  ;;  %v2824_v2 = vmul.f32 %v5878_v60, %v5878_v60 }
 0x9bd   :  { %v3878_v24 = vpop.eup %3877  ;;  %v5885_v35 = vadd.f32 %v3437_v37, %v3434_v47 }
 0x9be   :  { %v2114_v18 = vmul.f32 %v3878_v24, %v2112_v55  ;;  %vm2120_vm1 = vweird.f32 %v3878_v24  ;;  %v5889_v53 = vadd.f32 %v3435_v27, %v3432_v38  ;;  %v5891_v55 = vadd.f32 %v3436_v8, %v3433_v3 }
 0x9bf   :  { %vm2121_vm12 = vmor %vm2119_vm11, %vm2120_vm1  ;;  %6262 = vst [vmem:[#allocation16_spill] sm:$0xff] %v5885_v35 }
 0x9c0   :  { %v2115_v43 = vmul.f32 %v3878_v24, %v2114_v18 }
 0x9c2   :  { %v2116_v48 = vmul.f32 0.5, %v2115_v43  ;;  %2809 = vrot.lane.b32.xlu2 %v2803_v56, %s3953_s3  ;;  %2813 = vrot.lane.b32.xlu1 %v2805_v4, %s3953_s3 }
 0x9c3   :  { %2811 = vrot.lane.b32.xlu0 %v2804_v54, %s3953_s3 }
 0x9c4   :  { %v2117_v49 = vsub.f32 1.5, %v2116_v48 }
 0x9c6   :  { %v2118_v16 = vmul.f32 %v3878_v24, %v2117_v49 }
 0x9c8   :  { %v2122_v58 = vsel %vm2121_vm12, %v3878_v24, %v2118_v16 }
 0x9c9   :  { %v2125_v26 = vmul.f32 %v2124_v62, %v2122_v58 }
 0x9ca   :  { %2829 = vrot.lane.b32.xlu2 %v2823_v7, %s3954_s20  ;;  %2833 = vrot.lane.b32.xlu1 %v2825_v33, %s3954_s20 }
 0x9cb   :  { %v2126_v34 = vmul.f32 %v2125_v26, %v5681_v46  ;;  %v2127_v31 = vmul.f32 %v2125_v26, %v5670_v11  ;;  %v2128_v24 = vmul.f32 %v2125_v26, %v5693_v14  ;;  %2831 = vrot.lane.b32.xlu0 %v2824_v2, %s3954_s20  ;;  %v2176_v44 = vmul.f32 %v2125_v26, %v5513_v29 }
 0x9cc   :  { %v2177_v18 = vmul.f32 %v2125_v26, %v5542_v42  ;;  %v2178_v36 = vmul.f32 %v2125_v26, %v5555_v19  ;;  %v2151_v43 = vmul.f32 %v2125_v26, %v5517_v22  ;;  %v2152_v56 = vmul.f32 %v2125_v26, %v5521_v10 }
 0x9cd   :  { %v2131_v4 = vadd.f32 %v2130_v17, %v2126_v34  ;;  %v2132_v41 = vadd.f32 %v2130_v17, %v2127_v31  ;;  %v2133_v1 = vadd.f32 %v2130_v17, %v2128_v24  ;;  %v2181_v46 = vadd.f32 %v2176_v44, %v2130_v17 }
 0x9ce   :  { %v2182_v12 = vadd.f32 %v2177_v18, %v2130_v17  ;;  %v2183_v11 = vadd.f32 %v2178_v36, %v2130_v17  ;;  %v2153_v14 = vmul.f32 %v2125_v26, %v5538_v25  ;;  %v2156_v54 = vadd.f32 %v2151_v43, %v2130_v17 }
 0x9cf   :  { %v2134_v48 = vmax.f32 %v2131_v4, 0.0  ;;  %v2135_v30 = vmax.f32 %v2132_v41, 0.0  ;;  %v2136_v29 = vmax.f32 %v2133_v1, 0.0  ;;  %v2184_v39 = vmax.f32 %v2181_v46, 0.0  ;;  %v2995_v46 = vpop.permute.xlu1 %2994 }
 0x9d0   :  { %v2185_v22 = vmax.f32 %v2182_v12, 0.0  ;;  %v2186_v10 = vmax.f32 %v2183_v11, 0.0  ;;  %v2157_v19 = vadd.f32 %v2152_v56, %v2130_v17  ;;  %v2158_v47 = vadd.f32 %v2153_v14, %v2130_v17  ;;  %v3012_v12 = vpop.permute.xlu2 %3011 }
 0x9d1   :  { %v2140_v49 = vrot.slane %v2135_v30, 6  ;;  %v2141_v38 = vrot.slane %v2136_v29, 4  ;;  %v2159_v3 = vmax.f32 %v2156_v54, 0.0  ;;  %v2201_v25 = vmul.f32 %v2125_v26, %v5534_v59  ;;  %v3014_v54 = vpop.permute.xlu0 %3013 }
 0x9d2   :  { %3481 = vrot.lane.b32.xlu2 %v5889_v53, %s3954_s20  ;;  %3485 = vrot.lane.b32.xlu1 %v5885_v35, %s3954_s20  ;;  %v2190_v16 = vrot.slane %v2185_v22, 6  ;;  %v2191_v62 = vrot.slane %v2186_v10, 4  ;;  %v2160_v37 = vmax.f32 %v2157_v19, 0.0  ;;  %v2161_v27 = vmax.f32 %v2158_v47, 0.0 }
 0x9d3   :  { %3483 = vrot.lane.b32.xlu0 %v5891_v55, %s3954_s20  ;;  %v2142_v59 = vsel %vm350_vm8, %v2134_v48, %v2140_v49  ;;  %v2202_v58 = vmul.f32 %v2125_v26, %v5559_v50  ;;  %v2203_v7 = vmul.f32 %v2125_v26, %v5587_v15  ;;  %v2206_v33 = vadd.f32 %v2201_v25, %v2130_v17  ;;  %v3889_v25 = vld [vmem:[#allocation2 + $0x10] sm:$0xff] }
 0x9d4   :  { %v2144_v2 = vsel %vm2143_vm13, %v2142_v59, %v2141_v38  ;;  %v2192_v34 = vsel %vm350_vm8, %v2184_v39, %v2190_v16  ;;  %v2165_v31 = vrot.slane %v2160_v37, 6  ;;  %v2166_v24 = vrot.slane %v2161_v27, 4  ;;  %v3890_v37 = vld [vmem:[#allocation2] sm:$0xff] }
 0x9d5   :  { %v5931_v44 = vsel %vm2143_vm13, %v2192_v34, %v2191_v62  ;;  %v2207_v18 = vadd.f32 %v2202_v58, %v2130_v17  ;;  %v2208_v36 = vadd.f32 %v2203_v7, %v2130_v17  ;;  %2150 = vst.msk [vmem:[%s6229_s8] sm:$0x3f] %vm5919_vm5, %v2144_v2  ;;  %v2209_v56 = vmax.f32 %v2206_v33, 0.0  ;;  %v3891_v58 = vld [vmem:[#allocation2 + $0x8] sm:$0xff] }
 0x9d6   :  { %v2167_v50 = vsel %vm350_vm8, %v2159_v3, %v2165_v31  ;;  %v2999_v16 = vmul.f32 %v3889_v25, %v2995_v46  ;;  %v3017_v62 = vsel %vm119_vm0, %v3012_v12, %v3014_v54  ;;  %v2997_v27 = vmul.f32 %v3890_v37, %v2995_v46 }
 0x9d7   :  { %v5940_v15 = vsel %vm2143_vm13, %v2167_v50, %v2166_v24  ;;  %v2210_v26 = vmax.f32 %v2207_v18, 0.0  ;;  %v2211_v43 = vmax.f32 %v2208_v36, 0.0  ;;  %v3016_v11 = vpop.permute.xlu1 %3015  ;;  %v2998_v7 = vmul.f32 %v3891_v58, %v2995_v46 }
 0x9d8   :  { %v3070_v14 = vpop.permute.xlu2 %3069  ;;  %v3018_v59 = vsel %vm119_vm0, %v3014_v54, %v3016_v11  ;;  %v3024_v33 = vadd.f32 %v3016_v11, %v2999_v16  ;;  %v3022_v31 = vadd.f32 %v3017_v62, %v2997_v27 }
 0x9d9   :  { %v2215_v4 = vrot.slane %v2210_v26, 6  ;;  %v2216_v41 = vrot.slane %v2211_v43, 4  ;;  %v3072_v30 = vpop.permute.xlu0 %3071  ;;  %v3023_v24 = vadd.f32 %v3018_v59, %v2998_v7 }
 0x9da   :  { %v3075_v2 = vsel %vm171_vm2, %v3070_v14, %v3072_v30  ;;  %v5966_v14 = vsub.f32 %v5490_v6, %v5819_v9 }
 0x9db   :  { %v2217_v1 = vsel %vm350_vm8, %v2209_v56, %v2215_v4  ;;  %v3080_v43 = vadd.f32 %v3075_v2, %v3022_v31 }
 0x9dc   :  { %v5944_v17 = vsel %vm2143_vm13, %v2217_v1, %v2216_v41  ;;  %v2782_v37 = vmul.f32 %v5966_v14, %v5966_v14 }
 0x9df   :  { %v3074_v48 = vpop.permute.xlu1 %3073 }
 0x9e0   :  { %v3103_v29 = vpop.permute.xlu2 %3102  ;;  %v3076_v34 = vsel %vm171_vm2, %v3072_v30, %v3074_v48  ;;  %v3082_v18 = vadd.f32 %v3074_v48, %v3024_v33 }
 0x9e1   :  { %v3105_v42 = vpop.permute.xlu0 %3104  ;;  %v3081_v4 = vadd.f32 %v3076_v34, %v3023_v24 }
 0x9e2   :  { %v3108_v36 = vsel %vm197_vm3, %v3103_v29, %v3105_v42  ;;  %v5970_v29 = vsub.f32 %v5492_v20, %v5819_v9 }
 0x9e3   :  { %v3113_v1 = vadd.f32 %v3108_v36, %v3080_v43 }
 0x9e4   :  { %v2780_v20 = vmul.f32 %v5970_v29, %v5970_v29 }
 0x9e5   :  { %v3327_v54 = vrot.slane %v3113_v1, 2  ;;  %v3336_v7 = vrot.slane %v3113_v1, 4 }
 0x9e7   :  { %v3107_v39 = vpop.permute.xlu1 %3106  ;;  %v3333_v62 = vadd.f32 %v3327_v54, %v3113_v1 }
 0x9e8   :  { %v5946_v22 = vpop.permute.xlu2 %3447  ;;  %v3109_v26 = vsel %vm197_vm3, %v3105_v42, %v3107_v39  ;;  %v3115_v41 = vadd.f32 %v3107_v39, %v3082_v18  ;;  %v6267_v42 = vld [vmem:[#allocation17_spill] sm:$0xff] }
 0x9e9   :  { %v5950_v19 = vpop.permute.xlu0 %3449  ;;  %v3114_v12 = vadd.f32 %v3109_v26, %v3081_v4  ;;  %v5974_v25 = vsub.f32 %v6267_v42, %v5819_v9  ;;  %v3342_v18 = vadd.f32 %v3336_v7, %v3333_v62 }
 0x9ea   :  { %v3329_v11 = vrot.slane %v3115_v41, 2  ;;  %v3338_v27 = vrot.slane %v3115_v41, 4 }
 0x9eb   :  { %v3328_v30 = vrot.slane %v3114_v12, 2  ;;  %v2781_v9 = vmul.f32 %v5974_v25, %v5974_v25  ;;  %v3337_v34 = vrot.slane %v3114_v12, 4 }
 0x9ec   :  { %v3335_v16 = vadd.f32 %v3329_v11, %v3115_v41  ;;  %v3345_v11 = vrot.slane %v3113_v1, 6 }
 0x9ed   :  { %v3334_v59 = vadd.f32 %v3328_v30, %v3114_v12 }
 0x9ee   :  { %v3344_v2 = vadd.f32 %v3338_v27, %v3335_v16  ;;  %v3346_v16 = vrot.slane %v3114_v12, 6  ;;  %v6269_v12 = vld [vmem:[#allocation13_spill] sm:$0xff] }
 0x9ef   :  { %v5948_v10 = vpop.permute.xlu1 %3451  ;;  %v3343_v4 = vadd.f32 %v3337_v34, %v3334_v59 }
 0x9f0   :  { %v5952_v47 = vpop.permute.xlu2 %3464  ;;  %v3454_v62 = vsel %vm119_vm0, %v5950_v19, %v5948_v10 }
 0x9f1   :  { %v5956_v38 = vpop.permute.xlu0 %3466  ;;  %v5995_v1 = vadd.f32 %v3346_v16, %v3343_v4 }
 0x9f2   :  { %v3470_v34 = vsel %vm171_vm2, %v5952_v47, %v5956_v38 }
 0x9f7   :  { %v5954_v49 = vpop.permute.xlu1 %3468 }
 0xa14   :  { %v2790_v3 = vpop.permute.xlu2 %2789 }
 0xa1c   :  { %v2810_v46 = vpop.permute.xlu2 %2809 }
 0xa24   :  { %v2830_v36 = vpop.permute.xlu2 %2829 }
 0xa2c   :  { %v2794_v50 = vpop.permute.xlu1 %2793 }
 0xa2d   :  { %v2792_v56 = vpop.permute.xlu0 %2791  ;;  %v2802_v33 = vadd.f32 %v2794_v50, %v2782_v37 }
 0xa2e   :  { %v2795_v6 = vsel %vm119_vm0, %v2790_v3, %v2792_v56  ;;  %v2796_v58 = vsel %vm119_vm0, %v2792_v56, %v2794_v50  ;;  %v3347_v56 = vrot.slane %v3115_v41, 6 }
 0xa2f   :  { %v2800_v26 = vadd.f32 %v2795_v6, %v2780_v20  ;;  %v2801_v3 = vadd.f32 %v2796_v58, %v2781_v9  ;;  %v6268_v6 = vld [vmem:[#allocation15_spill] sm:$0xff]  ;;  %v3459_v9 = vadd.f32 %v3454_v62, %v5995_v1 }
 0xa30   :  { %v5986_v35 = vadd.f32 %v3347_v56, %v3344_v2  ;;  %v3453_v2 = vsel %vm119_vm0, %v5946_v22, %v5950_v19  ;;  %v3482_v19 = vpop.permute.xlu2 %3481 }
 0xa32   :  { %v3460_v59 = vadd.f32 %v5948_v10, %v5986_v35  ;;  %v3471_v10 = vsel %vm171_vm2, %v5956_v38, %v5954_v49 }
 0xa33   :  { %v3476_v22 = vadd.f32 %v3471_v10, %v3459_v9 }
 0xa34   :  { %v2814_v48 = vpop.permute.xlu1 %2813 }
 0xa35   :  { %v2812_v39 = vpop.permute.xlu0 %2811  ;;  %v2822_v43 = vadd.f32 %v2814_v48, %v2802_v33  ;;  %v6270_v33 = vld [vmem:[#allocation14_spill] sm:$0xff] }
 0xa36   :  { %v2815_v31 = vsel %vm171_vm2, %v2810_v46, %v2812_v39  ;;  %v2816_v24 = vsel %vm171_vm2, %v2812_v39, %v2814_v48  ;;  %v5993_v48 = vadd.f32 %v3345_v11, %v3342_v18 }
 0xa37   :  { %v2820_v54 = vadd.f32 %v2815_v31, %v2800_v26  ;;  %v2821_v30 = vadd.f32 %v2816_v24, %v2801_v3  ;;  %v3477_v24 = vadd.f32 %v5954_v49, %v3460_v59 }
 0xa38   :  { %v3458_v31 = vadd.f32 %v3453_v2, %v5993_v48 }
 0xa3c   :  { %v2834_v50 = vpop.permute.xlu1 %2833 }
 0xa3d   :  { %v2842_v42 = vadd.f32 %v2834_v50, %v2822_v43  ;;  %v2832_v37 = vpop.permute.xlu0 %2831  ;;  %v3475_v43 = vadd.f32 %v3470_v34, %v3458_v31 }
 0xa3e   :  { %v2835_v46 = vsel %vm197_vm3, %v2830_v36, %v2832_v37  ;;  %v2836_v39 = vsel %vm197_vm3, %v2832_v37, %v2834_v50 }
 0xa3f   :  { %v2840_v41 = vadd.f32 %v2835_v46, %v2820_v54  ;;  %v2841_v27 = vadd.f32 %v2836_v39, %v2821_v30  ;;  %v2845_v58 = vmul.f32 %v2842_v42, %v6268_v6 }
 0xa41   :  { %v2843_v7 = vmul.f32 %v2840_v41, %v6269_v12  ;;  %v2844_v20 = vmul.f32 %v2841_v27, %v6270_v33  ;;  %v2849_v47 = vsel %vm354_vm9, %v2845_v58, 0.0 }
 0xa43   :  { %v2846_v18 = vsel %vm350_vm8, %v2843_v7, 0.0  ;;  %v2847_v36 = vsel %vm350_vm8, %v2844_v20, 0.0 }
 0xa44   :  { %v3486_v26 = vpop.permute.xlu1 %3485  ;;  %v2848_v3 = vadd.f32 %v2847_v36, %v2846_v18 }
 0xa45   :  { %v3494_v56 = vadd.f32 %v3486_v26, %v3477_v24  ;;  %v3484_v4 = vpop.permute.xlu0 %3483 }
 0xa46   :  { %v3487_v50 = vsel %vm197_vm3, %v3482_v19, %v3484_v4  ;;  %v3488_v38 = vsel %vm197_vm3, %v3484_v4, %v3486_v26  ;;  %v2850_v11 = vadd.f32 %v2849_v47, %v2848_v3 }
 0xa47   :  { %v3492_v54 = vadd.f32 %v3487_v50, %v3475_v43  ;;  %v3493_v49 = vadd.f32 %v3488_v38, %v3476_v22  ;;  %v3497_v30 = vmul.f32 %v3494_v56, %v6268_v6 }
 0xa48   :  { %2851 = vadd.xlane.f32.xlu2 %v2850_v11 }
 0xa49   :  { %v3495_v42 = vmul.f32 %v3492_v54, %v6269_v12  ;;  %v3496_v37 = vmul.f32 %v3493_v49, %v6270_v33  ;;  %v3501_v62 = vsel %vm354_vm9, %v3497_v30, 0.0 }
 0xa4b   :  { %v3498_v16 = vsel %vm350_vm8, %v3495_v42, 0.0  ;;  %v3499_v46 = vsel %vm350_vm8, %v3496_v37, 0.0 }
 0xa4c   :  { %v3500_v39 = vadd.f32 %v3499_v46, %v3498_v16  ;;  %v2874_v16 = vstv %s3789_s4 }
 0xa4e   :  { %v3502_v41 = vadd.f32 %v3501_v62, %v3500_v39 }
 0xa50   :  { %3503 = vadd.xlane.f32.xlu0 %v3502_v41  ;;  %v2880_v41 = vstv %s3790_s22 }
 0xabb   :  { %v2852_v27 = vpop.xlane.xlu2 %2851 }
 0xabc   :  { %v2853_v59 = vrot.slane %v2852_v27, 4 }
 0xabe   :  { %v2854_v58 = vadd.f32 %v2853_v59, %v2852_v27 }
 0xac0   :  { %v2855_v7 = vrot.slane %v2854_v58, 2 }
 0xac2   :  { %v2856_v20 = vadd.f32 %v2855_v7, %v2854_v58 }
 0xac3   :  { %v3504_v9 = vpop.xlane.xlu0 %3503 }
 0xac4   :  { %v3505_v2 = vrot.slane %v3504_v9, 4  ;;  %v2857_v34 = vrot.slane %v2856_v20, 1 }
 0xac6   :  { %v3506_v10 = vadd.f32 %v3505_v2, %v3504_v9  ;;  %v2858_v31 = vadd.f32 %v2857_v34, %v2856_v20 }
 0xac8   :  { %v3507_v24 = vrot.slane %v3506_v10, 2  ;;  %3845 = vpush %v2858_v31 }
 0xaca   :  { %v3508_v18 = vadd.f32 %v3507_v24, %v3506_v10 }
 0xacc   :  { %v3509_v36 = vrot.slane %v3508_v18, 1 }
 0xace   :  { %v3510_v26 = vadd.f32 %v3509_v36, %v3508_v18 }
 0xad0   :  { %3847 = vpush %v3510_v26 }
 0xaf9   :  { %s3846_s16 = spop %3845 }
 0xafa   :  { %v2860_v3 = vstv %s3846_s16 }
 0xafb   :  { %v2861_v43 = vmul.f32 0.00048828125, %v2860_v3 }
 0xafd   :  { %v2862_v22 = vadd.f32 1e-05, %v2861_v43 }
 0xaff   :  { %3879 = vrsqrt.f32 %v2862_v22  ;;  %vm2869_vm7 = vweird.f32 %v2862_v22 }
 0xb01   :  { %s3848_s17 = spop %3847 }
 0xb02   :  { %v3512_v19 = vstv %s3848_s17 }
 0xb03   :  { %v6025_v56 = vmul.f32 0.00048828125, %v3512_v19 }
 0xb05   :  { %v3880_v4 = vpop.eup %3879  ;;  %v6029_v47 = vsub.f32 %v5889_v53, %v6025_v56  ;;  %v6033_v50 = vsub.f32 %v5797_v52, %v6025_v56  ;;  %v6037_v38 = vsub.f32 %v5803_v40, %v6025_v56  ;;  %v6050_v42 = vsub.f32 %v5761_v63, %v6025_v56 }
 0xb06   :  { %v2864_v11 = vmul.f32 %v3880_v4, %v2862_v22  ;;  %vm2870_vm6 = vweird.f32 %v3880_v4  ;;  %v6061_v63 = vsub.f32 %v5754_v13, %v6025_v56  ;;  %v6065_v27 = vsub.f32 %v5809_v28, %v6025_v56 }
 0xb07   :  { %v3569_v54 = vmul.f32 %v6029_v47, %v6029_v47  ;;  %v3551_v49 = vmul.f32 %v6033_v50, %v6033_v50  ;;  %v3529_v53 = vmul.f32 %v6037_v38, %v6037_v38  ;;  %vm2871_vm10 = vmor %vm2869_vm7, %vm2870_vm6  ;;  %v3530_v39 = vmul.f32 %v6050_v42, %v6050_v42 }
 0xb08   :  { %v2865_v30 = vmul.f32 %v3880_v4, %v2864_v11 }
 0xb09   :  { %3575 = vrot.lane.b32.xlu0 %v3569_v54, %s3954_s20  ;;  %3559 = vrot.lane.b32.xlu2 %v3551_v49, %s3953_s3 }
 0xb0a   :  { %v2866_v52 = vmul.f32 0.5, %v2865_v30  ;;  %3535 = vrot.lane.b32.xlu1 %v3529_v53, %s3951_s18 }
 0xb0c   :  { %v2867_v40 = vsub.f32 1.5, %v2866_v52 }
 0xb0e   :  { %v2868_v37 = vmul.f32 %v3880_v4, %v2867_v40 }
 0xb10   :  { %v2872_v46 = vsel %vm2871_vm10, %v3880_v4, %v2868_v37 }
 0xb11   :  { %v2875_v62 = vmul.f32 %v2874_v16, %v2872_v46  ;;  %2194 = vrot.lane.b32.xlu0 %v5931_v44, %s3953_s3  ;;  %2169 = vrot.lane.b32.xlu2 %v5940_v15, %s3951_s18 }
 0xb12   :  { %3537 = vrot.lane.b32.xlu1 %v3530_v39, %s3951_s18 }
 0xb13   :  { %v2876_v59 = vmul.f32 %v2875_v62, %v5970_v29  ;;  %v2877_v58 = vmul.f32 %v2875_v62, %v5974_v25  ;;  %v2878_v44 = vmul.f32 %v2875_v62, %v5966_v14  ;;  %v2897_v7 = vmul.f32 %v2875_v62, %v5826_v5 }
 0xb14   :  { %v2898_v15 = vmul.f32 %v2875_v62, %v5834_v32  ;;  %v2899_v20 = vmul.f32 %v2875_v62, %v5830_v23  ;;  %v2922_v9 = vmul.f32 %v2875_v62, %v5847_v57  ;;  %v2923_v13 = vmul.f32 %v2875_v62, %v5855_v21 }
 0xb15   :  { %v2881_v2 = vadd.f32 %v2880_v41, %v2876_v59  ;;  %v2882_v34 = vadd.f32 %v2880_v41, %v2877_v58  ;;  %v2883_v28 = vadd.f32 %v2880_v41, %v2878_v44  ;;  %v2902_v10 = vadd.f32 %v2897_v7, %v2880_v41 }
 0xb16   :  { %v3531_v29 = vmul.f32 %v6061_v63, %v6061_v63  ;;  %v2903_v25 = vadd.f32 %v2898_v15, %v2880_v41  ;;  %v2904_v31 = vadd.f32 %v2899_v20, %v2880_v41  ;;  %v2924_v14 = vmul.f32 %v2875_v62, %v5851_v51 }
 0xb17   :  { %v2884_v5 = vmax.f32 %v2881_v2, 0.0  ;;  %v2885_v24 = vmax.f32 %v2882_v34, 0.0  ;;  %v2886_v32 = vmax.f32 %v2883_v28, 0.0  ;;  %v2927_v18 = vadd.f32 %v2922_v9, %v2880_v41 }
 0xb18   :  { %v2906_v23 = vmax.f32 %v2903_v25, 0.0  ;;  %v2907_v36 = vmax.f32 %v2904_v31, 0.0  ;;  %v2928_v57 = vadd.f32 %v2923_v13, %v2880_v41  ;;  %v2929_v26 = vadd.f32 %v2924_v14, %v2880_v41 }
 0xb19   :  { %v2890_v21 = vrot.slane %v2885_v24, 6  ;;  %v2891_v3 = vrot.slane %v2886_v32, 4  ;;  %2219 = vrot.lane.b32.xlu2 %v5944_v17, %s3954_s20  ;;  %v2905_v43 = vmax.f32 %v2902_v10, 0.0  ;;  %v2947_v22 = vmul.f32 %v2875_v62, %v5870_v45 }
 0xb1a   :  { %3539 = vrot.lane.b32.xlu1 %v3531_v29, %s3951_s18  ;;  %v2911_v19 = vrot.slane %v2906_v23, 6  ;;  %v2912_v51 = vrot.slane %v2907_v36, 4  ;;  %v2931_v4 = vmax.f32 %v2928_v57, 0.0  ;;  %v2932_v11 = vmax.f32 %v2929_v26, 0.0 }
 0xb1b   :  { %v2892_v54 = vsel %vm350_vm8, %v2884_v5, %v2890_v21  ;;  %v2930_v49 = vmax.f32 %v2927_v18, 0.0  ;;  %v2948_v53 = vmul.f32 %v2875_v62, %v5878_v60  ;;  %v2949_v30 = vmul.f32 %v2875_v62, %v5874_v0 }
 0xb1c   :  { %v2893_v52 = vsel %vm2143_vm13, %v2892_v54, %v2891_v3  ;;  %v2913_v17 = vsel %vm350_vm8, %v2905_v43, %v2911_v19  ;;  %v2936_v40 = vrot.slane %v2931_v4, 6  ;;  %v2937_v37 = vrot.slane %v2932_v11, 4 }
 0xb1d   :  { %v2914_v45 = vsel %vm2143_vm13, %v2913_v17, %v2912_v51  ;;  %v2952_v16 = vadd.f32 %v2947_v22, %v2880_v41  ;;  %v2953_v46 = vadd.f32 %v2948_v53, %v2880_v41  ;;  %v2954_v39 = vadd.f32 %v2949_v30, %v2880_v41  ;;  %3791 = vst.msk [vmem:[%s6229_s8 + $0x18] sm:$0x3f] %vm5919_vm5, %v2893_v52 }
 0xb1e   :  { %2915 = vrot.lane.b32.xlu0 %v2914_v45, %s3951_s18  ;;  %v2938_v0 = vsel %vm350_vm8, %v2930_v49, %v2936_v40  ;;  %v3549_v58 = vmul.f32 %v6065_v27, %v6065_v27  ;;  %v6103_v20 = vsub.f32 %v5799_v61, %v6025_v56  ;;  %v6112_v2 = vsub.f32 %v5891_v55, %v6025_v56  ;;  %v6271_v61 = vld [vmem:[#allocation16_spill] sm:$0xff] }
 0xb1f   :  { %v2956_v60 = vmax.f32 %v2953_v46, 0.0  ;;  %v2957_v62 = vmax.f32 %v2954_v39, 0.0  ;;  %v2939_v59 = vsel %vm2143_vm13, %v2938_v0, %v2937_v37  ;;  %v2955_v41 = vmax.f32 %v2952_v16, 0.0 }
 0xb20   :  { %v3550_v13 = vmul.f32 %v6103_v20, %v6103_v20  ;;  %v3570_v34 = vmul.f32 %v6112_v2, %v6112_v2  ;;  %v6119_v28 = vsub.f32 %v6271_v61, %v6025_v56  ;;  %v3514_v52 = vsub.f32 %v5993_v48, %v6025_v56 }
 0xb21   :  { %2940 = vrot.lane.b32.xlu2 %v2939_v59, %s3953_s3  ;;  %v2961_v44 = vrot.slane %v2956_v60, 6  ;;  %v2962_v7 = vrot.slane %v2957_v62, 4  ;;  %v3516_v17 = vsub.f32 %v5986_v35, %v6025_v56  ;;  %v3515_v45 = vsub.f32 %v5995_v1, %v6025_v56 }
 0xb22   :  { %3555 = vrot.lane.b32.xlu1 %v3549_v58, %s3953_s3  ;;  %v3571_v10 = vmul.f32 %v6119_v28, %v6119_v28  ;;  %v3526_v37 = vmul.f32 %v3514_v52, %v3514_v52 }
 0xb23   :  { %v2963_v15 = vsel %vm350_vm8, %v2955_v41, %v2961_v44  ;;  %v3528_v46 = vmul.f32 %v3516_v17, %v3516_v17  ;;  %v3527_v48 = vmul.f32 %v3515_v45, %v3515_v45 }
 0xb24   :  { %v2964_v9 = vsel %vm2143_vm13, %v2963_v15, %v2962_v7 }
 0xb26   :  { %2965 = vrot.lane.b32.xlu0 %v2964_v9, %s3954_s20 }
 0xb2a   :  { %3557 = vrot.lane.b32.xlu1 %v3550_v13, %s3953_s3 }
 0xb32   :  { %3577 = vrot.lane.b32.xlu1 %v3570_v34, %s3954_s20 }
 0xb3a   :  { %3579 = vrot.lane.b32.xlu1 %v3571_v10, %s3954_s20 }
 0xb63   :  { %v3560_v29 = vpop.permute.xlu2 %3559 }
 0xb6b   :  { %v2170_v25 = vpop.permute.xlu2 %2169 }
 0xb6c   :  { %v2171_v31 = vrot.slane %v2170_v25, 2 }
 0xb6e   :  { %v2172_v55 = vsel %vm119_vm0, %v2170_v25, %v2171_v31 }
 0xb6f   :  { %3770 = vst.msk [vmem:[%s6229_s8 + $0x6] sm:$0x3f] %vm5919_vm5, %v2172_v55 }
 0xb73   :  { %v2220_v14 = vpop.permute.xlu2 %2219 }
 0xb74   :  { %v2221_v5 = vrot.slane %v2220_v14, 2 }
 0xb76   :  { %v2222_v24 = vsel %vm197_vm3, %v2220_v14, %v2221_v5 }
 0xb77   :  { %3772 = vst.msk [vmem:[%s6229_s8 + $0x12] sm:$0x3f] %vm5919_vm5, %v2222_v24 }
 0xb7b   :  { %v3576_v32 = vpop.permute.xlu0 %3575  ;;  %v2941_v18 = vpop.permute.xlu2 %2940 }
 0xb7c   :  { %v2942_v23 = vrot.slane %v2941_v18, 2  ;;  %v3536_v36 = vpop.permute.xlu1 %3535 }
 0xb7e   :  { %v2943_v57 = vsel %vm171_vm2, %v2941_v18, %v2942_v23 }
 0xb7f   :  { %3795 = vst.msk [vmem:[%s6229_s8 + $0x24] sm:$0x3f] %vm5919_vm5, %v2943_v57 }
 0xb83   :  { %v2195_v26 = vpop.permute.xlu0 %2194 }
 0xb84   :  { %v2196_v21 = vrot.slane %v2195_v26, 2  ;;  %v3538_v3 = vpop.permute.xlu1 %3537 }
 0xb85   :  { %v3541_v40 = vsel %vm119_vm0, %v3536_v36, %v3538_v3 }
 0xb86   :  { %v2197_v43 = vsel %vm171_vm2, %v2195_v26, %v2196_v21  ;;  %v3546_v0 = vadd.f32 %v3541_v40, %v3526_v37 }
 0xb87   :  { %3771 = vst.msk [vmem:[%s6229_s8 + $0xc] sm:$0x3f] %vm5919_vm5, %v2197_v43 }
 0xb8c   :  { %v3540_v22 = vpop.permute.xlu1 %3539 }
 0xb8d   :  { %v3542_v60 = vsel %vm119_vm0, %v3538_v3, %v3540_v22  ;;  %v3548_v62 = vadd.f32 %v3540_v22, %v3528_v46 }
 0xb8e   :  { %v3547_v41 = vadd.f32 %v3542_v60, %v3527_v48 }
 0xb8f   :  { %v3568_v7 = vadd.f32 %v3560_v29, %v3548_v62 }
 0xb90   :  { %v2916_v19 = vpop.permute.xlu0 %2915 }
 0xb91   :  { %v2917_v51 = vrot.slane %v2916_v19, 2 }
 0xb93   :  { %v2918_v4 = vsel %vm119_vm0, %v2916_v19, %v2917_v51  ;;  %v3620_v51 = vstv %s3814_s24 }
 0xb94   :  { %3793 = vst.msk [vmem:[%s6229_s8 + $0x1e] sm:$0x3f] %vm5919_vm5, %v2918_v4  ;;  %v3556_v11 = vpop.permute.xlu1 %3555 }
 0xb98   :  { %v2966_v54 = vpop.permute.xlu0 %2965 }
 0xb99   :  { %v2967_v49 = vrot.slane %v2966_v54, 2 }
 0xb9b   :  { %v2968_v53 = vsel %vm197_vm3, %v2966_v54, %v2967_v49  ;;  %v3626_v54 = vstv %s3815_s10 }
 0xb9c   :  { %3797 = vst.msk [vmem:[%s6229_s8 + $0x2a] sm:$0x3f] %vm5919_vm5, %v2968_v53  ;;  %v3558_v30 = vpop.permute.xlu1 %3557 }
 0xb9d   :  { %v3561_v39 = vsel %vm171_vm2, %v3556_v11, %v3558_v30  ;;  %v3562_v35 = vsel %vm171_vm2, %v3558_v30, %v3560_v29 }
 0xb9e   :  { %v3566_v58 = vadd.f32 %v3561_v39, %v3546_v0  ;;  %v3567_v15 = vadd.f32 %v3562_v35, %v3547_v41 }
 0xba4   :  { %v3578_v16 = vpop.permute.xlu1 %3577 }
 0xba5   :  { %v3581_v59 = vsel %vm197_vm3, %v3576_v32, %v3578_v16 }
 0xba6   :  { %v3586_v44 = vadd.f32 %v3581_v59, %v3566_v58 }
 0xba8   :  { %v3589_v13 = vmul.f32 %v3586_v44, %v6269_v12 }
 0xbaa   :  { %v3592_v25 = vsel %vm350_vm8, %v3589_v13, 0.0 }
 0xbac   :  { %v3580_v9 = vpop.permute.xlu1 %3579 }
 0xbad   :  { %v3582_v1 = vsel %vm197_vm3, %v3578_v16, %v3580_v9  ;;  %v3588_v56 = vadd.f32 %v3580_v9, %v3568_v7 }
 0xbae   :  { %v3587_v34 = vadd.f32 %v3582_v1, %v3567_v15 }
 0xbaf   :  { %v3591_v10 = vmul.f32 %v3588_v56, %v6268_v6 }
 0xbb0   :  { %v3590_v61 = vmul.f32 %v3587_v34, %v6270_v33 }
 0xbb1   :  { %v3595_v14 = vsel %vm354_vm9, %v3591_v10, 0.0 }
 0xbb2   :  { %v3593_v31 = vsel %vm350_vm8, %v3590_v61, 0.0 }
 0xbb3   :  { %v3594_v55 = vadd.f32 %v3593_v31, %v3592_v25 }
 0xbb5   :  { %v3596_v29 = vadd.f32 %v3595_v14, %v3594_v55 }
 0xbb7   :  { %3597 = vadd.xlane.f32.xlu1 %v3596_v29 }
 0xc2a   :  { %v3598_v5 = vpop.xlane.xlu1 %3597 }
 0xc2b   :  { %v3599_v24 = vrot.slane %v3598_v5, 4 }
 0xc2d   :  { %v3600_v32 = vadd.f32 %v3599_v24, %v3598_v5 }
 0xc2f   :  { %v3601_v18 = vrot.slane %v3600_v32, 2 }
 0xc31   :  { %v3602_v23 = vadd.f32 %v3601_v18, %v3600_v32 }
 0xc33   :  { %v3603_v12 = vrot.slane %v3602_v23, 1 }
 0xc35   :  { %v3604_v36 = vadd.f32 %v3603_v12, %v3602_v23 }
 0xc37   :  { %3849 = vpush %v3604_v36 }
 0xc68   :  { %s3850_s7 = spop %3849 }
 0xc69   :  { %v3606_v33 = vstv %s3850_s7 }
 0xc6a   :  { %v3607_v6 = vmul.f32 0.00048828125, %v3606_v33 }
 0xc6c   :  { %v3608_v57 = vadd.f32 1e-05, %v3607_v6 }
 0xc6e   :  { %3881 = vrsqrt.f32 %v3608_v57  ;;  %vm3615_vm1 = vweird.f32 %v3608_v57 }
 0xc74   :  { %v3882_v26 = vpop.eup %3881 }
 0xc75   :  { %v3610_v21 = vmul.f32 %v3882_v26, %v3608_v57  ;;  %vm3616_vm9 = vweird.f32 %v3882_v26 }
 0xc76   :  { %vm3617_vm11 = vmor %vm3615_vm1, %vm3616_vm9 }
 0xc77   :  { %v3611_v3 = vmul.f32 %v3882_v26, %v3610_v21 }
 0xc79   :  { %v3612_v43 = vmul.f32 0.5, %v3611_v3 }
 0xc7b   :  { %v3613_v22 = vsub.f32 1.5, %v3612_v43 }
 0xc7d   :  { %v3614_v19 = vmul.f32 %v3882_v26, %v3613_v22 }
 0xc7f   :  { %v3618_v4 = vsel %vm3617_vm11, %v3882_v26, %v3614_v19 }
 0xc80   :  { %v3621_v11 = vmul.f32 %v3620_v51, %v3618_v4 }
 0xc82   :  { %v3622_v49 = vmul.f32 %v3621_v11, %v3514_v52  ;;  %v3623_v53 = vmul.f32 %v3621_v11, %v3515_v45  ;;  %v3624_v30 = vmul.f32 %v3621_v11, %v3516_v17  ;;  %v3668_v40 = vmul.f32 %v3621_v11, %v6065_v27 }
 0xc83   :  { %v3669_v37 = vmul.f32 %v3621_v11, %v6103_v20  ;;  %v3670_v16 = vmul.f32 %v3621_v11, %v6033_v50  ;;  %v3643_v46 = vmul.f32 %v3621_v11, %v6037_v38  ;;  %v3644_v39 = vmul.f32 %v3621_v11, %v6050_v42 }
 0xc84   :  { %v3627_v0 = vadd.f32 %v3626_v54, %v3622_v49  ;;  %v3628_v60 = vadd.f32 %v3626_v54, %v3623_v53  ;;  %v3629_v62 = vadd.f32 %v3626_v54, %v3624_v30  ;;  %v3673_v59 = vadd.f32 %v3668_v40, %v3626_v54 }
 0xc85   :  { %v3674_v48 = vadd.f32 %v3669_v37, %v3626_v54  ;;  %v3675_v58 = vadd.f32 %v3670_v16, %v3626_v54  ;;  %v3645_v52 = vmul.f32 %v3621_v11, %v6061_v63  ;;  %v3648_v27 = vadd.f32 %v3643_v46, %v3626_v54 }
 0xc86   :  { %v3630_v45 = vmax.f32 %v3627_v0, 0.0  ;;  %v3631_v17 = vmax.f32 %v3628_v60, 0.0  ;;  %v3632_v35 = vmax.f32 %v3629_v62, 0.0  ;;  %v3649_v44 = vadd.f32 %v3644_v39, %v3626_v54 }
 0xc87   :  { %v3677_v41 = vmax.f32 %v3674_v48, 0.0  ;;  %v3678_v20 = vmax.f32 %v3675_v58, 0.0  ;;  %v3650_v50 = vadd.f32 %v3645_v52, %v3626_v54  ;;  %v3676_v15 = vmax.f32 %v3673_v59, 0.0 }
 0xc88   :  { %v3636_v7 = vrot.slane %v3631_v17, 6  ;;  %v3637_v38 = vrot.slane %v3632_v35, 4  ;;  %v3693_v42 = vmul.f32 %v3621_v11, %v6029_v47  ;;  %v3652_v56 = vmax.f32 %v3649_v44, 0.0 }
 0xc89   :  { %v3682_v9 = vrot.slane %v3677_v41, 6  ;;  %v3683_v1 = vrot.slane %v3678_v20, 4  ;;  %v3653_v13 = vmax.f32 %v3650_v50, 0.0  ;;  %v3651_v63 = vmax.f32 %v3648_v27, 0.0 }
 0xc8a   :  { %v3638_v34 = vsel %vm350_vm8, %v3630_v45, %v3636_v7  ;;  %v3694_v61 = vmul.f32 %v3621_v11, %v6112_v2  ;;  %v3695_v10 = vmul.f32 %v3621_v11, %v6119_v28  ;;  %v3657_v55 = vrot.slane %v3652_v56, 6 }
 0xc8b   :  { %v3639_v25 = vsel %vm2143_vm13, %v3638_v34, %v3637_v38  ;;  %v3684_v31 = vsel %vm350_vm8, %v3676_v15, %v3682_v9  ;;  %v3658_v14 = vrot.slane %v3653_v13, 4  ;;  %v3698_v28 = vadd.f32 %v3693_v42, %v3626_v54 }
 0xc8c   :  { %3816 = vst.msk [vmem:[%s6229_s8 + $0x30] sm:$0x3f] %vm5919_vm5, %v3639_v25  ;;  %v3685_v47 = vsel %vm2143_vm13, %v3684_v31, %v3683_v1  ;;  %v3699_v29 = vadd.f32 %v3694_v61, %v3626_v54  ;;  %v3700_v5 = vadd.f32 %v3695_v10, %v3626_v54  ;;  %v3659_v2 = vsel %vm350_vm8, %v3651_v63, %v3657_v55 }
 0xc8d   :  { %3686 = vrot.lane.b32.xlu0 %v3685_v47, %s3953_s3  ;;  %v3660_v24 = vsel %vm2143_vm13, %v3659_v2, %v3658_v14  ;;  %v3701_v12 = vmax.f32 %v3698_v28, 0.0 }
 0xc8e   :  { %v3702_v32 = vmax.f32 %v3699_v29, 0.0  ;;  %v3703_v18 = vmax.f32 %v3700_v5, 0.0  ;;  %3661 = vrot.lane.b32.xlu2 %v3660_v24, %s3951_s18 }
 0xc90   :  { %v3707_v23 = vrot.slane %v3702_v32, 6  ;;  %v3708_v36 = vrot.slane %v3703_v18, 4 }
 0xc92   :  { %v3709_v33 = vsel %vm350_vm8, %v3701_v12, %v3707_v23 }
 0xc93   :  { %v3710_v6 = vsel %vm2143_vm13, %v3709_v33, %v3708_v36 }
 0xc96   :  { %3711 = vrot.lane.b32.xlu2 %v3710_v6, %s3954_s20 }
 0xce8   :  { %v3662_v57 = vpop.permute.xlu2 %3661 }
 0xce9   :  { %v3663_v26 = vrot.slane %v3662_v57, 2 }
 0xceb   :  { %v3664_v21 = vsel %vm119_vm0, %v3662_v57, %v3663_v26 }
 0xcec   :  { %3818 = vst.msk [vmem:[%s6229_s8 + $0x36] sm:$0x3f] %vm5919_vm5, %v3664_v21 }
 0xcf0   :  { %v3712_v3 = vpop.permute.xlu2 %3711 }
 0xcf1   :  { %v3713_v43 = vrot.slane %v3712_v3, 2 }
 0xcf3   :  { %v3714_v22 = vsel %vm197_vm3, %v3712_v3, %v3713_v43 }
 0xcf4   :  { %3822 = vst.msk [vmem:[%s6229_s8 + $0x42] sm:$0x3f] %vm5919_vm5, %v3714_v22 }
 0xcff   :  { %v3687_v19 = vpop.permute.xlu0 %3686 }
 0xd00   :  { %v3688_v51 = vrot.slane %v3687_v19, 2 }
 0xd02   :  { %v3689_v4 = vsel %vm171_vm2, %v3687_v19, %v3688_v51 }
 0xd03   :  { %3820 = vst.msk [vmem:[%s6229_s8 + $0x3c] sm:$0x3f] %vm5919_vm5, %v3689_v4 }
 0xd04   :  { %3722 = vsyncpa [#allocation4], 1 }
 0xd05   :  { %3723 = vsyncpa [#allocation6], 1 }
 0xd06   :  { %3724 = vsyncpa [#allocation9], 1 }

</bundles_post_ra>
